<compile_context>
chip_gen: v6e
topology: v6e:2x2x1
jax: 0.10.0
libtpu: 0.0.40
codegen_flags: <defaults>
</compile_context>

<pallas_src>
import functools
import math

import numpy as np
import jax
import jax.numpy as jnp
from jax.experimental import pallas as pl
from jax.experimental.pallas import tpu as pltpu


# ------------------------- init-time operator builders ----------------------

def _convT_matrix_np(w_pt, stride, padding, in_hw):
    """Dense operator of ConvTranspose2d(bias=False) in NHWC-flat coordinates.

    w_pt: (Cin, Cout, K, K) numpy array (PyTorch ConvTranspose2d weight).
    Returns (M, (Ho, Wo)) with M of shape (H*W*Cin, Ho*Wo*Cout) such that
    flatten_nhwc(out) = flatten_nhwc(in) @ M, using the transposed-conv
    relation  out[ih*stride - padding + kh, ...] += in[ih, ...] * W[..., kh, kw].
    """
    cin, cout, k, _ = w_pt.shape
    h, wsp = in_hw
    ho = (h - 1) * stride - 2 * padding + k
    wo = (wsp - 1) * stride - 2 * padding + k
    m = np.zeros((h * wsp * cin, ho * wo * cout), np.float32)
    for ih in range(h):
        for kh in range(k):
            oh = ih * stride - padding + kh
            if not 0 <= oh < ho:
                continue
            for iw in range(wsp):
                for kw in range(k):
                    ow = iw * stride - padding + kw
                    if not 0 <= ow < wo:
                        continue
                    r = (ih * wsp + iw) * cin
                    c = (oh * wo + ow) * cout
                    m[r:r + cin, c:c + cout] += w_pt[:, :, kh, kw]
    return m, (ho, wo)


# ------------------------------- Pallas kernel -------------------------------

def _gen_kernel(*refs, nb_blocks, channels, gb_slot):
    """Entire Gen forward in one kernel (single grid step, whole batch).

    Ref layout (all full arrays, VMEM resident):
      refs[0]                z, (N, nz) f32 (per-stage slicing folded into ops)
      refs[1]                packed gamma/beta, (2, gb_slot * n_bn) f32
      next 3                 pre block:   M (bf16), P (bf16), Pt (bf16)
      next 4 per block       block i:     Mx, Mz, P, Pt (all bf16)
      next 1                 post block:  M (bf16, NCHW-flat output columns)
      refs[-1]               output       (N, nc*Ho*Wo) f32
    """
    z_ref, gb_ref = refs[0], refs[1]
    idx = 2
    pre_refs = refs[idx:idx + 3]
    idx += 3
    blk_refs = [refs[idx + 4 * i: idx + 4 * (i + 1)] for i in range(nb_blocks)]
    idx += 4 * nb_blocks
    post_m_ref = refs[idx]
    o_ref = refs[idx + 1]

    z_bf = z_ref[...].astype(jnp.bfloat16)

    def bn_relu(y, layer, p_ref, pt_ref):
        # Training-mode BatchNorm2d (exact batch stats over the full N*H*W
        # extent, biased variance, eps=1e-5) + ReLU on an NHWC-flat activation
        # y of shape (N, H*W*C).  One fused (2,HWC)@P pooling dot and one
        # fused (2,C)@Pt broadcast dot; all elementwise math stays f32.
        # TODO(synk): running_mean/running_var EMA of PyTorch train-mode BN is
        # not tracked (it does not affect this forward pass).
        c = channels[layer]
        off = gb_slot * layer
        gamma = gb_ref[0:1, off:off + c]                            # (1, C) f32
        beta = gb_ref[1:2, off:off + c]
        inv_cnt = 1.0 / float(y.shape[0] * (y.shape[1] // c))       # 1/(N*H*W)
        s12 = jnp.concatenate(
            [jnp.sum(y, axis=0, keepdims=True),
             jnp.sum(y * y, axis=0, keepdims=True)], axis=0)        # (2, HWC)
        stats = jnp.dot(s12.astype(jnp.bfloat16), p_ref[...],
                        preferred_element_type=jnp.float32) * inv_cnt  # (2, C)
        mean = stats[0:1]
        var = jnp.maximum(stats[1:2] - mean * mean, 0.0)            # clamp E[x^2]-m^2
        scale = gamma * jax.lax.rsqrt(var + 1e-5)
        shift = beta - mean * scale
        ss = jnp.concatenate([scale, shift], axis=0)                # (2, C)
        ssf = jnp.dot(ss.astype(jnp.bfloat16), pt_ref[...],
                      preferred_element_type=jnp.float32)           # (2, HWC)
        return jnp.maximum(y * ssf[0:1] + ssf[1:2], 0.0)

    # pre block: ConvTranspose2d(nzpb, nf, 4, 1, 0) on a 1x1 input == matmul.
    m_ref, p_ref, pt_ref = pre_refs
    x = jnp.dot(z_bf, m_ref[...], preferred_element_type=jnp.float32)
    x = bn_relu(x, 0, p_ref, pt_ref)

    # intermediate blocks: ConvTranspose2d(nf+nzpb, nf//2, 4, 2, 1); the
    # spatially-broadcast zi concat folds into the extra `Mz` matmul.
    for i in range(nb_blocks):
        mx_ref, mz_ref, p_ref, pt_ref = blk_refs[i]
        y = jnp.dot(x.astype(jnp.bfloat16), mx_ref[...],
                    preferred_element_type=jnp.float32)
        y = y + jnp.dot(z_bf, mz_ref[...], preferred_element_type=jnp.float32)
        x = bn_relu(y, i + 1, p_ref, pt_ref)

    # post block: ConvTranspose2d(nf, nc, 4, 2, 1) + tanh, stored NCHW-flat
    # (lane-dense store, already in PyTorch order).
    y = jnp.dot(x.astype(jnp.bfloat16), post_m_ref[...],
                preferred_element_type=jnp.float32)
    o_ref[...] = jnp.tanh(y)


# ------------------------ Gen: params + forward pass -------------------------

def init_gen_params(key, nz=16, ngf=8, nc=1, w=16, nb_blocks=None):
    """Mirrors Gen.__init__ + weights_init (Conv ~ N(0,0.02), BN gamma ~
    N(1,0.02), beta=0) and precomputes the dense per-layer operators (bf16)
    plus packed BN affine params for the fused Pallas kernel."""
    if nb_blocks is None:
        nb_blocks = int(math.log(w) / math.log(2)) - 3
    nf = ngf * 2 ** (nb_blocks + 1)
    nzpb = nz // (nb_blocks + 1)

    keys = jax.random.split(key, 2 * (nb_blocks + 2))
    ki = 0
    w_pre = 0.02 * jax.random.normal(keys[ki], (nzpb, nf, 4, 4), jnp.float32); ki += 1
    g_pre = 1.0 + 0.02 * jax.random.normal(keys[ki], (nf,), jnp.float32); ki += 1
    raw_blocks = []
    cur = nf
    for _ in range(nb_blocks):
        wb = 0.02 * jax.random.normal(keys[ki], (cur + nzpb, cur // 2, 4, 4),
                                      jnp.float32); ki += 1
        gb = 1.0 + 0.02 * jax.random.normal(keys[ki], (cur // 2,), jnp.float32); ki += 1
        raw_blocks.append((np.asarray(wb), np.asarray(gb)))
        cur //= 2
    w_post = 0.02 * jax.random.normal(keys[ki], (cur, nc, 4, 4), jnp.float32); ki += 1

    def bn_pool_mats(hw, c):
        # 0/1 pool (HWC -> C) and broadcast (C -> HWC) matrices; exact in bf16.
        p = np.tile(np.eye(c, dtype=np.float32), (hw, 1))           # (hw*c, c)
        return (jnp.asarray(p, jnp.bfloat16),
                jnp.asarray(np.ascontiguousarray(p.T), jnp.bfloat16))

    # --- pre block operator (1x1 input, stride 1, pad 0); fold z slicing by
    # zero-padding rows to the full nz contraction dim.
    m_pre, (h, wsp) = _convT_matrix_np(np.asarray(w_pre), 1, 0, (1, 1))
    m_pre_full = np.zeros((nz, m_pre.shape[1]), np.float32)
    m_pre_full[:nzpb] = m_pre
    p_pre, pt_pre = bn_pool_mats(h * wsp, nf)

    channels = [nf]
    flat_dims = [h * wsp * nf]
    ops = [jnp.asarray(m_pre_full, jnp.bfloat16), p_pre, pt_pre]
    gammas = [np.asarray(g_pre)]
    betas = [np.zeros(nf, np.float32)]
    f32_blocks = []

    c_in = nf
    for bi, (wb_np, gb_np) in enumerate(raw_blocks):
        c_out = wb_np.shape[1]
        mx, (ho, wo) = _convT_matrix_np(wb_np[:c_in], 2, 1, (h, wsp))
        mz_op, _ = _convT_matrix_np(wb_np[c_in:], 2, 1, (h, wsp))
        # zi is spatially constant -> its contribution is the spatial sum of
        # its operator rows (this is the fused `repeat` + `cat`), zero-padded
        # to the full nz contraction dim (this is the fused z slicing).
        mz = mz_op.reshape(h * wsp, nzpb, -1).sum(axis=0)
        mz_full = np.zeros((nz, mz.shape[1]), np.float32)
        mz_full[(bi + 1) * nzpb:(bi + 2) * nzpb] = mz
        p_b, pt_b = bn_pool_mats(ho * wo, c_out)
        ops += [jnp.asarray(mx, jnp.bfloat16), jnp.asarray(mz_full, jnp.bfloat16),
                p_b, pt_b]
        channels.append(c_out)
        flat_dims.append(ho * wo * c_out)
        gammas.append(gb_np)
        betas.append(np.zeros(c_out, np.float32))
        f32_blocks.append((mx, mz_full))
        h, wsp, c_in = ho, wo, c_out

    # --- post block operator; permute columns to NCHW-flat so the kernel's
    # single store is lane-dense and already in PyTorch layout.
    m_post, (ho, wo) = _convT_matrix_np(np.asarray(w_post), 2, 1, (h, wsp))
    m_post = m_post.reshape(h * wsp * c_in, ho * wo, nc)
    m_post = np.ascontiguousarray(m_post.transpose(0, 2, 1)).reshape(
        h * wsp * c_in, nc * ho * wo)
    ops.append(jnp.asarray(m_post, jnp.bfloat16))
    flat_dims.append(nc * ho * wo)

    # packed per-layer BN affine params (f32, one lane-aligned slot per layer).
    gb_slot = ((max(channels) + 127) // 128) * 128
    gb_all = np.zeros((2, gb_slot * len(channels)), np.float32)
    for j, (g, b) in enumerate(zip(gammas, betas)):
        gb_all[0, gb_slot * j:gb_slot * j + g.shape[0]] = g
        gb_all[1, gb_slot * j:gb_slot * j + b.shape[0]] = b

    return dict(
        nb_blocks=nb_blocks, nz=nz, nzpb=nzpb, nc=nc, out_hw=(ho, wo),
        channels=tuple(channels), flat_dims=tuple(flat_dims),
        gb_slot=gb_slot, gb_all=jnp.asarray(gb_all), ops=ops,
        f32=dict(m_pre=m_pre_full, blocks=f32_blocks, m_post=m_post,
                 gammas=gammas, betas=betas))


def make_gen_forward(params):
    nb_blocks = params["nb_blocks"]
    nz = params["nz"]
    nc = params["nc"]
    ho, wo = params["out_hw"]
    out_dim = nc * ho * wo
    channels = params["channels"]
    flat_dims = params["flat_dims"]
    gb_all = params["gb_all"]
    ops = params["ops"]
    weight_bytes = int(gb_all.nbytes) + sum(int(a.nbytes) for a in ops)

    kernel = functools.partial(_gen_kernel, nb_blocks=nb_blocks,
                               channels=channels, gb_slot=params["gb_slot"])

    # TODO(synk): single grid step keeps BN batch statistics exact at this toy
    # size but uses one TensorCore on v7x; for larger N add a size-2 "parallel"
    # batch grid with a cross-core reduction of the BN partial sums.
    @jax.jit
    def forward(z):
        # z: (N, nz, 1, 1) as in PyTorch.  Returns (N, nc, Ho, Wo), act='tanh'.
        n = z.shape[0]
        z2 = z.reshape(n, nz).astype(jnp.float32)

        # Advisory cost estimate for XLA scheduling around the custom call.
        io_bytes = weight_bytes + n * nz * 4 + n * out_dim * 4
        k_dims = [nz] + list(flat_dims[:-1])
        flops = sum(2 * n * k * d for k, d in zip(k_dims, flat_dims))       # conv dots
        flops += sum(2 * n * nz * d for d in flat_dims[1:-1])               # Mz dots
        flops += sum(8 * d + 8 * d * c for d, c in
                     zip(flat_dims[:-1], channels))                         # BN dots/elemwise
        transcendentals = n * out_dim + sum(channels)                       # tanh + rsqrt

        # VMEM budget derived from actual resident sizes (+ slack for temps).
        act_bytes = 6 * n * max(flat_dims) * 4
        vmem_limit = int(min(100 << 20,
                             max(8 << 20, 2 * io_bytes + act_bytes + (2 << 20))))

        out_flat = pl.pallas_call(
            kernel,
            out_shape=jax.ShapeDtypeStruct((n, out_dim), jnp.float32),
            compiler_params=pltpu.CompilerParams(vmem_limit_bytes=vmem_limit),
            cost_estimate=pl.CostEstimate(
                flops=int(flops),
                transcendentals=int(transcendentals),
                bytes_accessed=int(io_bytes)),
        )(z2, gb_all, *ops)
        return out_flat.reshape(n, nc, ho, wo)

    return forward


# ---------------- pure-NumPy f32 reference (validates the bf16 path) ---------

def _reference_forward_f32(params, z):
    f = params["f32"]
    channels = params["channels"]
    n = z.shape[0]
    z2 = np.asarray(z, np.float32).reshape(n, -1)

    def bn_relu(y, c, g, b):
        yr = y.reshape(n, -1, c)
        mean = yr.mean(axis=(0, 1))
        var = yr.var(axis=(0, 1))          # biased, matches train-mode BN
        yn = (yr - mean) / np.sqrt(var + 1e-5) * g + b
        return np.maximum(yn, 0.0).reshape(n, -1)

    x = bn_relu(z2 @ f["m_pre"], channels[0], f["gammas"][0], f["betas"][0])
    for i, (mx, mz) in enumerate(f["blocks"]):
        x = bn_relu(x @ mx + z2 @ mz, channels[i + 1],
                    f["gammas"][i + 1], f["betas"][i + 1])
    return np.tanh(x @ f["m_post"])


if __name__ == "__main__":
    key = jax.random.PRNGKey(0)
    kp, kz = jax.random.split(key)
    # small config consistent with Gen: nz=16, ngf=8, nc=1, w=16
    #   -> nb_blocks = 1, nf = 32, nz_per_block = 8, output (N, 1, 16, 16)
    nz, ngf, nc, w = 16, 8, 1, 16
    params = init_gen_params(kp, nz=nz, ngf=ngf, nc=nc, w=w)
    forward = make_gen_forward(params)
    z = jax.random.normal(kz, (2, nz, 1, 1), jnp.float32)
    out = jax.block_until_ready(forward(z))
    assert out.shape == (2, nc, w, w), out.shape
    assert bool(jnp.all(jnp.isfinite(out)))
    # bf16-operator path validated against the f32 dense-operator reference.
    ref = _reference_forward_f32(params, np.asarray(z))
    err = float(np.max(np.abs(np.asarray(out).reshape(2, -1) - ref)))
    assert err < 0.08, err
    print("KERNEL_OK")
</pallas_src>

<mosaic_0001>
module attributes {stable_mosaic.version = 11 : i64} {
  func.func @_gen_kernel(%arg0: memref<2x16xf32, #tpu.memory_space<vmem>>, %arg1: memref<2x256xf32, #tpu.memory_space<vmem>>, %arg2: memref<16x512xbf16, #tpu.memory_space<vmem>>, %arg3: memref<512x32xbf16, #tpu.memory_space<vmem>>, %arg4: memref<32x512xbf16, #tpu.memory_space<vmem>>, %arg5: memref<512x1024xbf16, #tpu.memory_space<vmem>>, %arg6: memref<16x1024xbf16, #tpu.memory_space<vmem>>, %arg7: memref<1024x16xbf16, #tpu.memory_space<vmem>>, %arg8: memref<16x1024xbf16, #tpu.memory_space<vmem>>, %arg9: memref<1024x256xbf16, #tpu.memory_space<vmem>>, %arg10: memref<2x256xf32, #tpu.memory_space<vmem>>) attributes {dimension_semantics = [], scalar_prefetch = 0 : i64, scratch_operands = 0 : i64, tpu.core_type = #tpu.core_type<tc>} {
    %c0 = arith.constant 0 : index
    %c0_0 = arith.constant 0 : index
    %0 = vector.load %arg0[%c0, %c0_0] : memref<2x16xf32, #tpu.memory_space<vmem>>, vector<2x16xf32>
    %1 = arith.truncf %0 : vector<2x16xf32> to vector<2x16xbf16>
    %c0_1 = arith.constant 0 : index
    %c0_2 = arith.constant 0 : index
    %2 = vector.load %arg2[%c0_1, %c0_2] : memref<16x512xbf16, #tpu.memory_space<vmem>>, vector<16x512xbf16>
    %cst = arith.constant dense<0.000000e+00> : vector<2x512xf32>
    %3 = tpu.matmul %1, %2, %cst {dimension_numbers = #tpu.dot_dimension_numbers<[1], [0], [0], [1], [0, 0, 1, 1], [], []>} : vector<2x16xbf16>, vector<16x512xbf16>, vector<2x512xf32> -> vector<2x512xf32>
    %c0_3 = arith.constant 0 : index
    %c0_4 = arith.constant 0 : index
    %4 = vector.load %arg1[%c0_3, %c0_4] : memref<2x256xf32, #tpu.memory_space<vmem>>, vector<1x32xf32>
    %c1 = arith.constant 1 : index
    %c0_5 = arith.constant 0 : index
    %5 = vector.load %arg1[%c1, %c0_5] : memref<2x256xf32, #tpu.memory_space<vmem>>, vector<1x32xf32>
    %cst_6 = arith.constant dense<0.000000e+00> : vector<512xf32>
    %6 = vector.multi_reduction <add>, %3, %cst_6 [0] : vector<2x512xf32> to vector<512xf32>
    %7 = vector.shape_cast %6 : vector<512xf32> to vector<1x512xf32>
    %8 = arith.mulf %3, %3 : vector<2x512xf32>
    %cst_7 = arith.constant dense<0.000000e+00> : vector<512xf32>
    %9 = vector.multi_reduction <add>, %8, %cst_7 [0] : vector<2x512xf32> to vector<512xf32>
    %10 = vector.shape_cast %9 : vector<512xf32> to vector<1x512xf32>
    %11 = tpu.concatenate %7, %10 in 0 : vector<1x512xf32>, vector<1x512xf32> -> vector<2x512xf32>
    %12 = arith.truncf %11 : vector<2x512xf32> to vector<2x512xbf16>
    %c0_8 = arith.constant 0 : index
    %c0_9 = arith.constant 0 : index
    %13 = vector.load %arg3[%c0_8, %c0_9] : memref<512x32xbf16, #tpu.memory_space<vmem>>, vector<512x32xbf16>
    %cst_10 = arith.constant dense<0.000000e+00> : vector<2x32xf32>
    %14 = tpu.matmul %12, %13, %cst_10 {dimension_numbers = #tpu.dot_dimension_numbers<[1], [0], [0], [1], [0, 0, 1, 1], [], []>} : vector<2x512xbf16>, vector<512x32xbf16>, vector<2x32xf32> -> vector<2x32xf32>
    %cst_11 = arith.constant 3.125000e-02 : f32
    %15 = vector.broadcast %cst_11 : f32 to vector<2x32xf32>
    %16 = arith.mulf %14, %15 : vector<2x32xf32>
    %17 = vector.extract_strided_slice %16 {offsets = [0, 0], sizes = [1, 32], strides = [1, 1]} : vector<2x32xf32> to vector<1x32xf32>
    %18 = vector.extract_strided_slice %16 {offsets = [1, 0], sizes = [1, 32], strides = [1, 1]} : vector<2x32xf32> to vector<1x32xf32>
    %19 = arith.mulf %17, %17 : vector<1x32xf32>
    %20 = arith.subf %18, %19 : vector<1x32xf32>
    %cst_12 = arith.constant 0.000000e+00 : f32
    %21 = vector.broadcast %cst_12 : f32 to vector<1x32xf32>
    %22 = arith.maximumf %20, %21 : vector<1x32xf32>
    %cst_13 = arith.constant 9.99999974E-6 : f32
    %23 = vector.broadcast %cst_13 : f32 to vector<1x32xf32>
    %24 = arith.addf %22, %23 : vector<1x32xf32>
    %25 = math.rsqrt %24 : vector<1x32xf32>
    %26 = arith.mulf %4, %25 : vector<1x32xf32>
    %27 = arith.mulf %17, %26 : vector<1x32xf32>
    %28 = arith.subf %5, %27 : vector<1x32xf32>
    %29 = tpu.concatenate %26, %28 in 0 : vector<1x32xf32>, vector<1x32xf32> -> vector<2x32xf32>
    %30 = arith.truncf %29 : vector<2x32xf32> to vector<2x32xbf16>
    %c0_14 = arith.constant 0 : index
    %c0_15 = arith.constant 0 : index
    %31 = vector.load %arg4[%c0_14, %c0_15] : memref<32x512xbf16, #tpu.memory_space<vmem>>, vector<32x512xbf16>
    %cst_16 = arith.constant dense<0.000000e+00> : vector<2x512xf32>
    %32 = tpu.matmul %30, %31, %cst_16 {dimension_numbers = #tpu.dot_dimension_numbers<[1], [0], [0], [1], [0, 0, 1, 1], [], []>} : vector<2x32xbf16>, vector<32x512xbf16>, vector<2x512xf32> -> vector<2x512xf32>
    %33 = vector.extract_strided_slice %32 {offsets = [0, 0], sizes = [1, 512], strides = [1, 1]} : vector<2x512xf32> to vector<1x512xf32>
    %34 = vector.broadcast %33 : vector<1x512xf32> to vector<2x512xf32>
    %35 = arith.mulf %3, %34 : vector<2x512xf32>
    %36 = vector.extract_strided_slice %32 {offsets = [1, 0], sizes = [1, 512], strides = [1, 1]} : vector<2x512xf32> to vector<1x512xf32>
    %37 = vector.broadcast %36 : vector<1x512xf32> to vector<2x512xf32>
    %38 = arith.addf %35, %37 : vector<2x512xf32>
    %cst_17 = arith.constant 0.000000e+00 : f32
    %39 = vector.broadcast %cst_17 : f32 to vector<2x512xf32>
    %40 = arith.maximumf %38, %39 : vector<2x512xf32>
    %41 = arith.truncf %40 : vector<2x512xf32> to vector<2x512xbf16>
    %c0_18 = arith.constant 0 : index
    %c0_19 = arith.constant 0 : index
    %42 = vector.load %arg5[%c0_18, %c0_19] : memref<512x1024xbf16, #tpu.memory_space<vmem>>, vector<512x1024xbf16>
    %cst_20 = arith.constant dense<0.000000e+00> : vector<2x1024xf32>
    %43 = tpu.matmul %41, %42, %cst_20 {dimension_numbers = #tpu.dot_dimension_numbers<[1], [0], [0], [1], [0, 0, 1, 1], [], []>} : vector<2x512xbf16>, vector<512x1024xbf16>, vector<2x1024xf32> -> vector<2x1024xf32>
    %c0_21 = arith.constant 0 : index
    %c0_22 = arith.constant 0 : index
    %44 = vector.load %arg6[%c0_21, %c0_22] : memref<16x1024xbf16, #tpu.memory_space<vmem>>, vector<16x1024xbf16>
    %cst_23 = arith.constant dense<0.000000e+00> : vector<2x1024xf32>
    %45 = tpu.matmul %1, %44, %cst_23 {dimension_numbers = #tpu.dot_dimension_numbers<[1], [0], [0], [1], [0, 0, 1, 1], [], []>} : vector<2x16xbf16>, vector<16x1024xbf16>, vector<2x1024xf32> -> vector<2x1024xf32>
    %46 = arith.addf %43, %45 : vector<2x1024xf32>
    %c0_24 = arith.constant 0 : index
    %c128 = arith.constant 128 : index
    %47 = vector.load %arg1[%c0_24, %c128] : memref<2x256xf32, #tpu.memory_space<vmem>>, vector<1x16xf32>
    %c1_25 = arith.constant 1 : index
    %c128_26 = arith.constant 128 : index
    %48 = vector.load %arg1[%c1_25, %c128_26] : memref<2x256xf32, #tpu.memory_space<vmem>>, vector<1x16xf32>
    %cst_27 = arith.constant dense<0.000000e+00> : vector<1024xf32>
    %49 = vector.multi_reduction <add>, %46, %cst_27 [0] : vector<2x1024xf32> to vector<1024xf32>
    %50 = vector.shape_cast %49 : vector<1024xf32> to vector<1x1024xf32>
    %51 = arith.mulf %46, %46 : vector<2x1024xf32>
    %cst_28 = arith.constant dense<0.000000e+00> : vector<1024xf32>
    %52 = vector.multi_reduction <add>, %51, %cst_28 [0] : vector<2x1024xf32> to vector<1024xf32>
    %53 = vector.shape_cast %52 : vector<1024xf32> to vector<1x1024xf32>
    %54 = tpu.concatenate %50, %53 in 0 : vector<1x1024xf32>, vector<1x1024xf32> -> vector<2x1024xf32>
    %55 = arith.truncf %54 : vector<2x1024xf32> to vector<2x1024xbf16>
    %c0_29 = arith.constant 0 : index
    %c0_30 = arith.constant 0 : index
    %56 = vector.load %arg7[%c0_29, %c0_30] : memref<1024x16xbf16, #tpu.memory_space<vmem>>, vector<1024x16xbf16>
    %cst_31 = arith.constant dense<0.000000e+00> : vector<2x16xf32>
    %57 = tpu.matmul %55, %56, %cst_31 {dimension_numbers = #tpu.dot_dimension_numbers<[1], [0], [0], [1], [0, 0, 1, 1], [], []>} : vector<2x1024xbf16>, vector<1024x16xbf16>, vector<2x16xf32> -> vector<2x16xf32>
    %cst_32 = arith.constant 7.812500e-03 : f32
    %58 = vector.broadcast %cst_32 : f32 to vector<2x16xf32>
    %59 = arith.mulf %57, %58 : vector<2x16xf32>
    %60 = vector.extract_strided_slice %59 {offsets = [0, 0], sizes = [1, 16], strides = [1, 1]} : vector<2x16xf32> to vector<1x16xf32>
    %61 = vector.extract_strided_slice %59 {offsets = [1, 0], sizes = [1, 16], strides = [1, 1]} : vector<2x16xf32> to vector<1x16xf32>
    %62 = arith.mulf %60, %60 : vector<1x16xf32>
    %63 = arith.subf %61, %62 : vector<1x16xf32>
    %cst_33 = arith.constant 0.000000e+00 : f32
    %64 = vector.broadcast %cst_33 : f32 to vector<1x16xf32>
    %65 = arith.maximumf %63, %64 : vector<1x16xf32>
    %cst_34 = arith.constant 9.99999974E-6 : f32
    %66 = vector.broadcast %cst_34 : f32 to vector<1x16xf32>
    %67 = arith.addf %65, %66 : vector<1x16xf32>
    %68 = math.rsqrt %67 : vector<1x16xf32>
    %69 = arith.mulf %47, %68 : vector<1x16xf32>
    %70 = arith.mulf %60, %69 : vector<1x16xf32>
    %71 = arith.subf %48, %70 : vector<1x16xf32>
    %72 = tpu.concatenate %69, %71 in 0 : vector<1x16xf32>, vector<1x16xf32> -> vector<2x16xf32>
    %73 = arith.truncf %72 : vector<2x16xf32> to vector<2x16xbf16>
    %c0_35 = arith.constant 0 : index
    %c0_36 = arith.constant 0 : index
    %74 = vector.load %arg8[%c0_35, %c0_36] : memref<16x1024xbf16, #tpu.memory_space<vmem>>, vector<16x1024xbf16>
    %cst_37 = arith.constant dense<0.000000e+00> : vector<2x1024xf32>
    %75 = tpu.matmul %73, %74, %cst_37 {dimension_numbers = #tpu.dot_dimension_numbers<[1], [0], [0], [1], [0, 0, 1, 1], [], []>} : vector<2x16xbf16>, vector<16x1024xbf16>, vector<2x1024xf32> -> vector<2x1024xf32>
    %76 = vector.extract_strided_slice %75 {offsets = [0, 0], sizes = [1, 1024], strides = [1, 1]} : vector<2x1024xf32> to vector<1x1024xf32>
    %77 = vector.broadcast %76 : vector<1x1024xf32> to vector<2x1024xf32>
    %78 = arith.mulf %46, %77 : vector<2x1024xf32>
    %79 = vector.extract_strided_slice %75 {offsets = [1, 0], sizes = [1, 1024], strides = [1, 1]} : vector<2x1024xf32> to vector<1x1024xf32>
    %80 = vector.broadcast %79 : vector<1x1024xf32> to vector<2x1024xf32>
    %81 = arith.addf %78, %80 : vector<2x1024xf32>
    %cst_38 = arith.constant 0.000000e+00 : f32
    %82 = vector.broadcast %cst_38 : f32 to vector<2x1024xf32>
    %83 = arith.maximumf %81, %82 : vector<2x1024xf32>
    %84 = arith.truncf %83 : vector<2x1024xf32> to vector<2x1024xbf16>
    %c0_39 = arith.constant 0 : index
    %c0_40 = arith.constant 0 : index
    %85 = vector.load %arg9[%c0_39, %c0_40] : memref<1024x256xbf16, #tpu.memory_space<vmem>>, vector<1024x256xbf16>
    %cst_41 = arith.constant dense<0.000000e+00> : vector<2x256xf32>
    %86 = tpu.matmul %84, %85, %cst_41 {dimension_numbers = #tpu.dot_dimension_numbers<[1], [0], [0], [1], [0, 0, 1, 1], [], []>} : vector<2x1024xbf16>, vector<1024x256xbf16>, vector<2x256xf32> -> vector<2x256xf32>
    %87 = math.tanh %86 : vector<2x256xf32>
    %c0_42 = arith.constant 0 : index
    %c0_43 = arith.constant 0 : index
    %88 = vector.load %arg10[%c0_42, %c0_43] : memref<2x256xf32, #tpu.memory_space<vmem>>, vector<2x256xf32>
    tpu.vector_store %arg10[%c0_42, %c0_43], %87 {strides = array<i32>} : memref<2x256xf32, #tpu.memory_space<vmem>>, vector<2x256xf32>,
    return
  }
}

</mosaic_0001>

<bundles_post_ra>
// kernel: forward.1
= control target key start
LH: loop header
LB: loop body
LE: loop exit
PB: predicated region body
PF: predicated region fallthrough
CT: control target
= control target key end

     0   :  { %15 = vsyncpa [#allocation3], 0  ;;  %s6660_s0 = inlined_call_operand.hbm [shape: f32[2,16], index: 0, kind: input, shape index: {}]   ;;  %s6661_s1 = inlined_call_operand.hbm [shape: f32[2,256], index: 1, kind: input, shape index: {}]   ;;  %s6662_s2 = inlined_call_operand.hbm [shape: bf16[16,512], index: 2, kind: input, shape index: {}]   ;;  %s6663_s3 = inlined_call_operand.hbm [shape: bf16[512,32], index: 3, kind: input, shape index: {}]   ;;  %s6664_s4 = inlined_call_operand.hbm [shape: bf16[32,512], index: 4, kind: input, shape index: {}]   ;;  %s6665_s5 = inlined_call_operand.hbm [shape: bf16[512,1024], index: 5, kind: input, shape index: {}]   ;;  %s6666_s6 = inlined_call_operand.hbm [shape: bf16[16,1024], index: 6, kind: input, shape index: {}]   ;;  %s6667_s7 = inlined_call_operand.hbm [shape: bf16[1024,16], index: 7, kind: input, shape index: {}]   ;;  %s6668_s8 = inlined_call_operand.hbm [shape: bf16[16,1024], index: 8, kind: input, shape index: {}]   ;;  %s6669_s9 = inlined_call_operand.hbm [shape: bf16[1024,256], index: 9, kind: input, shape index: {}]   ;;  %s6670_s10 = inlined_call_operand.vmem [shape: f32[2,256], index: 10, kind: output, shape index: {}]  }
   0x1   :  { %16 = vsyncpa [#allocation5], 0 }
   0x2   :  { %17 = vsyncpa [#allocation8], 0 }
   0x3   :  { %18 = vsyncpa [#allocation11], 0 }
   0x4   :  { %19 = vsyncpa [#allocation14], 0 }
   0x5   :  { %20 = vsyncpa [#allocation17], 0  ;;  %s6286_s13 = smov [#allocation4]   ;;  %s6287_s15 = smov [#allocation7]  }
   0x6   :  { %s37_s14 = sshll.u32 %s6286_s13, 4  ;;  %s58_s16 = sshll.u32 %s6287_s15, 4  ;;  %s38_s14 = int_to_ptr.vmem [resolvable:$true] %s37_s14  ;;  %s59_s16 = int_to_ptr.vmem [resolvable:$true] %s58_s16 }
   0x7   :  { %s6082_s17 = scalar_lea.vmem %s38_s14, 64  ;;  %p6087_p1 = scmp.lt.s32.totalorder %s38_s14, %s38_s14 }
   0x8   :  { %p6083_p0 = scmp.ne.s32.totalorder %s38_s14, %s6082_s17  ;;  %p6088_p2 = scmp.lt.s32.totalorder %s6082_s17, %s6082_s17 }
   0xa   :  { %p6089_p3 = por %p6088_p2, %p6087_p1 }
   0xc   :  { %p6090_p4 = pnand %p6089_p3, %p6083_p0 }
   0xe   :  { %6093 = shalt.err (!%p6090_p4)
}
   0xf   :  { %40 = dma.hbm_to_vmem [thread:$0]  %s6661_s1, 64, %s38_s14, [#allocation5]  }
  0x10   :  { %s6102_s20 = scalar_lea.vmem %s59_s16, 4096  ;;  %p6107_p6 = scmp.lt.s32.totalorder %s59_s16, %s59_s16 }
  0x11   :  { %p6103_p5 = scmp.ne.s32.totalorder %s59_s16, %s6102_s20  ;;  %p6108_p7 = scmp.lt.s32.totalorder %s6102_s20, %s6102_s20 }
  0x13   :  { %p6109_p8 = por %p6108_p7, %p6107_p6 }
  0x15   :  { %p6110_p9 = pnand %p6109_p8, %p6103_p5 }
  0x17   :  { %6113 = shalt.err (!%p6110_p9)
}
  0x18   :  { %s6288_s21 = smov 64   ;;  %s6289_s22 = smov 4  }
  0x19   :  { %64 = dma.hbm_to_vmem [thread:$0]  %s6663_s3, 4096, %s59_s16, [#allocation8], %s6288_s21, %s6288_s21, %s6289_s22  }
  0x1a   :  { %s6290_s25 = smov [#allocation10]  }
  0x1b   :  { %s82_s26 = sshll.u32 %s6290_s25, 4  ;;  %s83_s26 = int_to_ptr.vmem [resolvable:$true] %s82_s26 }
  0x1c   :  { %s6122_s1 = scalar_lea.vmem %s83_s26, 32768  ;;  %p6127_p11 = scmp.lt.s32.totalorder %s83_s26, %s83_s26 }
  0x1d   :  { %p6123_p10 = scmp.ne.s32.totalorder %s83_s26, %s6122_s1  ;;  %p6128_p12 = scmp.lt.s32.totalorder %s6122_s1, %s6122_s1 }
  0x1f   :  { %p6129_p13 = por %p6128_p12, %p6127_p11 }
  0x21   :  { %p6130_p0 = pnand %p6129_p13, %p6123_p10 }
  0x23   :  { %6133 = shalt.err (!%p6130_p0)
}
  0x24   :  { %s6291_s27 = smov 512   ;;  %s6292_s28 = smov 32  }
  0x25   :  { %88 = dma.hbm_to_vmem [thread:$0]  %s6665_s5, 32768, %s83_s26, [#allocation11], %s6291_s27, %s6291_s27, %s6292_s28  }
  0x26   :  { %s6293_s3 = smov [#allocation13]   ;;  %s6294_s12 = smov [#allocation2]  }
  0x27   :  { %s106_s11 = sshll.u32 %s6293_s3, 4  ;;  %s27_s13 = sshll.u32 %s6294_s12, 4  ;;  %s107_s11 = int_to_ptr.vmem [resolvable:$true] %s106_s11  ;;  %s28_s13 = int_to_ptr.vmem [resolvable:$true] %s27_s13 }
  0x28   :  { %s6142_s14 = scalar_lea.vmem %s107_s11, 8192  ;;  %p6147_p2 = scmp.lt.s32.totalorder %s107_s11, %s107_s11 }
  0x29   :  { %p6143_p1 = scmp.ne.s32.totalorder %s107_s11, %s6142_s14  ;;  %p6148_p3 = scmp.lt.s32.totalorder %s6142_s14, %s6142_s14 }
  0x2b   :  { %p6149_p4 = por %p6148_p3, %p6147_p2 }
  0x2d   :  { %p6150_p5 = pnand %p6149_p4, %p6143_p1 }
  0x2f   :  { %6153 = shalt.err (!%p6150_p5)
}
  0x30   :  { %112 = dma.hbm_to_vmem [thread:$0]  %s6667_s7, 8192, %s107_s11, [#allocation14], %s6288_s21, %s6288_s21, %s6289_s22  }
  0x31   :  { %s6162_s5 = scalar_lea.vmem %s28_s13, 32  ;;  %p6167_p7 = scmp.lt.s32.totalorder %s28_s13, %s28_s13 }
  0x32   :  { %p6163_p6 = scmp.ne.s32.totalorder %s28_s13, %s6162_s5  ;;  %p6168_p8 = scmp.lt.s32.totalorder %s6162_s5, %s6162_s5 }
  0x34   :  { %p6169_p9 = por %p6168_p8, %p6167_p7 }
  0x36   :  { %p6170_p10 = pnand %p6169_p9, %p6163_p6 }
  0x38   :  { %6173 = shalt.err (!%p6170_p10)
}
  0x39   :  { %30 = dma.hbm_to_vmem [thread:$0]  %s6660_s0, 32, %s28_s13, [#allocation3]  }
  0x3a   :  { %s6295_s19 = smov [#allocation6]  }
  0x3b   :  { %s46_s20 = sshll.u32 %s6295_s19, 4  ;;  %s47_s20 = int_to_ptr.vmem [resolvable:$true] %s46_s20 }
  0x3c   :  { %s6182_s23 = scalar_lea.vmem %s47_s20, 512  ;;  %p6187_p12 = scmp.lt.s32.totalorder %s47_s20, %s47_s20 }
  0x3d   :  { %p6183_p11 = scmp.ne.s32.totalorder %s47_s20, %s6182_s23  ;;  %p6188_p13 = scmp.lt.s32.totalorder %s6182_s23, %s6182_s23 }
  0x3f   :  { %p6189_p0 = por %p6188_p13, %p6187_p12 }
  0x41   :  { %p6190_p1 = pnand %p6189_p0, %p6183_p11 }
  0x43   :  { %6193 = shalt.err (!%p6190_p1)
}
  0x44   :  { %s6296_s7 = smov 256   ;;  %s6297_s21 = smov 16  }
  0x45   :  { %52 = dma.hbm_to_vmem [thread:$0]  %s6662_s2, 512, %s47_s20, [#allocation5], %s6296_s7, %s6296_s7, %s6297_s21  }
  0x46   :  { %s6298_s25 = smov [#allocation9]   ;;  %s6299_s1 = smov [#allocation12]  }
  0x47   :  { %s70_s26 = sshll.u32 %s6298_s25, 4  ;;  %s94_s0 = sshll.u32 %s6299_s1, 4  ;;  %s71_s26 = int_to_ptr.vmem [resolvable:$true] %s70_s26  ;;  %s95_s0 = int_to_ptr.vmem [resolvable:$true] %s94_s0 }
  0x48   :  { %s6202_s29 = scalar_lea.vmem %s71_s26, 1024  ;;  %p6207_p3 = scmp.lt.s32.totalorder %s71_s26, %s71_s26 }
  0x49   :  { %p6203_p2 = scmp.ne.s32.totalorder %s71_s26, %s6202_s29  ;;  %p6208_p4 = scmp.lt.s32.totalorder %s6202_s29, %s6202_s29 }
  0x4b   :  { %p6209_p5 = por %p6208_p4, %p6207_p3 }
  0x4d   :  { %p6210_p6 = pnand %p6209_p5, %p6203_p2 }
  0x4f   :  { %6213 = shalt.err (!%p6210_p6)
}
  0x50   :  { %76 = dma.hbm_to_vmem [thread:$0]  %s6664_s4, 1024, %s71_s26, [#allocation8], %s6296_s7, %s6296_s7, %s6297_s21  }
  0x51   :  { %s6222_s11 = scalar_lea.vmem %s95_s0, 1024  ;;  %p6227_p8 = scmp.lt.s32.totalorder %s95_s0, %s95_s0 }
  0x52   :  { %p6223_p7 = scmp.ne.s32.totalorder %s95_s0, %s6222_s11  ;;  %p6228_p9 = scmp.lt.s32.totalorder %s6222_s11, %s6222_s11 }
  0x54   :  { %p6229_p10 = por %p6228_p9, %p6227_p8 }
  0x56   :  { %p6230_p11 = pnand %p6229_p10, %p6223_p7 }
  0x58   :  { %6233 = shalt.err (!%p6230_p11)
}
  0x59   :  { %100 = dma.hbm_to_vmem [thread:$0]  %s6666_s6, 1024, %s95_s0, [#allocation11], %s6291_s27, %s6291_s27, %s6292_s28  }
  0x5a   :  { %s6300_s13 = smov [#allocation15]   ;;  %s6301_s15 = smov [#allocation16]  }
  0x5b   :  { %s118_s14 = sshll.u32 %s6300_s13, 4  ;;  %s130_s16 = sshll.u32 %s6301_s15, 4  ;;  %s119_s14 = int_to_ptr.vmem [resolvable:$true] %s118_s14  ;;  %s131_s16 = int_to_ptr.vmem [resolvable:$true] %s130_s16 }
  0x5c   :  { %s6242_s4 = scalar_lea.vmem %s119_s14, 1024  ;;  %p6247_p13 = scmp.lt.s32.totalorder %s119_s14, %s119_s14 }
  0x5d   :  { %p6243_p12 = scmp.ne.s32.totalorder %s119_s14, %s6242_s4  ;;  %p6248_p0 = scmp.lt.s32.totalorder %s6242_s4, %s6242_s4 }
  0x5f   :  { %p6249_p1 = por %p6248_p0, %p6247_p13 }
  0x61   :  { %p6250_p2 = pnand %p6249_p1, %p6243_p12 }
  0x63   :  { %6253 = shalt.err (!%p6250_p2)
}
  0x64   :  { %124 = dma.hbm_to_vmem [thread:$0]  %s6668_s8, 1024, %s119_s14, [#allocation14], %s6291_s27, %s6291_s27, %s6292_s28  }
  0x65   :  { %s6262_s6 = scalar_lea.vmem %s131_s16, 16384  ;;  %p6267_p4 = scmp.lt.s32.totalorder %s131_s16, %s131_s16 }
  0x66   :  { %p6263_p3 = scmp.ne.s32.totalorder %s131_s16, %s6262_s6  ;;  %p6268_p5 = scmp.lt.s32.totalorder %s6262_s6, %s6262_s6 }
  0x68   :  { %p6269_p6 = por %p6268_p5, %p6267_p4 }
  0x6a   :  { %p6270_p7 = pnand %p6269_p6, %p6263_p3 }
  0x6c   :  { %6273 = shalt.err (!%p6270_p7)
}
  0x6d   :  { %s6302_s18 = smov 128   ;;  %s6303_s19 = smov 8  }
  0x6e   :  { %136 = dma.hbm_to_vmem [thread:$0]  %s6669_s9, 16384, %s131_s16, [#allocation17], %s6302_s18, %s6302_s18, %s6303_s19  }
  0x6f   :  { %6274 = dma.done.wait [#allocation3], 32  }
  0x70   :  { %6275 = vsyncadd [#allocation3], 4294967264 }
  0x71   :  { %6276 = dma.done.wait [#allocation5], 576  }
  0x72   :  { %6277 = vsyncadd [#allocation5], 4294966720 }
  0x73   :  { %6278 = dma.done.wait [#allocation8], 5120  }
  0x74   :  { %6279 = vsyncadd [#allocation8], 4294962176 }
  0x75   :  { %6280 = dma.done.wait [#allocation11], 33792  }
  0x76   :  { %6281 = vsyncadd [#allocation11], 4294933504 }
  0x77   :  { %6282 = dma.done.wait [#allocation14], 9216  }
  0x78   :  { %6283 = vsyncadd [#allocation14], 4294958080 }
  0x79   :  { %6284 = dma.done.wait [#allocation17], 16384  }
  0x7a   :  { %6285 = vsyncadd [#allocation17], 4294950912  ;;  %v6304_v0 = vmov 0   ;;  %v5760_v1 = vld [vmem:[#allocation6 + $0x4] ss:$16 sps:$4 sm:$0xff]   ;;  %v5766_v7 = vld [vmem:[#allocation7 + $0x78] sm:$0xff]  }
  0x7b   :  { %230 = vmatprep.mubr.bf16.mxu0 %v6304_v0  ;;  %271 = vmatprep.mubr.bf16.mxu1 %v6304_v0  ;;  %v5762_v2 = vld [vmem:[#allocation6 + $0xc] ss:$16 sps:$4 sm:$0xff]   ;;  %v5764_v3 = vld [vmem:[#allocation6] ss:$16 sps:$4 sm:$0xff]   ;;  %v5765_v4 = vld [vmem:[#allocation6 + $0x8] ss:$16 sps:$4 sm:$0xff]  }
  0x7c   :  { %212 = vmatprep.subr.bf16.mxu0 %v5760_v1  ;;  %v168_v5 = vld [vmem:[#allocation2] sm:$0x3]  ;;  %253 = vmatprep.subr.bf16.mxu1 %v5762_v2  ;;  %vm194_vm0 = vcmask 130048   ;;  %v5770_v11 = vld [vmem:[#allocation7 + $0x70] sm:$0xff]   ;;  %v5774_v15 = vld [vmem:[#allocation7 + $0x68] sm:$0xff]   ;;  %vm282_vm1 = vcmask 1041408  }
  0x7d   :  { %v6408_v6 = vpack.c.bf16 %v168_v5, %v168_v5  ;;  %213 = vmatpush1.bf16.msra.mxu0 %v5764_v3  ;;  %254 = vmatpush1.bf16.msra.mxu1 %v5765_v4  ;;  %v5767_v8 = vld [vmem:[#allocation7 + $0xf8] sm:$0xff]   ;;  %v5771_v12 = vld [vmem:[#allocation7 + $0xf0] sm:$0xff]   ;;  %v5775_v16 = vld [vmem:[#allocation7 + $0xe8] sm:$0xff]   ;;  %vm343_vm2 = vcmask 1040384   ;;  %vm767_vm3 = vcmask 261120  }
  0x7e   :  { %5608 = vmatprep.subr.bf16.mxu0 %v5766_v7  ;;  %v5768_v9 = vld [vmem:[#allocation7 + $0x38] sm:$0xff]   ;;  %5630 = vmatprep.subr.bf16.mxu1 %v5767_v8  ;;  %v5772_v13 = vld [vmem:[#allocation7 + $0x30] sm:$0xff]   ;;  %v5776_v17 = vld [vmem:[#allocation7 + $0x28] sm:$0xff]  }
  0x7f   :  { %v5769_v10 = vld [vmem:[#allocation7 + $0xb8] sm:$0xff]   ;;  %v5773_v14 = vld [vmem:[#allocation7 + $0xb0] sm:$0xff]   ;;  %v5777_v18 = vld [vmem:[#allocation7 + $0xa8] sm:$0xff]  }
  0x80   :  { %5089 = vmatmul.mubr.msk.bf16.vlgmr.msra.gmra.mxu0 %vm194_vm0, %v6408_v6  ;;  %5090 = vmatmul.mubr.msk.bf16.vlgmr.msra.gmra.mxu1 %vm194_vm0, %v6408_v6  ;;  %v5778_v19 = vld [vmem:[#allocation7 + $0x60] sm:$0xff]   ;;  %v5782_v23 = vld [vmem:[#allocation7 + $0x58] sm:$0xff]   ;;  %v5786_v27 = vld [vmem:[#allocation7 + $0x50] sm:$0xff]  }
  0x81   :  { %5609 = vmatpush3.bf16.msra.mxu0 %v5768_v9  ;;  %5631 = vmatpush3.bf16.msra.mxu1 %v5769_v10  ;;  %v5779_v20 = vld [vmem:[#allocation7 + $0xe0] sm:$0xff]   ;;  %v5783_v24 = vld [vmem:[#allocation7 + $0xd8] sm:$0xff]   ;;  %v5787_v28 = vld [vmem:[#allocation7 + $0xd0] sm:$0xff]  }
  0x82   :  { %5610 = vmatprep.subr.bf16.mxu0 %v5770_v11  ;;  %5632 = vmatprep.subr.bf16.mxu1 %v5771_v12  ;;  %v5780_v21 = vld [vmem:[#allocation7 + $0x20] sm:$0xff]   ;;  %v5784_v25 = vld [vmem:[#allocation7 + $0x18] sm:$0xff]   ;;  %v5788_v29 = vld [vmem:[#allocation7 + $0x10] sm:$0xff]  }
  0x83   :  { %v5781_v22 = vld [vmem:[#allocation7 + $0xa0] sm:$0xff]   ;;  %v5785_v26 = vld [vmem:[#allocation7 + $0x98] sm:$0xff]   ;;  %v5789_v30 = vld [vmem:[#allocation7 + $0x90] sm:$0xff]  }
  0x84   :  { %v5790_v31 = vld [vmem:[#allocation7 + $0x48] sm:$0xff]   ;;  %v5794_v35 = vld [vmem:[#allocation7 + $0x40] sm:$0xff]  }
  0x85   :  { %5611 = vmatpush3.bf16.msra.mxu0 %v5772_v13  ;;  %5633 = vmatpush3.bf16.msra.mxu1 %v5773_v14  ;;  %v5791_v32 = vld [vmem:[#allocation7 + $0xc8] sm:$0xff]   ;;  %v5795_v36 = vld [vmem:[#allocation7 + $0xc0] sm:$0xff]  }
  0x86   :  { %5612 = vmatprep.subr.bf16.mxu0 %v5774_v15  ;;  %5634 = vmatprep.subr.bf16.mxu1 %v5775_v16  ;;  %v5792_v33 = vld [vmem:[#allocation7 + $0x8] sm:$0xff]   ;;  %v5796_v37 = vld [vmem:[#allocation7] sm:$0xff]  }
  0x87   :  { %v5793_v34 = vld [vmem:[#allocation7 + $0x88] sm:$0xff]   ;;  %v5797_v38 = vld [vmem:[#allocation7 + $0x80] sm:$0xff]  }
  0x89   :  { %5613 = vmatpush3.bf16.msra.mxu0 %v5776_v17  ;;  %5635 = vmatpush3.bf16.msra.mxu1 %v5777_v18 }
  0x8a   :  { %5614 = vmatprep.subr.bf16.mxu0 %v5778_v19  ;;  %5636 = vmatprep.subr.bf16.mxu1 %v5779_v20 }
  0x8d   :  { %5615 = vmatpush3.bf16.msra.mxu0 %v5780_v21  ;;  %5637 = vmatpush3.bf16.msra.mxu1 %v5781_v22 }
  0x8e   :  { %5616 = vmatprep.subr.bf16.mxu0 %v5782_v23  ;;  %5638 = vmatprep.subr.bf16.mxu1 %v5783_v24 }
  0x91   :  { %5617 = vmatpush3.bf16.msra.mxu0 %v5784_v25  ;;  %5639 = vmatpush3.bf16.msra.mxu1 %v5785_v26 }
  0x92   :  { %5618 = vmatprep.subr.bf16.mxu0 %v5786_v27  ;;  %5640 = vmatprep.subr.bf16.mxu1 %v5787_v28 }
  0x95   :  { %5619 = vmatpush3.bf16.msra.mxu0 %v5788_v29  ;;  %5641 = vmatpush3.bf16.msra.mxu1 %v5789_v30 }
  0x96   :  { %5620 = vmatprep.subr.bf16.mxu0 %v5790_v31  ;;  %5642 = vmatprep.subr.bf16.mxu1 %v5791_v32 }
  0x99   :  { %5621 = vmatpush3.bf16.msra.mxu0 %v5792_v33  ;;  %5643 = vmatpush3.bf16.msra.mxu1 %v5793_v34 }
  0x9a   :  { %5622 = vmatprep.subr.bf16.mxu0 %v5794_v35  ;;  %5644 = vmatprep.subr.bf16.mxu1 %v5795_v36 }
  0x9d   :  { %5623 = vmatpush3.bf16.msra.mxu0 %v5796_v37  ;;  %5645 = vmatpush3.bf16.msra.mxu1 %v5797_v38 }
 0x140   :  { %v6414_v39 = vpop.f32.mrf.mxu0  ;;  %v6416_v40 = vpop.f32.mrf.mxu1 }
 0x141   :  { %v283_v41 = vsel %vm282_vm1, %v6414_v39, 0.0  ;;  %v311_v42 = vmul.f32 %v6414_v39, %v6414_v39  ;;  %v297_v43 = vsel %vm282_vm1, %v6416_v40, 0.0  ;;  %v313_v44 = vmul.f32 %v6416_v40, %v6416_v40 }
 0x142   :  { %v284_v45 = vrot.slane %v283_v41, 4  ;;  %v298_v46 = vrot.slane %v297_v43, 4  ;;  %v6426_v47 = vpop.f32.mrf.mxu0  ;;  %v6428_v48 = vpop.f32.mrf.mxu1 }
 0x143   :  { %v315_v49 = vsel %vm282_vm1, %v311_v42, 0.0  ;;  %v329_v50 = vsel %vm282_vm1, %v313_v44, 0.0  ;;  %v290_v51 = vsel %vm282_vm1, %v6426_v47, 0.0  ;;  %v312_v52 = vmul.f32 %v6426_v47, %v6426_v47 }
 0x144   :  { %v285_v53 = vadd.f32 %v284_v45, %v283_v41  ;;  %v316_v54 = vrot.slane %v315_v49, 4  ;;  %v299_v55 = vadd.f32 %v298_v46, %v297_v43  ;;  %v330_v56 = vrot.slane %v329_v50, 4  ;;  %v236_v57 = vpop.f32.mrf.mxu0  ;;  %v277_v58 = vpop.f32.mrf.mxu1 }
 0x145   :  { %v291_v59 = vrot.slane %v290_v51, 4  ;;  %v322_v60 = vsel %vm282_vm1, %v312_v52, 0.0  ;;  %v304_v61 = vsel %vm282_vm1, %v6428_v48, 0.0  ;;  %v314_v62 = vmul.f32 %v6428_v48, %v6428_v48  ;;  %v5800_v57 = vld [vmem:[#allocation9 + $0x24] ss:$16 sps:$4 sm:$0xff]  }
 0x146   :  { %v286_v63 = vrot.slane %v285_v53, 2  ;;  %v317_v1 = vadd.f32 %v316_v54, %v315_v49  ;;  %v300_v2 = vrot.slane %v299_v55, 2  ;;  %v331_v3 = vadd.f32 %v330_v56, %v329_v50  ;;  %v237_v4 = vpop.f32.mrf.mxu0  ;;  %v278_v5 = vpop.f32.mrf.mxu1  ;;  %v5803_v58 = vld [vmem:[#allocation9 + $0x2c] ss:$16 sps:$4 sm:$0xff]   ;;  %783 = vmatprep.subr.bf16.mxu0 %v5800_v57  ;;  %v961_v57 = vld [vmem:[#allocation10 + $0x1e0] sm:$0xff] }
 0x147   :  { %v292_v7 = vadd.f32 %v291_v59, %v290_v51  ;;  %v323_v8 = vrot.slane %v322_v60, 4  ;;  %v305_v9 = vrot.slane %v304_v61, 4  ;;  %v336_v10 = vsel %vm282_vm1, %v314_v62, 0.0  ;;  %v5798_v59 = vld [vmem:[#allocation9 + $0x20] ss:$16 sps:$4 sm:$0xff]   ;;  %824 = vmatprep.subr.bf16.mxu1 %v5803_v58 }
 0x148   :  { %v287_v11 = vadd.f32 %v286_v63, %v285_v53  ;;  %v318_v12 = vrot.slane %v317_v1, 2  ;;  %v332_v13 = vrot.slane %v331_v3, 2  ;;  %v337_v17 = vrot.slane %v336_v10, 4  ;;  %v5809_v62 = vld [vmem:[#allocation9 + $0xc] ss:$16 sps:$4 sm:$0xff]   ;;  %v1085_v58 = vld [vmem:[#allocation10 + $0x5c0] sm:$0xff] }
 0x149   :  { %v293_v14 = vrot.slane %v292_v7, 2  ;;  %v324_v15 = vadd.f32 %v323_v8, %v322_v60  ;;  %v306_v16 = vadd.f32 %v305_v9, %v304_v61  ;;  %v301_v19 = vadd.f32 %v300_v2, %v299_v55  ;;  %v5801_v60 = vld [vmem:[#allocation9 + $0x28] ss:$16 sps:$4 sm:$0xff]   ;;  %v5806_v61 = vld [vmem:[#allocation9 + $0x4] ss:$16 sps:$4 sm:$0xff]  }
 0x14a   :  { %v319_v18 = vadd.f32 %v318_v12, %v317_v1  ;;  %v333_v20 = vadd.f32 %v332_v13, %v331_v3  ;;  %v338_v24 = vadd.f32 %v337_v17, %v336_v10  ;;  %v288_v25 = vrot.slane %v287_v11, 1  ;;  %v5804_v63 = vld [vmem:[#allocation9] ss:$16 sps:$4 sm:$0xff]   ;;  %v5807_v1 = vld [vmem:[#allocation9 + $0x8] ss:$16 sps:$4 sm:$0xff]  }
 0x14b   :  { %v294_v21 = vadd.f32 %v293_v14, %v292_v7  ;;  %v325_v22 = vrot.slane %v324_v15, 2  ;;  %v307_v23 = vrot.slane %v306_v16, 2  ;;  %v302_v33 = vrot.slane %v301_v19, 1  ;;  %v1157_v2 = vld [vmem:[#allocation12] sm:$0xff]  ;;  %v1158_v7 = vld [vmem:[#allocation12 + $0x8] sm:$0xff] }
 0x14c   :  { %v320_v26 = vrot.slane %v319_v18, 1  ;;  %v334_v27 = vrot.slane %v333_v20, 1  ;;  %v339_v31 = vrot.slane %v338_v24, 2  ;;  %v289_v37 = vadd.f32 %v288_v25, %v287_v11  ;;  %v1161_v3 = vld [vmem:[#allocation12 + $0x20] sm:$0xff]  ;;  %v1162_v8 = vld [vmem:[#allocation12 + $0x28] sm:$0xff] }
 0x14d   :  { %v295_v28 = vrot.slane %v294_v21, 1  ;;  %v326_v29 = vadd.f32 %v325_v22, %v324_v15  ;;  %v308_v30 = vadd.f32 %v307_v23, %v306_v16  ;;  %v303_v44 = vadd.f32 %v302_v33, %v301_v19 }
 0x14e   :  { %v321_v32 = vadd.f32 %v320_v26, %v319_v18  ;;  %v340_v36 = vadd.f32 %v339_v31, %v338_v24  ;;  %v335_v38 = vadd.f32 %v334_v27, %v333_v20  ;;  %v5134_v4 = vcombine.low %v1157_v2, %v1161_v3 }
 0x14f   :  { %v327_v34 = vrot.slane %v326_v29, 1  ;;  %v309_v35 = vrot.slane %v308_v30, 1  ;;  %v296_v41 = vadd.f32 %v295_v28, %v294_v21  ;;  %v5135_v5 = vcombine.high %v1157_v2, %v1161_v3  ;;  %v953_v2 = vld [vmem:[#allocation10 + $0x1a0] sm:$0xff] }
 0x150   :  { %v341_v42 = vrot.slane %v340_v36, 1  ;;  %v344_v45 = vsel %vm343_vm2, %v289_v37, %v321_v32  ;;  %v346_v52 = vsel %vm343_vm2, %v303_v44, %v335_v38  ;;  %v5136_v9 = vcombine.low %v1158_v7, %v1162_v8  ;;  %v1077_v3 = vld [vmem:[#allocation10 + $0x580] sm:$0xff] }
 0x151   :  { %v328_v43 = vadd.f32 %v327_v34, %v326_v29  ;;  %v310_v46 = vadd.f32 %v309_v35, %v308_v30  ;;  %v348_v54 = vpack.c.bf16 %v344_v45, %v344_v45  ;;  %v350_v56 = vpack.c.bf16 %v346_v52, %v346_v52 }
 0x152   :  { %v342_v50 = vadd.f32 %v341_v42, %v340_v36  ;;  %v5137_v10 = vcombine.high %v1158_v7, %v1162_v8  ;;  %v6305_v28 = vmov 1983009808   ;;  %v701_v30 = vlaneseq  ;;  %v280_v36 = vld [vmem:[#allocation4] sm:$0x1] }
 0x153   :  { %v345_v49 = vsel %vm343_vm2, %v296_v41, %v328_v43  ;;  %v699_v29 = vunpack.c.l.s4 %v6305_v28  ;;  %v281_v41 = vld [vmem:[#allocation4 + $0x1] sm:$0x1]  ;;  %v1057_v28 = vld [vmem:[#allocation10 + $0x4e0] sm:$0xff] }
 0x154   :  { %v349_v51 = vpack.c.bf16 %v345_v49, %v345_v49  ;;  %v347_v53 = vsel %vm343_vm2, %v310_v46, %v342_v50  ;;  %v6448_v32 = vshrl.u32 %v701_v30, 7  ;;  %v1159_v46 = vld [vmem:[#allocation12 + $0x10] sm:$0xff]  ;;  %v1160_v50 = vld [vmem:[#allocation12 + $0x18] sm:$0xff] }
 0x155   :  { %v351_v55 = vpack.c.bf16 %v347_v53, %v347_v53  ;;  %v700_v31 = vunpack.c.0.s8 %v699_v29  ;;  %v1163_v49 = vld [vmem:[#allocation12 + $0x30] sm:$0xff] }
 0x156   :  { %640 = vmatprep.mubr.bf16.mxu0 %v349_v51  ;;  %v6455_v43 = vsub.s32 0, %v6448_v32  ;;  %v1164_v51 = vld [vmem:[#allocation12 + $0x38] sm:$0xff] }
 0x157   :  { %641 = vmatmul.mubr.bf16.vlgmr.msra.gmra.mxu0 %v348_v54  ;;  %680 = vmatprep.mubr.bf16.mxu1 %v351_v55  ;;  %v6451_v33 = vsub.s32 %v700_v31, %v6448_v32  ;;  %v5139_v54 = vcombine.high %v1159_v46, %v1163_v49  ;;  %v5141_v55 = vcombine.high %v1160_v50, %v1164_v51 }
 0x158   :  { %803 = vmatprep.mubr.bf16.mxu0 %v6304_v0  ;;  %681 = vmatmul.mubr.bf16.vlgmr.msra.gmra.mxu1 %v350_v56  ;;  %v957_v56 = vld [vmem:[#allocation10 + $0x1c0] sm:$0xff] }
 0x159   :  { %844 = vmatprep.mubr.bf16.mxu1 %v6304_v0  ;;  %784 = vmatpush1.bf16.msra.mxu0 %v5798_v59  ;;  %v1089_v59 = vld [vmem:[#allocation10 + $0x5e0] sm:$0xff] }
 0x15a   :  { %825 = vmatpush1.bf16.msra.mxu1 %v5801_v60  ;;  %785 = vmatprep.subr.bf16.mxu0 %v5806_v61  ;;  %v5138_v60 = vcombine.low %v1159_v46, %v1163_v49  ;;  %v5140_v61 = vcombine.low %v1160_v50, %v1164_v51  ;;  %v5330_v7 = vcombine.low %v1085_v58, %v1089_v59  ;;  %v909_v46 = vld [vmem:[#allocation10 + $0x40] sm:$0xff] }
 0x15b   :  { %826 = vmatprep.subr.bf16.mxu1 %v5809_v62  ;;  %v5203_v62 = vcombine.high %v957_v56, %v961_v57  ;;  %v913_v49 = vld [vmem:[#allocation10 + $0x60] sm:$0xff] }
 0x15c   :  { %v1037_v50 = vld [vmem:[#allocation10 + $0x440] sm:$0xff] }
 0x15d   :  { %786 = vmatpush1.bf16.msra.mxu0 %v5804_v63  ;;  %v5331_v63 = vcombine.high %v1085_v58, %v1089_v59  ;;  %v1041_v51 = vld [vmem:[#allocation10 + $0x460] sm:$0xff] }
 0x15e   :  { %827 = vmatpush1.bf16.msra.mxu1 %v5807_v1  ;;  %1219 = vmatprep.subr.bf16.mxu0 %v5135_v5  ;;  %v949_v1 = vld [vmem:[#allocation10 + $0x180] sm:$0xff]  ;;  %v5202_v5 = vcombine.low %v957_v56, %v961_v57 }
 0x15f   :  { %1260 = vmatprep.subr.bf16.mxu1 %v5137_v10  ;;  %v5195_v8 = vcombine.high %v949_v1, %v953_v2  ;;  %v941_v10 = vld [vmem:[#allocation10 + $0x140] sm:$0xff] }
 0x160   :  { %v901_v56 = vld [vmem:[#allocation10] sm:$0xff] }
 0x161   :  { %v905_v57 = vld [vmem:[#allocation10 + $0x20] sm:$0xff] }
 0x162   :  { %v1029_v58 = vld [vmem:[#allocation10 + $0x400] sm:$0xff] }
 0x163   :  { %v1033_v59 = vld [vmem:[#allocation10 + $0x420] sm:$0xff] }
 0x217   :  { %v5624_v11 = vpop.f32.mrf.mxu0 }
 0x218   :  { %v5646_v12 = vpop.f32.mrf.mxu1 }
 0x219   :  { %v5625_v13 = vpop.f32.mrf.mxu0 }
 0x21a   :  { %v5626_v14 = vadd.f32 %v5625_v13, %v5624_v11  ;;  %v5647_v15 = vpop.f32.mrf.mxu1  ;;  %v945_v11 = vld [vmem:[#allocation10 + $0x160] sm:$0xff] }
 0x21b   :  { %v5627_v16 = vpop.f32.mrf.mxu0  ;;  %v5648_v17 = vadd.f32 %v5647_v15, %v5646_v12  ;;  %v1069_v12 = vld [vmem:[#allocation10 + $0x540] sm:$0xff] }
 0x21c   :  { %v5649_v18 = vpop.f32.mrf.mxu1  ;;  %v1073_v13 = vld [vmem:[#allocation10 + $0x560] sm:$0xff]  ;;  %v5187_v16 = vcombine.high %v941_v10, %v945_v11 }
 0x21d   :  { %v5628_v19 = vpop.f32.mrf.mxu0  ;;  %v683_v20 = vadd.f32 %v5648_v17, %v5626_v14  ;;  %v5194_v14 = vcombine.low %v949_v1, %v953_v2  ;;  %v5315_v17 = vcombine.high %v1069_v12, %v1073_v13  ;;  %v933_v18 = vld [vmem:[#allocation10 + $0x100] sm:$0xff] }
 0x21e   :  { %v5650_v21 = vpop.f32.mrf.mxu1  ;;  %v937_v19 = vld [vmem:[#allocation10 + $0x120] sm:$0xff] }
 0x21f   :  { %v688_v22 = vmul.f32 0.03125, %v683_v20  ;;  %v1061_v20 = vld [vmem:[#allocation10 + $0x500] sm:$0xff]  ;;  %v5178_v29 = vcombine.low %v933_v18, %v937_v19 }
 0x220   :  { %v1065_v21 = vld [vmem:[#allocation10 + $0x520] sm:$0xff] }
 0x221   :  { %v689_v23 = vmul.f32 %v688_v22, %v688_v22  ;;  %v5306_v30 = vcombine.low %v1061_v20, %v1065_v21  ;;  %v1021_v1 = vld [vmem:[#allocation10 + $0x3c0] sm:$0xff] }
 0x222   :  { %v1025_v2 = vld [vmem:[#allocation10 + $0x3e0] sm:$0xff] }
 0x223   :  { %v691_v24 = vrot.slane %v689_v23, 7  ;;  %v5314_v23 = vcombine.low %v1069_v12, %v1073_v13  ;;  %v1141_v12 = vld [vmem:[#allocation10 + $0x780] sm:$0xff] }
 0x224   :  { %v1145_v13 = vld [vmem:[#allocation10 + $0x7a0] sm:$0xff] }
 0x225   :  { %v693_v25 = vsub.f32 %v688_v22, %v691_v24  ;;  %v5179_v24 = vcombine.high %v933_v18, %v937_v19  ;;  %v1005_v18 = vld [vmem:[#allocation10 + $0x340] sm:$0xff] }
 0x226   :  { %v1009_v19 = vld [vmem:[#allocation10 + $0x360] sm:$0xff] }
 0x227   :  { %v694_v26 = vmax.f32 %v693_v25, 0.0  ;;  %v925_v25 = vld [vmem:[#allocation10 + $0xc0] sm:$0xff] }
 0x229   :  { %v695_v27 = vadd.f32 1e-05, %v694_v26  ;;  %v929_v26 = vld [vmem:[#allocation10 + $0xe0] sm:$0xff] }
 0x22a   :  { %v5171_v31 = vcombine.high %v925_v25, %v929_v26 }
 0x22b   :  { %6066 = vrsqrt.f32 %v695_v27  ;;  %v1053_v27 = vld [vmem:[#allocation10 + $0x4c0] sm:$0xff] }
 0x238   :  { %v6067_v34 = vpop.eup %6066 }
 0x239   :  { %v704_v35 = vrot.slane %v6067_v34, %v6451_v33  ;;  %v5299_v34 = vcombine.high %v1053_v27, %v1057_v28 }
 0x23b   :  { %v5123_v37 = vrot.slane %v704_v35, 9  ;;  %v917_v35 = vld [vmem:[#allocation10 + $0x80] sm:$0xff] }
 0x23d   :  { %v708_v38 = vmul.f32 %v5123_v37, %v280_v36  ;;  %v921_v36 = vld [vmem:[#allocation10 + $0xa0] sm:$0xff] }
 0x23e   :  { %v1045_v37 = vld [vmem:[#allocation10 + $0x480] sm:$0xff] }
 0x23f   :  { %v709_v42 = vmul.f32 %v708_v38, %v688_v22  ;;  %v5186_v22 = vcombine.low %v941_v10, %v945_v11  ;;  %v1013_v10 = vld [vmem:[#allocation10 + $0x380] sm:$0xff] }
 0x240   :  { %v1017_v11 = vld [vmem:[#allocation10 + $0x3a0] sm:$0xff] }
 0x241   :  { %v710_v44 = vsub.f32 %v281_v41, %v709_v42  ;;  %v5170_v41 = vcombine.low %v925_v25, %v929_v26  ;;  %v5298_v42 = vcombine.low %v1053_v27, %v1057_v28  ;;  %v997_v25 = vld [vmem:[#allocation10 + $0x300] sm:$0xff] }
 0x242   :  { %v1001_v26 = vld [vmem:[#allocation10 + $0x320] sm:$0xff] }
 0x243   :  { %v715_v45 = vrot.slane %v710_v44, %v6455_v43  ;;  %v5163_v44 = vcombine.high %v917_v35, %v921_v36  ;;  %v1125_v27 = vld [vmem:[#allocation10 + $0x700] sm:$0xff] }
 0x244   :  { %v1129_v28 = vld [vmem:[#allocation10 + $0x720] sm:$0xff] }
 0x245   :  { %v717_v52 = vsel %vm343_vm2, %v708_v38, %v715_v45  ;;  %v1049_v38 = vld [vmem:[#allocation10 + $0x4a0] sm:$0xff] }
 0x246   :  { %v718_v53 = vpack.c.bf16 %v717_v52, %v717_v52  ;;  %v5291_v45 = vcombine.high %v1045_v37, %v1049_v38  ;;  %v5162_v52 = vcombine.low %v917_v35, %v921_v36  ;;  %v989_v35 = vld [vmem:[#allocation10 + $0x2c0] sm:$0xff] }
 0x247   :  { %v993_v36 = vld [vmem:[#allocation10 + $0x2e0] sm:$0xff] }
 0x248   :  { %5132 = vmatmul.mubr.msk.bf16.vlgmr.msra.gmra.mxu0 %vm767_vm3, %v718_v53  ;;  %5133 = vmatmul.mubr.msk.bf16.vlgmr.msra.gmra.mxu1 %vm767_vm3, %v718_v53  ;;  %v5290_v53 = vcombine.low %v1045_v37, %v1049_v38  ;;  %v1117_v37 = vld [vmem:[#allocation10 + $0x6c0] sm:$0xff] }
 0x249   :  { %1220 = vmatpush1.bf16.msra.mxu0 %v5134_v4  ;;  %1237 = vmatprep.mubr.bf16.mxu0 %v6304_v0  ;;  %v1081_v4 = vld [vmem:[#allocation10 + $0x5a0] sm:$0xff] }
 0x24a   :  { %1261 = vmatpush1.bf16.msra.mxu1 %v5136_v9  ;;  %1278 = vmatprep.mubr.bf16.mxu1 %v6304_v0  ;;  %v5323_v9 = vcombine.high %v1077_v3, %v1081_v4  ;;  %v5322_v15 = vcombine.low %v1077_v3, %v1081_v4  ;;  %v1149_v3 = vld [vmem:[#allocation10 + $0x7c0] sm:$0xff] }
 0x24b   :  { %1301 = vmatprep.subr.bf16.mxu0 %v5139_v54  ;;  %1342 = vmatprep.subr.bf16.mxu1 %v5141_v55  ;;  %v5155_v54 = vcombine.high %v909_v46, %v913_v49  ;;  %v5283_v55 = vcombine.high %v1037_v50, %v1041_v51  ;;  %v1153_v4 = vld [vmem:[#allocation10 + $0x7e0] sm:$0xff] }
 0x24c   :  { %v1121_v38 = vld [vmem:[#allocation10 + $0x6e0] sm:$0xff] }
 0x250   :  { %5142 = vmatmul.mubr.msk.bf16.vlgmr.msra.gmra.mxu0 %vm194_vm0, %v6408_v6  ;;  %5143 = vmatmul.mubr.msk.bf16.vlgmr.msra.gmra.mxu1 %vm194_vm0, %v6408_v6 }
 0x251   :  { %1302 = vmatpush1.bf16.msra.mxu0 %v5138_v60  ;;  %1319 = vmatprep.mubr.bf16.mxu0 %v6304_v0  ;;  %v5154_v60 = vcombine.low %v909_v46, %v913_v49  ;;  %v5234_v46 = vcombine.low %v989_v35, %v993_v36  ;;  %v5362_v49 = vcombine.low %v1117_v37, %v1121_v38 }
 0x252   :  { %1343 = vmatpush1.bf16.msra.mxu1 %v5140_v61  ;;  %1360 = vmatprep.mubr.bf16.mxu1 %v6304_v0  ;;  %v5282_v61 = vcombine.low %v1037_v50, %v1041_v51  ;;  %v981_v50 = vld [vmem:[#allocation10 + $0x280] sm:$0xff] }
 0x253   :  { %2649 = vmatprep.subr.bf16.mxu0 %v5203_v62  ;;  %2690 = vmatprep.subr.bf16.mxu1 %v5331_v63  ;;  %v5147_v62 = vcombine.high %v901_v56, %v905_v57  ;;  %v5275_v63 = vcombine.high %v1029_v58, %v1033_v59  ;;  %v985_v51 = vld [vmem:[#allocation10 + $0x2a0] sm:$0xff] }
 0x258   :  { %5144 = vmatmul.mubr.msk.bf16.vlgmr.msra.gmra.mxu0 %vm194_vm0, %v6408_v6  ;;  %5145 = vmatmul.mubr.msk.bf16.vlgmr.msra.gmra.mxu1 %vm194_vm0, %v6408_v6  ;;  %v5307_v6 = vcombine.high %v1061_v20, %v1065_v21  ;;  %v1133_v20 = vld [vmem:[#allocation10 + $0x740] sm:$0xff] }
 0x259   :  { %2650 = vmatpush1.bf16.msra.mxu0 %v5202_v5  ;;  %2691 = vmatpush1.bf16.msra.mxu1 %v5330_v7  ;;  %v5146_v5 = vcombine.low %v901_v56, %v905_v57  ;;  %v5274_v7 = vcombine.low %v1029_v58, %v1033_v59  ;;  %v1137_v21 = vld [vmem:[#allocation10 + $0x760] sm:$0xff]  ;;  %v5226_v56 = vcombine.low %v981_v50, %v985_v51 }
 0x25a   :  { %2651 = vmatprep.subr.bf16.mxu0 %v5195_v8  ;;  %2692 = vmatprep.subr.bf16.mxu1 %v5323_v9  ;;  %v5267_v8 = vcombine.high %v1021_v1, %v1025_v2  ;;  %v5395_v9 = vcombine.high %v1149_v3, %v1153_v4  ;;  %v973_v58 = vld [vmem:[#allocation10 + $0x240] sm:$0xff] }
 0x25b   :  { %v977_v59 = vld [vmem:[#allocation10 + $0x260] sm:$0xff] }
 0x25d   :  { %2652 = vmatpush1.bf16.msra.mxu0 %v5194_v14  ;;  %2693 = vmatpush1.bf16.msra.mxu1 %v5322_v15  ;;  %v5266_v14 = vcombine.low %v1021_v1, %v1025_v2  ;;  %v5394_v15 = vcombine.low %v1149_v3, %v1153_v4  ;;  %v965_v3 = vld [vmem:[#allocation10 + $0x200] sm:$0xff] }
 0x25e   :  { %2653 = vmatprep.subr.bf16.mxu0 %v5187_v16  ;;  %2694 = vmatprep.subr.bf16.mxu1 %v5315_v17  ;;  %v5259_v16 = vcombine.high %v1013_v10, %v1017_v11  ;;  %v5387_v17 = vcombine.high %v1141_v12, %v1145_v13  ;;  %v969_v4 = vld [vmem:[#allocation10 + $0x220] sm:$0xff] }
 0x261   :  { %2654 = vmatpush1.bf16.msra.mxu0 %v5186_v22  ;;  %2695 = vmatpush1.bf16.msra.mxu1 %v5314_v23  ;;  %v5258_v22 = vcombine.low %v1013_v10, %v1017_v11  ;;  %v5386_v23 = vcombine.low %v1141_v12, %v1145_v13  ;;  %v6471_v12 = vld [vmem:[#allocation10 + $0x1c8] sm:$0xff] }
 0x262   :  { %2655 = vmatprep.subr.bf16.mxu0 %v5179_v24  ;;  %2696 = vmatprep.subr.bf16.mxu1 %v5307_v6  ;;  %v5251_v24 = vcombine.high %v1005_v18, %v1009_v19  ;;  %v5379_v6 = vcombine.high %v1133_v20, %v1137_v21  ;;  %v6473_v13 = vld [vmem:[#allocation10 + $0x1e8] sm:$0xff] }
 0x265   :  { %2656 = vmatpush1.bf16.msra.mxu0 %v5178_v29  ;;  %2697 = vmatpush1.bf16.msra.mxu1 %v5306_v30  ;;  %v5250_v29 = vcombine.low %v1005_v18, %v1009_v19  ;;  %v5378_v30 = vcombine.low %v1133_v20, %v1137_v21  ;;  %v6488_v20 = vsub.s32 1, %v6448_v32 }
 0x266   :  { %2657 = vmatprep.subr.bf16.mxu0 %v5171_v31  ;;  %2698 = vmatprep.subr.bf16.mxu1 %v5299_v34  ;;  %v5243_v31 = vcombine.high %v997_v25, %v1001_v26  ;;  %v5371_v34 = vcombine.high %v1125_v27, %v1129_v28 }
 0x269   :  { %2658 = vmatpush1.bf16.msra.mxu0 %v5170_v41  ;;  %2699 = vmatpush1.bf16.msra.mxu1 %v5298_v42  ;;  %v5242_v41 = vcombine.low %v997_v25, %v1001_v26  ;;  %v5370_v42 = vcombine.low %v1125_v27, %v1129_v28 }
 0x26a   :  { %2659 = vmatprep.subr.bf16.mxu0 %v5163_v44  ;;  %2700 = vmatprep.subr.bf16.mxu1 %v5291_v45  ;;  %v5235_v44 = vcombine.high %v989_v35, %v993_v36  ;;  %v5363_v45 = vcombine.high %v1117_v37, %v1121_v38 }
 0x26d   :  { %2660 = vmatpush1.bf16.msra.mxu0 %v5162_v52  ;;  %2701 = vmatpush1.bf16.msra.mxu1 %v5290_v53  ;;  %v1109_v52 = vld [vmem:[#allocation10 + $0x680] sm:$0xff]  ;;  %v5227_v53 = vcombine.high %v981_v50, %v985_v51 }
 0x26e   :  { %2661 = vmatprep.subr.bf16.mxu0 %v5155_v54  ;;  %2702 = vmatprep.subr.bf16.mxu1 %v5283_v55  ;;  %v1113_v54 = vld [vmem:[#allocation10 + $0x6a0] sm:$0xff] }
 0x26f   :  { %v5355_v55 = vcombine.high %v1109_v52, %v1113_v54  ;;  %v5354_v57 = vcombine.low %v1109_v52, %v1113_v54  ;;  %v950_v54 = vld [vmem:[#allocation10 + $0x188] sm:$0xff] }
 0x271   :  { %2662 = vmatpush1.bf16.msra.mxu0 %v5154_v60  ;;  %2703 = vmatpush1.bf16.msra.mxu1 %v5282_v61  ;;  %v1101_v60 = vld [vmem:[#allocation10 + $0x640] sm:$0xff]  ;;  %v5219_v61 = vcombine.high %v973_v58, %v977_v59 }
 0x272   :  { %2663 = vmatprep.subr.bf16.mxu0 %v5147_v62  ;;  %2704 = vmatprep.subr.bf16.mxu1 %v5275_v63  ;;  %v1105_v62 = vld [vmem:[#allocation10 + $0x660] sm:$0xff]  ;;  %v5218_v63 = vcombine.low %v973_v58, %v977_v59  ;;  %v1082_v58 = vld [vmem:[#allocation10 + $0x5a8] sm:$0xff] }
 0x273   :  { %v5346_v1 = vcombine.low %v1101_v60, %v1105_v62  ;;  %v5347_v2 = vcombine.high %v1101_v60, %v1105_v62 }
 0x275   :  { %2664 = vmatpush1.bf16.msra.mxu0 %v5146_v5  ;;  %2705 = vmatpush1.bf16.msra.mxu1 %v5274_v7  ;;  %v1093_v5 = vld [vmem:[#allocation10 + $0x600] sm:$0xff]  ;;  %v5211_v7 = vcombine.high %v965_v3, %v969_v4 }
 0x276   :  { %2665 = vmatprep.subr.bf16.mxu0 %v5267_v8  ;;  %2706 = vmatprep.subr.bf16.mxu1 %v5395_v9  ;;  %v1097_v8 = vld [vmem:[#allocation10 + $0x620] sm:$0xff]  ;;  %v5210_v9 = vcombine.low %v965_v3, %v969_v4  ;;  %v946_v3 = vld [vmem:[#allocation10 + $0x168] sm:$0xff] }
 0x277   :  { %v5338_v10 = vcombine.low %v1093_v5, %v1097_v8  ;;  %v5339_v11 = vcombine.high %v1093_v5, %v1097_v8  ;;  %v1070_v5 = vld [vmem:[#allocation10 + $0x548] sm:$0xff] }
 0x279   :  { %2666 = vmatpush2.bf16.msra.mxu0 %v5266_v14  ;;  %2707 = vmatpush2.bf16.msra.mxu1 %v5394_v15  ;;  %v6475_v14 = vld [vmem:[#allocation10 + $0x5c8] sm:$0xff]  ;;  %v5205_v15 = vcombine.high %v6471_v12, %v6473_v13 }
 0x27a   :  { %2667 = vmatprep.subr.bf16.mxu0 %v5259_v16  ;;  %2708 = vmatprep.subr.bf16.mxu1 %v5387_v17  ;;  %v6479_v16 = vld [vmem:[#allocation10 + $0x5e8] sm:$0xff]  ;;  %v5204_v17 = vcombine.low %v6471_v12, %v6473_v13 }
 0x27b   :  { %v5332_v18 = vcombine.low %v6475_v14, %v6479_v16  ;;  %v5333_v19 = vcombine.high %v6475_v14, %v6479_v16  ;;  %v934_v16 = vld [vmem:[#allocation10 + $0x108] sm:$0xff] }
 0x27d   :  { %2668 = vmatpush2.bf16.msra.mxu0 %v5258_v22  ;;  %2709 = vmatpush2.bf16.msra.mxu1 %v5386_v23 }
 0x27e   :  { %2669 = vmatprep.subr.bf16.mxu0 %v5251_v24  ;;  %2710 = vmatprep.subr.bf16.mxu1 %v5379_v6 }
 0x281   :  { %2670 = vmatpush2.bf16.msra.mxu0 %v5250_v29  ;;  %2711 = vmatpush2.bf16.msra.mxu1 %v5378_v30 }
 0x282   :  { %2671 = vmatprep.subr.bf16.mxu0 %v5243_v31  ;;  %2712 = vmatprep.subr.bf16.mxu1 %v5371_v34 }
 0x285   :  { %2672 = vmatpush2.bf16.msra.mxu0 %v5242_v41  ;;  %2713 = vmatpush2.bf16.msra.mxu1 %v5370_v42 }
 0x286   :  { %2673 = vmatprep.subr.bf16.mxu0 %v5235_v44  ;;  %2714 = vmatprep.subr.bf16.mxu1 %v5363_v45 }
 0x289   :  { %2674 = vmatpush2.bf16.msra.mxu0 %v5234_v46  ;;  %2715 = vmatpush2.bf16.msra.mxu1 %v5362_v49 }
 0x28a   :  { %2675 = vmatprep.subr.bf16.mxu0 %v5227_v53  ;;  %2716 = vmatprep.subr.bf16.mxu1 %v5355_v55 }
 0x28d   :  { %2676 = vmatpush2.bf16.msra.mxu0 %v5226_v56  ;;  %2717 = vmatpush2.bf16.msra.mxu1 %v5354_v57  ;;  %v1078_v57 = vld [vmem:[#allocation10 + $0x588] sm:$0xff] }
 0x28e   :  { %2677 = vmatprep.subr.bf16.mxu0 %v5219_v61  ;;  %2718 = vmatprep.subr.bf16.mxu1 %v5347_v2  ;;  %v942_v2 = vld [vmem:[#allocation10 + $0x148] sm:$0xff]  ;;  %v5325_v4 = vcombine.high %v1078_v57, %v1082_v58 }
 0x28f   :  { %v5189_v12 = vcombine.high %v942_v2, %v946_v3 }
 0x291   :  { %2678 = vmatpush2.bf16.msra.mxu0 %v5218_v63  ;;  %2719 = vmatpush2.bf16.msra.mxu1 %v5346_v1 }
 0x292   :  { %2679 = vmatprep.subr.bf16.mxu0 %v5211_v7  ;;  %2720 = vmatprep.subr.bf16.mxu1 %v5339_v11  ;;  %v1074_v7 = vld [vmem:[#allocation10 + $0x568] sm:$0xff]  ;;  %v5324_v11 = vcombine.low %v1078_v57, %v1082_v58 }
 0x295   :  { %2680 = vmatpush2.bf16.msra.mxu0 %v5210_v9  ;;  %2721 = vmatpush2.bf16.msra.mxu1 %v5338_v10 }
 0x296   :  { %2731 = vmatprep.subr.bf16.mxu0 %v5205_v15  ;;  %2772 = vmatprep.subr.bf16.mxu1 %v5333_v19  ;;  %v5317_v15 = vcombine.high %v1070_v5, %v1074_v7  ;;  %v938_v19 = vld [vmem:[#allocation10 + $0x128] sm:$0xff] }
 0x308   :  { %v805_v21 = vpop.f32.mrf.mxu0  ;;  %v846_v22 = vpop.f32.mrf.mxu1 }
 0x309   :  { %v856_v23 = vrot.slane %v805_v21, %v6455_v43  ;;  %v864_v24 = vrot.slane %v846_v22, %v6455_v43  ;;  %v876_v6 = vrot.slane %v805_v21, %v6488_v20  ;;  %v884_v29 = vrot.slane %v846_v22, %v6488_v20  ;;  %v1062_v21 = vld [vmem:[#allocation10 + $0x508] sm:$0xff] }
 0x30a   :  { %v807_v25 = vpop.f32.mrf.mxu0  ;;  %v848_v26 = vpop.f32.mrf.mxu1  ;;  %v1066_v22 = vld [vmem:[#allocation10 + $0x528] sm:$0xff] }
 0x30b   :  { %v869_v27 = vmul.f32 %v856_v23, %v6414_v39  ;;  %v871_v28 = vmul.f32 %v864_v24, %v6416_v40  ;;  %v860_v30 = vrot.slane %v807_v25, %v6455_v43  ;;  %v868_v32 = vrot.slane %v848_v26, %v6455_v43 }
 0x30c   :  { %v809_v31 = vpop.f32.mrf.mxu0  ;;  %v850_v34 = vpop.f32.mrf.mxu1  ;;  %v880_v38 = vrot.slane %v807_v25, %v6488_v20  ;;  %v888_v39 = vrot.slane %v848_v26, %v6488_v20  ;;  %v5188_v23 = vcombine.low %v942_v2, %v946_v3  ;;  %v5316_v24 = vcombine.low %v1070_v5, %v1074_v7  ;;  %v906_v2 = vld [vmem:[#allocation10 + $0x28] sm:$0xff] }
 0x30d   :  { %v889_v35 = vadd.f32 %v876_v6, %v869_v27  ;;  %v891_v36 = vadd.f32 %v884_v29, %v871_v28  ;;  %v870_v37 = vmul.f32 %v860_v30, %v6426_v47  ;;  %v872_v41 = vmul.f32 %v868_v32, %v6428_v48  ;;  %v954_v47 = vld [vmem:[#allocation10 + $0x1a8] sm:$0xff] }
 0x30e   :  { %v810_v42 = vpop.f32.mrf.mxu0  ;;  %v851_v40 = vpop.f32.mrf.mxu1  ;;  %v5197_v1 = vcombine.high %v950_v54, %v954_v47  ;;  %v5196_v10 = vcombine.low %v950_v54, %v954_v47  ;;  %v5181_v6 = vcombine.high %v934_v16, %v938_v19  ;;  %v5309_v27 = vcombine.high %v1062_v21, %v1066_v22  ;;  %v926_v28 = vld [vmem:[#allocation10 + $0xc8] sm:$0xff] }
 0x30f   :  { %v890_v44 = vadd.f32 %v880_v38, %v870_v37  ;;  %v893_v45 = vmax.f32 %v889_v35, 0.0  ;;  %v892_v46 = vadd.f32 %v888_v39, %v872_v41  ;;  %v895_v51 = vmax.f32 %v891_v36, 0.0  ;;  %v930_v29 = vld [vmem:[#allocation10 + $0xe8] sm:$0xff] }
 0x310   :  { %v6502_v49 = vpop.f32.mrf.mxu0  ;;  %v6504_v50 = vpop.f32.mrf.mxu1  ;;  %v1054_v30 = vld [vmem:[#allocation10 + $0x4c8] sm:$0xff]  ;;  %v5180_v35 = vcombine.low %v934_v16, %v938_v19  ;;  %v5308_v36 = vcombine.low %v1062_v21, %v1066_v22  ;;  %v5173_v37 = vcombine.high %v926_v28, %v930_v29 }
 0x311   :  { %v894_v52 = vmax.f32 %v890_v44, 0.0  ;;  %v896_v53 = vmax.f32 %v892_v46, 0.0  ;;  %v6512_v59 = vpack.c.bf16 %v893_v45, %v893_v45  ;;  %v6516_v63 = vpack.c.bf16 %v895_v51, %v895_v51  ;;  %v1058_v32 = vld [vmem:[#allocation10 + $0x4e8] sm:$0xff] }
 0x312   :  { %v6506_v55 = vpop.f32.mrf.mxu0  ;;  %v6508_v56 = vpop.f32.mrf.mxu1  ;;  %v5301_v38 = vcombine.high %v1054_v30, %v1058_v32  ;;  %v918_v41 = vld [vmem:[#allocation10 + $0x88] sm:$0xff]  ;;  %v5172_v44 = vcombine.low %v926_v28, %v930_v29  ;;  %v5300_v45 = vcombine.low %v1054_v30, %v1058_v32 }
 0x313   :  { %v6510_v48 = vpack.c.bf16 %v894_v52, %v894_v52  ;;  %v6514_v60 = vpack.c.bf16 %v896_v53, %v896_v53  ;;  %v922_v39 = vld [vmem:[#allocation10 + $0xa8] sm:$0xff] }
 0x314   :  { %v1243_v61 = vpop.f32.mrf.mxu0  ;;  %v1284_v62 = vpop.f32.mrf.mxu1  ;;  %v1046_v42 = vld [vmem:[#allocation10 + $0x488] sm:$0xff]  ;;  %v5165_v46 = vcombine.high %v918_v41, %v922_v39  ;;  %v5164_v57 = vcombine.low %v918_v41, %v922_v39 }
 0x315   :  { %2681 = vmatprep.mubr.bf16.mxu0 %v6510_v48  ;;  %2722 = vmatprep.mubr.bf16.mxu1 %v6514_v60  ;;  %v1050_v40 = vld [vmem:[#allocation10 + $0x4a8] sm:$0xff] }
 0x316   :  { %2682 = vmatmul.mubr.bf16.vlgmr.msra.gmra.mxu0 %v6512_v59  ;;  %v1244_v8 = vpop.f32.mrf.mxu0  ;;  %v1285_v9 = vpop.f32.mrf.mxu1  ;;  %2723 = vmatmul.mubr.bf16.vlgmr.msra.gmra.mxu1 %v6516_v63  ;;  %v5293_v51 = vcombine.high %v1046_v42, %v1050_v40  ;;  %v910_v52 = vld [vmem:[#allocation10 + $0x48] sm:$0xff]  ;;  %v5292_v58 = vcombine.low %v1046_v42, %v1050_v40 }
 0x317   :  { %2732 = vmatpush1.bf16.msra.mxu0 %v5204_v17  ;;  %2773 = vmatpush1.bf16.msra.mxu1 %v5332_v18  ;;  %v914_v53 = vld [vmem:[#allocation10 + $0x68] sm:$0xff] }
 0x318   :  { %2763 = vmatprep.mubr.bf16.mxu0 %v6510_v48  ;;  %v6523_v13 = vpop.f32.mrf.mxu0  ;;  %v6525_v14 = vpop.f32.mrf.mxu1  ;;  %2804 = vmatprep.mubr.bf16.mxu1 %v6514_v60  ;;  %v1038_v54 = vld [vmem:[#allocation10 + $0x448] sm:$0xff]  ;;  %v5157_v61 = vcombine.high %v910_v52, %v914_v53  ;;  %v5156_v5 = vcombine.low %v910_v52, %v914_v53 }
 0x319   :  { %2733 = vmatprep.subr.bf16.mxu0 %v5197_v1  ;;  %2774 = vmatprep.subr.bf16.mxu1 %v5325_v4  ;;  %v1042_v47 = vld [vmem:[#allocation10 + $0x468] sm:$0xff] }
 0x31a   :  { %v6528_v17 = vpop.f32.mrf.mxu0  ;;  %v6530_v18 = vpop.f32.mrf.mxu1  ;;  %v5285_v62 = vcombine.high %v1038_v54, %v1042_v47  ;;  %v902_v1 = vld [vmem:[#allocation10 + $0x8] sm:$0xff]  ;;  %v5284_v7 = vcombine.low %v1038_v54, %v1042_v47 }
 0x31b   :  { %2734 = vmatpush1.bf16.msra.mxu0 %v5196_v10  ;;  %2775 = vmatpush1.bf16.msra.mxu1 %v5324_v11  ;;  %v1030_v3 = vld [vmem:[#allocation10 + $0x408] sm:$0xff]  ;;  %v5149_v8 = vcombine.high %v902_v1, %v906_v2  ;;  %v5148_v16 = vcombine.low %v902_v1, %v906_v2 }
 0x31c   :  { %2735 = vmatprep.subr.bf16.mxu0 %v5189_v12  ;;  %v1325_v25 = vpop.f32.mrf.mxu0  ;;  %v1366_v26 = vpop.f32.mrf.mxu1  ;;  %2776 = vmatprep.subr.bf16.mxu1 %v5317_v15  ;;  %v1034_v4 = vld [vmem:[#allocation10 + $0x428] sm:$0xff] }
 0x31d   :  { %v5277_v9 = vcombine.high %v1030_v3, %v1034_v4  ;;  %v1022_v10 = vld [vmem:[#allocation10 + $0x3c8] sm:$0xff]  ;;  %v5276_v19 = vcombine.low %v1030_v3, %v1034_v4 }
 0x31e   :  { %v1326_v31 = vpop.f32.mrf.mxu0  ;;  %v1367_v34 = vpop.f32.mrf.mxu1  ;;  %v1026_v11 = vld [vmem:[#allocation10 + $0x3e8] sm:$0xff] }
 0x31f   :  { %2736 = vmatpush1.bf16.msra.mxu0 %v5188_v23  ;;  %2777 = vmatpush1.bf16.msra.mxu1 %v5316_v24  ;;  %v1150_v12 = vld [vmem:[#allocation10 + $0x7c8] sm:$0xff]  ;;  %v5269_v21 = vcombine.high %v1022_v10, %v1026_v11  ;;  %v5268_v26 = vcombine.low %v1022_v10, %v1026_v11 }
 0x320   :  { %2737 = vmatprep.subr.bf16.mxu0 %v5181_v6  ;;  %2778 = vmatprep.subr.bf16.mxu1 %v5309_v27  ;;  %v1154_v15 = vld [vmem:[#allocation10 + $0x7e8] sm:$0xff] }
 0x321   :  { %v5397_v22 = vcombine.high %v1150_v12, %v1154_v15  ;;  %v1014_v23 = vld [vmem:[#allocation10 + $0x388] sm:$0xff]  ;;  %v5396_v27 = vcombine.low %v1150_v12, %v1154_v15 }
 0x322   :  { %v1018_v24 = vld [vmem:[#allocation10 + $0x3a8] sm:$0xff] }
 0x323   :  { %2738 = vmatpush1.bf16.msra.mxu0 %v5180_v35  ;;  %2779 = vmatpush1.bf16.msra.mxu1 %v5308_v36  ;;  %v1142_v6 = vld [vmem:[#allocation10 + $0x788] sm:$0xff]  ;;  %v5261_v28 = vcombine.high %v1014_v23, %v1018_v24  ;;  %v5260_v35 = vcombine.low %v1014_v23, %v1018_v24 }
 0x324   :  { %2739 = vmatprep.subr.bf16.mxu0 %v5173_v37  ;;  %2780 = vmatprep.subr.bf16.mxu1 %v5301_v38  ;;  %v1146_v25 = vld [vmem:[#allocation10 + $0x7a8] sm:$0xff] }
 0x325   :  { %v5389_v29 = vcombine.high %v1142_v6, %v1146_v25  ;;  %v1006_v30 = vld [vmem:[#allocation10 + $0x348] sm:$0xff]  ;;  %v5388_v36 = vcombine.low %v1142_v6, %v1146_v25 }
 0x326   :  { %v1010_v32 = vld [vmem:[#allocation10 + $0x368] sm:$0xff] }
 0x327   :  { %2740 = vmatpush1.bf16.msra.mxu0 %v5172_v44  ;;  %2781 = vmatpush1.bf16.msra.mxu1 %v5300_v45  ;;  %v1134_v31 = vld [vmem:[#allocation10 + $0x748] sm:$0xff]  ;;  %v5253_v37 = vcombine.high %v1006_v30, %v1010_v32  ;;  %v5252_v44 = vcombine.low %v1006_v30, %v1010_v32  ;;  %v959_v30 = vld [vmem:[#allocation10 + $0x1d0] sm:$0xff] }
 0x328   :  { %2741 = vmatprep.subr.bf16.mxu0 %v5165_v46  ;;  %2782 = vmatprep.subr.bf16.mxu1 %v5293_v51  ;;  %v1138_v34 = vld [vmem:[#allocation10 + $0x768] sm:$0xff]  ;;  %v963_v32 = vld [vmem:[#allocation10 + $0x1f0] sm:$0xff] }
 0x329   :  { %v5381_v38 = vcombine.high %v1134_v31, %v1138_v34  ;;  %v998_v41 = vld [vmem:[#allocation10 + $0x308] sm:$0xff]  ;;  %v5380_v45 = vcombine.low %v1134_v31, %v1138_v34  ;;  %v1087_v31 = vld [vmem:[#allocation10 + $0x5d0] sm:$0xff] }
 0x32a   :  { %v1002_v39 = vld [vmem:[#allocation10 + $0x328] sm:$0xff]  ;;  %v1091_v34 = vld [vmem:[#allocation10 + $0x5f0] sm:$0xff] }
 0x32b   :  { %2742 = vmatpush1.bf16.msra.mxu0 %v5164_v57  ;;  %2783 = vmatpush1.bf16.msra.mxu1 %v5292_v58  ;;  %v1126_v42 = vld [vmem:[#allocation10 + $0x708] sm:$0xff]  ;;  %v5245_v46 = vcombine.high %v998_v41, %v1002_v39  ;;  %v5244_v57 = vcombine.low %v998_v41, %v1002_v39  ;;  %v951_v41 = vld [vmem:[#allocation10 + $0x190] sm:$0xff] }
 0x32c   :  { %2743 = vmatprep.subr.bf16.mxu0 %v5157_v61  ;;  %2784 = vmatprep.subr.bf16.mxu1 %v5285_v62  ;;  %v1130_v40 = vld [vmem:[#allocation10 + $0x728] sm:$0xff]  ;;  %v955_v39 = vld [vmem:[#allocation10 + $0x1b0] sm:$0xff] }
 0x32d   :  { %v5373_v51 = vcombine.high %v1126_v42, %v1130_v40  ;;  %v990_v52 = vld [vmem:[#allocation10 + $0x2c8] sm:$0xff]  ;;  %v5372_v58 = vcombine.low %v1126_v42, %v1130_v40  ;;  %v5206_v42 = vcombine.low %v959_v30, %v963_v32  ;;  %v1079_v40 = vld [vmem:[#allocation10 + $0x590] sm:$0xff] }
 0x32e   :  { %v994_v53 = vld [vmem:[#allocation10 + $0x2e8] sm:$0xff] }
 0x32f   :  { %2744 = vmatpush1.bf16.msra.mxu0 %v5156_v5  ;;  %2785 = vmatpush1.bf16.msra.mxu1 %v5284_v7  ;;  %v1118_v54 = vld [vmem:[#allocation10 + $0x6c8] sm:$0xff]  ;;  %v5237_v61 = vcombine.high %v990_v52, %v994_v53  ;;  %v5236_v5 = vcombine.low %v990_v52, %v994_v53  ;;  %v947_v52 = vld [vmem:[#allocation10 + $0x170] sm:$0xff] }
 0x330   :  { %2745 = vmatprep.subr.bf16.mxu0 %v5149_v8  ;;  %2786 = vmatprep.subr.bf16.mxu1 %v5277_v9  ;;  %v1122_v47 = vld [vmem:[#allocation10 + $0x6e8] sm:$0xff] }
 0x331   :  { %v5365_v62 = vcombine.high %v1118_v54, %v1122_v47  ;;  %v982_v1 = vld [vmem:[#allocation10 + $0x288] sm:$0xff]  ;;  %v5364_v7 = vcombine.low %v1118_v54, %v1122_v47  ;;  %v1071_v54 = vld [vmem:[#allocation10 + $0x550] sm:$0xff] }
 0x332   :  { %v986_v2 = vld [vmem:[#allocation10 + $0x2a8] sm:$0xff]  ;;  %v1075_v47 = vld [vmem:[#allocation10 + $0x570] sm:$0xff] }
 0x333   :  { %2746 = vmatpush1.bf16.msra.mxu0 %v5148_v16  ;;  %2787 = vmatpush1.bf16.msra.mxu1 %v5276_v19  ;;  %v1110_v3 = vld [vmem:[#allocation10 + $0x688] sm:$0xff]  ;;  %v5229_v8 = vcombine.high %v982_v1, %v986_v2  ;;  %v5228_v16 = vcombine.low %v982_v1, %v986_v2  ;;  %v935_v1 = vld [vmem:[#allocation10 + $0x110] sm:$0xff] }
 0x334   :  { %2747 = vmatprep.subr.bf16.mxu0 %v5269_v21  ;;  %2788 = vmatprep.subr.bf16.mxu1 %v5397_v22  ;;  %v1114_v4 = vld [vmem:[#allocation10 + $0x6a8] sm:$0xff]  ;;  %v939_v2 = vld [vmem:[#allocation10 + $0x130] sm:$0xff] }
 0x335   :  { %v5357_v9 = vcombine.high %v1110_v3, %v1114_v4  ;;  %v974_v10 = vld [vmem:[#allocation10 + $0x248] sm:$0xff]  ;;  %v5356_v19 = vcombine.low %v1110_v3, %v1114_v4  ;;  %v1063_v3 = vld [vmem:[#allocation10 + $0x510] sm:$0xff] }
 0x336   :  { %v978_v11 = vld [vmem:[#allocation10 + $0x268] sm:$0xff]  ;;  %v1067_v4 = vld [vmem:[#allocation10 + $0x530] sm:$0xff] }
 0x337   :  { %2748 = vmatpush2.bf16.msra.mxu0 %v5268_v26  ;;  %2789 = vmatpush2.bf16.msra.mxu1 %v5396_v27  ;;  %v1102_v12 = vld [vmem:[#allocation10 + $0x648] sm:$0xff]  ;;  %v5221_v21 = vcombine.high %v974_v10, %v978_v11  ;;  %v5220_v26 = vcombine.low %v974_v10, %v978_v11  ;;  %v927_v10 = vld [vmem:[#allocation10 + $0xd0] sm:$0xff] }
 0x338   :  { %2749 = vmatprep.subr.bf16.mxu0 %v5261_v28  ;;  %2790 = vmatprep.subr.bf16.mxu1 %v5389_v29  ;;  %v1106_v15 = vld [vmem:[#allocation10 + $0x668] sm:$0xff]  ;;  %v931_v11 = vld [vmem:[#allocation10 + $0xf0] sm:$0xff] }
 0x339   :  { %v5349_v22 = vcombine.high %v1102_v12, %v1106_v15  ;;  %v966_v23 = vld [vmem:[#allocation10 + $0x208] sm:$0xff]  ;;  %v5348_v27 = vcombine.low %v1102_v12, %v1106_v15  ;;  %v1055_v12 = vld [vmem:[#allocation10 + $0x4d0] sm:$0xff] }
 0x33a   :  { %v970_v24 = vld [vmem:[#allocation10 + $0x228] sm:$0xff]  ;;  %v1059_v15 = vld [vmem:[#allocation10 + $0x4f0] sm:$0xff] }
 0x33b   :  { %2750 = vmatpush2.bf16.msra.mxu0 %v5260_v35  ;;  %2791 = vmatpush2.bf16.msra.mxu1 %v5388_v36  ;;  %v1094_v6 = vld [vmem:[#allocation10 + $0x608] sm:$0xff]  ;;  %v5213_v28 = vcombine.high %v966_v23, %v970_v24  ;;  %v5212_v35 = vcombine.low %v966_v23, %v970_v24  ;;  %v919_v23 = vld [vmem:[#allocation10 + $0x90] sm:$0xff] }
 0x33c   :  { %2751 = vmatprep.subr.bf16.mxu0 %v5253_v37  ;;  %2792 = vmatprep.subr.bf16.mxu1 %v5381_v38  ;;  %v1098_v25 = vld [vmem:[#allocation10 + $0x628] sm:$0xff]  ;;  %v5207_v37 = vcombine.high %v959_v30, %v963_v32  ;;  %v5335_v38 = vcombine.high %v1087_v31, %v1091_v34  ;;  %v923_v24 = vld [vmem:[#allocation10 + $0xb0] sm:$0xff] }
 0x33d   :  { %v5341_v29 = vcombine.high %v1094_v6, %v1098_v25  ;;  %v5340_v36 = vcombine.low %v1094_v6, %v1098_v25  ;;  %v1047_v6 = vld [vmem:[#allocation10 + $0x490] sm:$0xff] }
 0x33e   :  { %v1051_v25 = vld [vmem:[#allocation10 + $0x4b0] sm:$0xff] }
 0x33f   :  { %2752 = vmatpush2.bf16.msra.mxu0 %v5252_v44  ;;  %2793 = vmatpush2.bf16.msra.mxu1 %v5380_v45  ;;  %v1083_v44 = vld [vmem:[#allocation10 + $0x5b0] sm:$0xff]  ;;  %v5334_v45 = vcombine.low %v1087_v31, %v1091_v34 }
 0x340   :  { %2753 = vmatprep.subr.bf16.mxu0 %v5245_v46  ;;  %2794 = vmatprep.subr.bf16.mxu1 %v5373_v51  ;;  %v5199_v46 = vcombine.high %v951_v41, %v955_v39  ;;  %v943_v51 = vld [vmem:[#allocation10 + $0x150] sm:$0xff]  ;;  %v5327_v53 = vcombine.high %v1079_v40, %v1083_v44 }
 0x341   :  { %v911_v30 = vld [vmem:[#allocation10 + $0x50] sm:$0xff] }
 0x342   :  { %v915_v32 = vld [vmem:[#allocation10 + $0x70] sm:$0xff] }
 0x343   :  { %2754 = vmatpush2.bf16.msra.mxu0 %v5244_v57  ;;  %2795 = vmatpush2.bf16.msra.mxu1 %v5372_v58  ;;  %v5198_v57 = vcombine.low %v951_v41, %v955_v39  ;;  %v5326_v58 = vcombine.low %v1079_v40, %v1083_v44  ;;  %v1039_v31 = vld [vmem:[#allocation10 + $0x450] sm:$0xff]  ;;  %v5158_v44 = vcombine.low %v911_v30, %v915_v32 }
 0x344   :  { %2755 = vmatprep.subr.bf16.mxu0 %v5237_v61  ;;  %2796 = vmatprep.subr.bf16.mxu1 %v5365_v62  ;;  %v5191_v61 = vcombine.high %v943_v51, %v947_v52  ;;  %v5319_v62 = vcombine.high %v1071_v54, %v1075_v47  ;;  %v1043_v34 = vld [vmem:[#allocation10 + $0x470] sm:$0xff] }
 0x345   :  { %v903_v41 = vld [vmem:[#allocation10 + $0x10] sm:$0xff] }
 0x346   :  { %v907_v39 = vld [vmem:[#allocation10 + $0x30] sm:$0xff] }
 0x347   :  { %2756 = vmatpush2.bf16.msra.mxu0 %v5236_v5  ;;  %2797 = vmatpush2.bf16.msra.mxu1 %v5364_v7  ;;  %v5190_v5 = vcombine.low %v943_v51, %v947_v52  ;;  %v5318_v7 = vcombine.low %v1071_v54, %v1075_v47  ;;  %v1035_v40 = vld [vmem:[#allocation10 + $0x430] sm:$0xff] }
 0x348   :  { %2757 = vmatprep.subr.bf16.mxu0 %v5229_v8  ;;  %2798 = vmatprep.subr.bf16.mxu1 %v5357_v9  ;;  %v5183_v8 = vcombine.high %v935_v1, %v939_v2  ;;  %v5311_v9 = vcombine.high %v1063_v3, %v1067_v4  ;;  %v1023_v52 = vld [vmem:[#allocation10 + $0x3d0] sm:$0xff] }
 0x349   :  { %v1151_v54 = vld [vmem:[#allocation10 + $0x7d0] sm:$0xff] }
 0x34a   :  { %v1155_v47 = vld [vmem:[#allocation10 + $0x7f0] sm:$0xff] }
 0x34b   :  { %2758 = vmatpush2.bf16.msra.mxu0 %v5228_v16  ;;  %2799 = vmatpush2.bf16.msra.mxu1 %v5356_v19  ;;  %v5182_v16 = vcombine.low %v935_v1, %v939_v2  ;;  %v5310_v19 = vcombine.low %v1063_v3, %v1067_v4  ;;  %v1015_v1 = vld [vmem:[#allocation10 + $0x390] sm:$0xff] }
 0x34c   :  { %2759 = vmatprep.subr.bf16.mxu0 %v5221_v21  ;;  %2800 = vmatprep.subr.bf16.mxu1 %v5349_v22  ;;  %v5175_v21 = vcombine.high %v927_v10, %v931_v11  ;;  %v5303_v22 = vcombine.high %v1055_v12, %v1059_v15  ;;  %v1019_v2 = vld [vmem:[#allocation10 + $0x3b0] sm:$0xff] }
 0x34d   :  { %v1143_v3 = vld [vmem:[#allocation10 + $0x790] sm:$0xff] }
 0x34e   :  { %v1147_v4 = vld [vmem:[#allocation10 + $0x7b0] sm:$0xff] }
 0x34f   :  { %2760 = vmatpush2.bf16.msra.mxu0 %v5220_v26  ;;  %2801 = vmatpush2.bf16.msra.mxu1 %v5348_v27  ;;  %v5174_v26 = vcombine.low %v927_v10, %v931_v11  ;;  %v5302_v27 = vcombine.low %v1055_v12, %v1059_v15  ;;  %v1007_v10 = vld [vmem:[#allocation10 + $0x350] sm:$0xff] }
 0x350   :  { %2761 = vmatprep.subr.bf16.mxu0 %v5213_v28  ;;  %2802 = vmatprep.subr.bf16.mxu1 %v5341_v29  ;;  %v5167_v28 = vcombine.high %v919_v23, %v923_v24  ;;  %v5295_v29 = vcombine.high %v1047_v6, %v1051_v25  ;;  %v1011_v11 = vld [vmem:[#allocation10 + $0x370] sm:$0xff] }
 0x351   :  { %v1135_v12 = vld [vmem:[#allocation10 + $0x750] sm:$0xff] }
 0x352   :  { %v1139_v15 = vld [vmem:[#allocation10 + $0x770] sm:$0xff] }
 0x353   :  { %2762 = vmatpush2.bf16.msra.mxu0 %v5212_v35  ;;  %2803 = vmatpush2.bf16.msra.mxu1 %v5340_v36  ;;  %v5166_v35 = vcombine.low %v919_v23, %v923_v24  ;;  %v5294_v36 = vcombine.low %v1047_v6, %v1051_v25  ;;  %v999_v23 = vld [vmem:[#allocation10 + $0x310] sm:$0xff] }
 0x354   :  { %2813 = vmatprep.subr.bf16.mxu0 %v5207_v37  ;;  %2854 = vmatprep.subr.bf16.mxu1 %v5335_v38  ;;  %v5159_v37 = vcombine.high %v911_v30, %v915_v32  ;;  %v5287_v38 = vcombine.high %v1039_v31, %v1043_v34  ;;  %v1003_v24 = vld [vmem:[#allocation10 + $0x330] sm:$0xff] }
 0x355   :  { %v1127_v6 = vld [vmem:[#allocation10 + $0x710] sm:$0xff] }
 0x356   :  { %2764 = vmatmul.mubr.bf16.vlgmr.msra.gmra.mxu0 %v6512_v59  ;;  %2805 = vmatmul.mubr.bf16.vlgmr.msra.gmra.mxu1 %v6516_v63  ;;  %v1131_v25 = vld [vmem:[#allocation10 + $0x730] sm:$0xff] }
 0x357   :  { %2814 = vmatpush1.bf16.msra.mxu0 %v5206_v42  ;;  %2845 = vmatprep.mubr.bf16.mxu0 %v6510_v48  ;;  %v1031_v42 = vld [vmem:[#allocation10 + $0x410] sm:$0xff] }
 0x358   :  { %2855 = vmatpush1.bf16.msra.mxu1 %v5334_v45  ;;  %2886 = vmatprep.mubr.bf16.mxu1 %v6514_v60  ;;  %v5286_v45 = vcombine.low %v1039_v31, %v1043_v34  ;;  %v5279_v51 = vcombine.high %v1031_v42, %v1035_v40  ;;  %v991_v30 = vld [vmem:[#allocation10 + $0x2d0] sm:$0xff] }
 0x359   :  { %2815 = vmatprep.subr.bf16.mxu0 %v5199_v46  ;;  %2856 = vmatprep.subr.bf16.mxu1 %v5327_v53  ;;  %v5151_v46 = vcombine.high %v903_v41, %v907_v39  ;;  %v1027_v53 = vld [vmem:[#allocation10 + $0x3f0] sm:$0xff] }
 0x35a   :  { %v995_v32 = vld [vmem:[#allocation10 + $0x2f0] sm:$0xff] }
 0x35b   :  { %2816 = vmatpush1.bf16.msra.mxu0 %v5198_v57  ;;  %v5150_v57 = vcombine.low %v903_v41, %v907_v39  ;;  %v1119_v31 = vld [vmem:[#allocation10 + $0x6d0] sm:$0xff] }
 0x35c   :  { %2857 = vmatpush1.bf16.msra.mxu1 %v5326_v58  ;;  %2817 = vmatprep.subr.bf16.mxu0 %v5191_v61  ;;  %v5278_v58 = vcombine.low %v1031_v42, %v1035_v40  ;;  %v5271_v61 = vcombine.high %v1023_v52, %v1027_v53  ;;  %v1123_v34 = vld [vmem:[#allocation10 + $0x6f0] sm:$0xff] }
 0x35d   :  { %2858 = vmatprep.subr.bf16.mxu1 %v5319_v62  ;;  %v5399_v62 = vcombine.high %v1151_v54, %v1155_v47  ;;  %v983_v41 = vld [vmem:[#allocation10 + $0x290] sm:$0xff] }
 0x35e   :  { %v987_v39 = vld [vmem:[#allocation10 + $0x2b0] sm:$0xff] }
 0x35f   :  { %2818 = vmatpush1.bf16.msra.mxu0 %v5190_v5  ;;  %v5270_v5 = vcombine.low %v1023_v52, %v1027_v53  ;;  %v1111_v42 = vld [vmem:[#allocation10 + $0x690] sm:$0xff] }
 0x360   :  { %2859 = vmatpush1.bf16.msra.mxu1 %v5318_v7  ;;  %2819 = vmatprep.subr.bf16.mxu0 %v5183_v8  ;;  %v5398_v7 = vcombine.low %v1151_v54, %v1155_v47  ;;  %v5263_v8 = vcombine.high %v1015_v1, %v1019_v2  ;;  %v1115_v40 = vld [vmem:[#allocation10 + $0x6b0] sm:$0xff] }
 0x361   :  { %2860 = vmatprep.subr.bf16.mxu1 %v5311_v9  ;;  %v5391_v9 = vcombine.high %v1143_v3, %v1147_v4  ;;  %v975_v52 = vld [vmem:[#allocation10 + $0x250] sm:$0xff] }
 0x362   :  { %v979_v53 = vld [vmem:[#allocation10 + $0x270] sm:$0xff] }
 0x363   :  { %2820 = vmatpush1.bf16.msra.mxu0 %v5182_v16  ;;  %v5262_v16 = vcombine.low %v1015_v1, %v1019_v2  ;;  %v1103_v54 = vld [vmem:[#allocation10 + $0x650] sm:$0xff] }
 0x364   :  { %2861 = vmatpush1.bf16.msra.mxu1 %v5310_v19  ;;  %2821 = vmatprep.subr.bf16.mxu0 %v5175_v21  ;;  %v5390_v19 = vcombine.low %v1143_v3, %v1147_v4  ;;  %v5255_v21 = vcombine.high %v1007_v10, %v1011_v11  ;;  %v1107_v47 = vld [vmem:[#allocation10 + $0x670] sm:$0xff] }
 0x365   :  { %2862 = vmatprep.subr.bf16.mxu1 %v5303_v22  ;;  %v5383_v22 = vcombine.high %v1135_v12, %v1139_v15  ;;  %v967_v1 = vld [vmem:[#allocation10 + $0x210] sm:$0xff] }
 0x366   :  { %v971_v2 = vld [vmem:[#allocation10 + $0x230] sm:$0xff] }
 0x367   :  { %2822 = vmatpush1.bf16.msra.mxu0 %v5174_v26  ;;  %v5254_v26 = vcombine.low %v1007_v10, %v1011_v11  ;;  %v1095_v3 = vld [vmem:[#allocation10 + $0x610] sm:$0xff]  ;;  %v960_v10 = vld [vmem:[#allocation10 + $0x1d8] sm:$0xff] }
 0x368   :  { %2863 = vmatpush1.bf16.msra.mxu1 %v5302_v27  ;;  %2823 = vmatprep.subr.bf16.mxu0 %v5167_v28  ;;  %v5382_v27 = vcombine.low %v1135_v12, %v1139_v15  ;;  %v5247_v28 = vcombine.high %v999_v23, %v1003_v24  ;;  %v1099_v4 = vld [vmem:[#allocation10 + $0x630] sm:$0xff]  ;;  %v964_v11 = vld [vmem:[#allocation10 + $0x1f8] sm:$0xff] }
 0x369   :  { %2864 = vmatprep.subr.bf16.mxu1 %v5295_v29  ;;  %v5375_v29 = vcombine.high %v1127_v6, %v1131_v25  ;;  %v1088_v12 = vld [vmem:[#allocation10 + $0x5d8] sm:$0xff] }
 0x36a   :  { %v1092_v15 = vld [vmem:[#allocation10 + $0x5f8] sm:$0xff] }
 0x36b   :  { %2824 = vmatpush1.bf16.msra.mxu0 %v5166_v35  ;;  %v5246_v35 = vcombine.low %v999_v23, %v1003_v24  ;;  %v952_v23 = vld [vmem:[#allocation10 + $0x198] sm:$0xff] }
 0x36c   :  { %2865 = vmatpush1.bf16.msra.mxu1 %v5294_v36  ;;  %2825 = vmatprep.subr.bf16.mxu0 %v5159_v37  ;;  %v5374_v36 = vcombine.low %v1127_v6, %v1131_v25  ;;  %v5239_v37 = vcombine.high %v991_v30, %v995_v32  ;;  %v956_v24 = vld [vmem:[#allocation10 + $0x1b8] sm:$0xff]  ;;  %v5208_v6 = vcombine.low %v960_v10, %v964_v11 }
 0x36d   :  { %2866 = vmatprep.subr.bf16.mxu1 %v5287_v38  ;;  %v5367_v38 = vcombine.high %v1119_v31, %v1123_v34  ;;  %v1080_v25 = vld [vmem:[#allocation10 + $0x598] sm:$0xff] }
 0x36f   :  { %2826 = vmatpush1.bf16.msra.mxu0 %v5158_v44  ;;  %v5238_v44 = vcombine.low %v991_v30, %v995_v32  ;;  %v948_v30 = vld [vmem:[#allocation10 + $0x178] sm:$0xff] }
 0x370   :  { %2867 = vmatpush1.bf16.msra.mxu1 %v5286_v45  ;;  %2827 = vmatprep.subr.bf16.mxu0 %v5151_v46  ;;  %v5366_v45 = vcombine.low %v1119_v31, %v1123_v34  ;;  %v5231_v46 = vcombine.high %v983_v41, %v987_v39  ;;  %v1072_v31 = vld [vmem:[#allocation10 + $0x558] sm:$0xff] }
 0x371   :  { %2868 = vmatprep.subr.bf16.mxu1 %v5279_v51  ;;  %v5359_v51 = vcombine.high %v1111_v42, %v1115_v40  ;;  %v1076_v34 = vld [vmem:[#allocation10 + $0x578] sm:$0xff] }
 0x373   :  { %2828 = vmatpush1.bf16.msra.mxu0 %v5150_v57  ;;  %v5230_v57 = vcombine.low %v983_v41, %v987_v39  ;;  %v936_v41 = vld [vmem:[#allocation10 + $0x118] sm:$0xff] }
 0x374   :  { %2869 = vmatpush1.bf16.msra.mxu1 %v5278_v58  ;;  %2829 = vmatprep.subr.bf16.mxu0 %v5271_v61  ;;  %v5358_v58 = vcombine.low %v1111_v42, %v1115_v40  ;;  %v5223_v61 = vcombine.high %v975_v52, %v979_v53  ;;  %v940_v39 = vld [vmem:[#allocation10 + $0x138] sm:$0xff] }
 0x375   :  { %2870 = vmatprep.subr.bf16.mxu1 %v5399_v62  ;;  %v5351_v62 = vcombine.high %v1103_v54, %v1107_v47  ;;  %v1064_v42 = vld [vmem:[#allocation10 + $0x518] sm:$0xff] }
 0x376   :  { %v1068_v40 = vld [vmem:[#allocation10 + $0x538] sm:$0xff] }
 0x377   :  { %2830 = vmatpush2.bf16.msra.mxu0 %v5270_v5  ;;  %v5222_v5 = vcombine.low %v975_v52, %v979_v53  ;;  %v932_v52 = vld [vmem:[#allocation10 + $0xf8] sm:$0xff] }
 0x378   :  { %2871 = vmatpush2.bf16.msra.mxu1 %v5398_v7  ;;  %2831 = vmatprep.subr.bf16.mxu0 %v5263_v8  ;;  %v5350_v7 = vcombine.low %v1103_v54, %v1107_v47  ;;  %v5215_v8 = vcombine.high %v967_v1, %v971_v2  ;;  %v1056_v53 = vld [vmem:[#allocation10 + $0x4d8] sm:$0xff]  ;;  %v5312_v47 = vcombine.low %v1064_v42, %v1068_v40 }
 0x379   :  { %2872 = vmatprep.subr.bf16.mxu1 %v5391_v9  ;;  %v5343_v9 = vcombine.high %v1095_v3, %v1099_v4  ;;  %v1060_v54 = vld [vmem:[#allocation10 + $0x4f8] sm:$0xff] }
 0x37b   :  { %2832 = vmatpush2.bf16.msra.mxu0 %v5262_v16  ;;  %v5214_v16 = vcombine.low %v967_v1, %v971_v2  ;;  %v1048_v1 = vld [vmem:[#allocation10 + $0x498] sm:$0xff] }
 0x37c   :  { %2873 = vmatpush2.bf16.msra.mxu1 %v5390_v19  ;;  %2833 = vmatprep.subr.bf16.mxu0 %v5255_v21  ;;  %v5342_v19 = vcombine.low %v1095_v3, %v1099_v4  ;;  %v5209_v21 = vcombine.high %v960_v10, %v964_v11  ;;  %v1052_v2 = vld [vmem:[#allocation10 + $0x4b8] sm:$0xff]  ;;  %v5304_v4 = vcombine.low %v1056_v53, %v1060_v54 }
 0x37d   :  { %2874 = vmatprep.subr.bf16.mxu1 %v5383_v22  ;;  %v5337_v22 = vcombine.high %v1088_v12, %v1092_v15  ;;  %v1040_v10 = vld [vmem:[#allocation10 + $0x458] sm:$0xff] }
 0x37e   :  { %v1044_v11 = vld [vmem:[#allocation10 + $0x478] sm:$0xff] }
 0x37f   :  { %2834 = vmatpush2.bf16.msra.mxu0 %v5254_v26  ;;  %v1084_v26 = vld [vmem:[#allocation10 + $0x5b8] sm:$0xff] }
 0x380   :  { %2875 = vmatpush2.bf16.msra.mxu1 %v5382_v27  ;;  %2835 = vmatprep.subr.bf16.mxu0 %v5247_v28  ;;  %v5336_v27 = vcombine.low %v1088_v12, %v1092_v15  ;;  %v5201_v28 = vcombine.high %v952_v23, %v956_v24  ;;  %v5329_v32 = vcombine.high %v1080_v25, %v1084_v26 }
 0x381   :  { %2876 = vmatprep.subr.bf16.mxu1 %v5375_v29  ;;  %v944_v29 = vld [vmem:[#allocation10 + $0x158] sm:$0xff]  ;;  %v5296_v15 = vcombine.low %v1048_v1, %v1052_v2 }
 0x383   :  { %2836 = vmatpush2.bf16.msra.mxu0 %v5246_v35  ;;  %v5200_v35 = vcombine.low %v952_v23, %v956_v24  ;;  %v1032_v23 = vld [vmem:[#allocation10 + $0x418] sm:$0xff] }
 0x384   :  { %2877 = vmatpush2.bf16.msra.mxu1 %v5374_v36  ;;  %2837 = vmatprep.subr.bf16.mxu0 %v5239_v37  ;;  %v5328_v36 = vcombine.low %v1080_v25, %v1084_v26  ;;  %v5193_v37 = vcombine.high %v944_v29, %v948_v30  ;;  %v1036_v24 = vld [vmem:[#allocation10 + $0x438] sm:$0xff]  ;;  %v5288_v25 = vcombine.low %v1040_v10, %v1044_v11 }
 0x385   :  { %2878 = vmatprep.subr.bf16.mxu1 %v5367_v38  ;;  %v5321_v38 = vcombine.high %v1072_v31, %v1076_v34 }
 0x387   :  { %2838 = vmatpush2.bf16.msra.mxu0 %v5238_v44  ;;  %v5192_v44 = vcombine.low %v944_v29, %v948_v30  ;;  %v1028_v29 = vld [vmem:[#allocation10 + $0x3f8] sm:$0xff] }
 0x388   :  { %2879 = vmatpush2.bf16.msra.mxu1 %v5366_v45  ;;  %2839 = vmatprep.subr.bf16.mxu0 %v5231_v46  ;;  %v5320_v45 = vcombine.low %v1072_v31, %v1076_v34  ;;  %v5185_v46 = vcombine.high %v936_v41, %v940_v39  ;;  %v1152_v30 = vld [vmem:[#allocation10 + $0x7d8] sm:$0xff]  ;;  %v5280_v34 = vcombine.low %v1032_v23, %v1036_v24 }
 0x389   :  { %2880 = vmatprep.subr.bf16.mxu1 %v5359_v51  ;;  %v928_v51 = vld [vmem:[#allocation10 + $0xd8] sm:$0xff] }
 0x38a   :  { %v5176_v3 = vcombine.low %v928_v51, %v932_v52 }
 0x38b   :  { %2840 = vmatpush2.bf16.msra.mxu0 %v5230_v57  ;;  %v5177_v57 = vcombine.high %v928_v51, %v932_v52  ;;  %v1136_v51 = vld [vmem:[#allocation10 + $0x758] sm:$0xff] }
 0x38c   :  { %2881 = vmatpush2.bf16.msra.mxu1 %v5358_v58  ;;  %2841 = vmatprep.subr.bf16.mxu0 %v5223_v61  ;;  %v5305_v58 = vcombine.high %v1056_v53, %v1060_v54  ;;  %v920_v61 = vld [vmem:[#allocation10 + $0x98] sm:$0xff] }
 0x38d   :  { %2882 = vmatprep.subr.bf16.mxu1 %v5351_v62  ;;  %v924_v62 = vld [vmem:[#allocation10 + $0xb8] sm:$0xff] }
 0x38e   :  { %v5168_v12 = vcombine.low %v920_v61, %v924_v62  ;;  %v1140_v52 = vld [vmem:[#allocation10 + $0x778] sm:$0xff] }
 0x38f   :  { %2842 = vmatpush2.bf16.msra.mxu0 %v5222_v5  ;;  %v5169_v5 = vcombine.high %v920_v61, %v924_v62  ;;  %v1128_v61 = vld [vmem:[#allocation10 + $0x718] sm:$0xff] }
 0x390   :  { %2883 = vmatpush2.bf16.msra.mxu1 %v5350_v7  ;;  %2843 = vmatprep.subr.bf16.mxu0 %v5215_v8  ;;  %v5297_v7 = vcombine.high %v1048_v1, %v1052_v2  ;;  %v912_v8 = vld [vmem:[#allocation10 + $0x58] sm:$0xff]  ;;  %v5384_v2 = vcombine.low %v1136_v51, %v1140_v52 }
 0x391   :  { %2884 = vmatprep.subr.bf16.mxu1 %v5343_v9  ;;  %v916_v9 = vld [vmem:[#allocation10 + $0x78] sm:$0xff] }
 0x392   :  { %v1132_v62 = vld [vmem:[#allocation10 + $0x738] sm:$0xff] }
 0x393   :  { %2844 = vmatpush2.bf16.msra.mxu0 %v5214_v16  ;;  %v5161_v16 = vcombine.high %v912_v8, %v916_v9 }
 0x394   :  { %2885 = vmatpush2.bf16.msra.mxu1 %v5342_v19  ;;  %2895 = vmatprep.subr.bf16.mxu0 %v5209_v21  ;;  %v5289_v19 = vcombine.high %v1040_v10, %v1044_v11  ;;  %v904_v21 = vld [vmem:[#allocation10 + $0x18] sm:$0xff]  ;;  %v5376_v11 = vcombine.low %v1128_v61, %v1132_v62 }
 0x395   :  { %2936 = vmatprep.subr.bf16.mxu1 %v5337_v22  ;;  %v908_v22 = vld [vmem:[#allocation10 + $0x38] sm:$0xff] }
 0x396   :  { %2846 = vmatmul.mubr.bf16.vlgmr.msra.gmra.mxu0 %v6512_v59  ;;  %v5153_v26 = vcombine.high %v904_v21, %v908_v22  ;;  %v5152_v31 = vcombine.low %v904_v21, %v908_v22  ;;  %v1112_v21 = vld [vmem:[#allocation10 + $0x698] sm:$0xff] }
 0x397   :  { %2887 = vmatmul.mubr.bf16.vlgmr.msra.gmra.mxu1 %v6516_v63  ;;  %2896 = vmatpush1.bf16.msra.mxu0 %v5208_v6  ;;  %v5160_v6 = vcombine.low %v912_v8, %v916_v9  ;;  %v1120_v8 = vld [vmem:[#allocation10 + $0x6d8] sm:$0xff] }
 0x398   :  { %2927 = vmatprep.mubr.bf16.mxu0 %v6510_v48  ;;  %2937 = vmatpush1.bf16.msra.mxu1 %v5336_v27  ;;  %v5313_v48 = vcombine.high %v1064_v42, %v1068_v40  ;;  %v5281_v27 = vcombine.high %v1032_v23, %v1036_v24  ;;  %v1124_v9 = vld [vmem:[#allocation10 + $0x6f8] sm:$0xff] }
 0x399   :  { %2968 = vmatprep.mubr.bf16.mxu1 %v6514_v60  ;;  %2897 = vmatprep.subr.bf16.mxu0 %v5201_v28  ;;  %v5184_v60 = vcombine.low %v936_v41, %v940_v39  ;;  %v1024_v28 = vld [vmem:[#allocation10 + $0x3d8] sm:$0xff]  ;;  %v5368_v24 = vcombine.low %v1120_v8, %v1124_v9 }
 0x39a   :  { %2938 = vmatprep.subr.bf16.mxu1 %v5329_v32  ;;  %v1156_v32 = vld [vmem:[#allocation10 + $0x7f8] sm:$0xff]  ;;  %v5272_v42 = vcombine.low %v1024_v28, %v1028_v29 }
 0x39b   :  { %2898 = vmatpush1.bf16.msra.mxu0 %v5200_v35  ;;  %v5273_v35 = vcombine.high %v1024_v28, %v1028_v29  ;;  %v1144_v41 = vld [vmem:[#allocation10 + $0x798] sm:$0xff]  ;;  %v5400_v40 = vcombine.low %v1152_v30, %v1156_v32 }
 0x39c   :  { %2939 = vmatpush1.bf16.msra.mxu1 %v5328_v36  ;;  %2899 = vmatprep.subr.bf16.mxu0 %v5193_v37  ;;  %v5401_v36 = vcombine.high %v1152_v30, %v1156_v32  ;;  %v1016_v37 = vld [vmem:[#allocation10 + $0x398] sm:$0xff] }
 0x39d   :  { %2940 = vmatprep.subr.bf16.mxu1 %v5321_v38  ;;  %v1020_v38 = vld [vmem:[#allocation10 + $0x3b8] sm:$0xff] }
 0x39e   :  { %v1148_v39 = vld [vmem:[#allocation10 + $0x7b8] sm:$0xff]  ;;  %v5264_v53 = vcombine.low %v1016_v37, %v1020_v38 }
 0x39f   :  { %2900 = vmatpush1.bf16.msra.mxu0 %v5192_v44  ;;  %v5265_v44 = vcombine.high %v1016_v37, %v1020_v38  ;;  %v5392_v54 = vcombine.low %v1144_v41, %v1148_v39  ;;  %v1116_v22 = vld [vmem:[#allocation10 + $0x6b8] sm:$0xff] }
 0x3a0   :  { %2941 = vmatpush1.bf16.msra.mxu1 %v5320_v45  ;;  %2901 = vmatprep.subr.bf16.mxu0 %v5185_v46  ;;  %v5393_v45 = vcombine.high %v1144_v41, %v1148_v39  ;;  %v1008_v46 = vld [vmem:[#allocation10 + $0x358] sm:$0xff]  ;;  %v5360_v32 = vcombine.low %v1112_v21, %v1116_v22 }
 0x3a1   :  { %2942 = vmatprep.subr.bf16.mxu1 %v5313_v48  ;;  %v1012_v48 = vld [vmem:[#allocation10 + $0x378] sm:$0xff] }
 0x3a2   :  { %v5256_v1 = vcombine.low %v1008_v46, %v1012_v48  ;;  %v1104_v28 = vld [vmem:[#allocation10 + $0x658] sm:$0xff] }
 0x3a3   :  { %2902 = vmatpush1.bf16.msra.mxu0 %v5184_v60  ;;  %v5257_v60 = vcombine.high %v1008_v46, %v1012_v48  ;;  %v1108_v29 = vld [vmem:[#allocation10 + $0x678] sm:$0xff] }
 0x3a4   :  { %2943 = vmatpush1.bf16.msra.mxu1 %v5312_v47  ;;  %2903 = vmatprep.subr.bf16.mxu0 %v5177_v57  ;;  %v5385_v47 = vcombine.high %v1136_v51, %v1140_v52  ;;  %v1000_v57 = vld [vmem:[#allocation10 + $0x318] sm:$0xff]  ;;  %v5352_v39 = vcombine.low %v1104_v28, %v1108_v29  ;;  %v5812_v52 = vld [vmem:[#allocation13 + $0x70] sm:$0xff]  }
 0x3a5   :  { %2944 = vmatprep.subr.bf16.mxu1 %v5305_v58  ;;  %v1004_v58 = vld [vmem:[#allocation10 + $0x338] sm:$0xff] }
 0x3a6   :  { %v5248_v10 = vcombine.low %v1000_v57, %v1004_v58  ;;  %v1096_v37 = vld [vmem:[#allocation10 + $0x618] sm:$0xff] }
 0x3a7   :  { %2904 = vmatpush1.bf16.msra.mxu0 %v5176_v3  ;;  %v5249_v3 = vcombine.high %v1000_v57, %v1004_v58  ;;  %v1100_v38 = vld [vmem:[#allocation10 + $0x638] sm:$0xff]  ;;  %v5813_v58 = vld [vmem:[#allocation13 + $0x30] sm:$0xff]  }
 0x3a8   :  { %2945 = vmatpush1.bf16.msra.mxu1 %v5304_v4  ;;  %2905 = vmatprep.subr.bf16.mxu0 %v5169_v5  ;;  %v5377_v4 = vcombine.high %v1128_v61, %v1132_v62  ;;  %v992_v5 = vld [vmem:[#allocation10 + $0x2d8] sm:$0xff]  ;;  %v5814_v62 = vld [vmem:[#allocation13 + $0x68] sm:$0xff]  }
 0x3a9   :  { %2946 = vmatprep.subr.bf16.mxu1 %v5297_v7  ;;  %v996_v7 = vld [vmem:[#allocation10 + $0x2f8] sm:$0xff] }
 0x3aa   :  { %v5240_v23 = vcombine.low %v992_v5, %v996_v7  ;;  %v5810_v46 = vld [vmem:[#allocation13 + $0x78] sm:$0xff]  }
 0x3ab   :  { %2906 = vmatpush1.bf16.msra.mxu0 %v5168_v12  ;;  %v5241_v12 = vcombine.high %v992_v5, %v996_v7  ;;  %v5826_v48 = vld [vmem:[#allocation13 + $0xf8] sm:$0xff]  }
 0x3ac   :  { %2947 = vmatpush1.bf16.msra.mxu1 %v5296_v15  ;;  %2907 = vmatprep.subr.bf16.mxu0 %v5161_v16  ;;  %v5369_v15 = vcombine.high %v1120_v8, %v1124_v9  ;;  %v984_v16 = vld [vmem:[#allocation10 + $0x298] sm:$0xff]  ;;  %v5815_v9 = vld [vmem:[#allocation13 + $0x28] sm:$0xff]  }
 0x3ad   :  { %2948 = vmatprep.subr.bf16.mxu1 %v5289_v19  ;;  %v988_v19 = vld [vmem:[#allocation10 + $0x2b8] sm:$0xff] }
 0x3ae   :  { %v5232_v30 = vcombine.low %v984_v16, %v988_v19  ;;  %v5811_v51 = vld [vmem:[#allocation13 + $0x38] sm:$0xff]  }
 0x3af   :  { %2908 = vmatpush1.bf16.msra.mxu0 %v5160_v6  ;;  %v5233_v6 = vcombine.high %v984_v16, %v988_v19 }
 0x3b0   :  { %2949 = vmatpush1.bf16.msra.mxu1 %v5288_v25  ;;  %2909 = vmatprep.subr.bf16.mxu0 %v5153_v26  ;;  %v5361_v25 = vcombine.high %v1112_v21, %v1116_v22  ;;  %v976_v26 = vld [vmem:[#allocation10 + $0x258] sm:$0xff]  ;;  %v5832_v22 = vld [vmem:[#allocation13 + $0xe0] sm:$0xff]  }
 0x3b1   :  { %2950 = vmatprep.subr.bf16.mxu1 %v5281_v27  ;;  %v980_v27 = vld [vmem:[#allocation10 + $0x278] sm:$0xff] }
 0x3b2   :  { %v5224_v41 = vcombine.low %v976_v26, %v980_v27 }
 0x3b3   :  { %2910 = vmatpush1.bf16.msra.mxu0 %v5152_v31  ;;  %v5225_v31 = vcombine.high %v976_v26, %v980_v27  ;;  %v5817_v26 = vld [vmem:[#allocation13 + $0x20] sm:$0xff]  }
 0x3b4   :  { %2951 = vmatpush1.bf16.msra.mxu1 %v5280_v34  ;;  %2911 = vmatprep.subr.bf16.mxu0 %v5273_v35  ;;  %v5353_v34 = vcombine.high %v1104_v28, %v1108_v29  ;;  %v968_v35 = vld [vmem:[#allocation10 + $0x218] sm:$0xff] }
 0x3b5   :  { %2952 = vmatprep.subr.bf16.mxu1 %v5401_v36  ;;  %v972_v36 = vld [vmem:[#allocation10 + $0x238] sm:$0xff] }
 0x3b7   :  { %2912 = vmatpush2.bf16.msra.mxu0 %v5272_v42  ;;  %v5217_v42 = vcombine.high %v968_v35, %v972_v36 }
 0x3b8   :  { %2953 = vmatpush2.bf16.msra.mxu1 %v5400_v40  ;;  %2913 = vmatprep.subr.bf16.mxu0 %v5265_v44  ;;  %v5345_v40 = vcombine.high %v1096_v37, %v1100_v38  ;;  %v5216_v44 = vcombine.low %v968_v35, %v972_v36 }
 0x3b9   :  { %2954 = vmatprep.subr.bf16.mxu1 %v5393_v45  ;;  %v5344_v45 = vcombine.low %v1096_v37, %v1100_v38  ;;  %v5819_v38 = vld [vmem:[#allocation13 + $0x18] sm:$0xff]  }
 0x3bb   :  { %2914 = vmatpush2.bf16.msra.mxu0 %v5264_v53  ;;  %v5827_v53 = vld [vmem:[#allocation13 + $0xb8] sm:$0xff]  }
 0x3bc   :  { %2955 = vmatpush2.bf16.msra.mxu1 %v5392_v54  ;;  %2915 = vmatprep.subr.bf16.mxu0 %v5257_v60  ;;  %v5828_v54 = vld [vmem:[#allocation13 + $0xf0] sm:$0xff]  }
 0x3bd   :  { %2956 = vmatprep.subr.bf16.mxu1 %v5385_v47 }
 0x3bf   :  { %2916 = vmatpush2.bf16.msra.mxu0 %v5256_v1  ;;  %v5829_v1 = vld [vmem:[#allocation13 + $0xb0] sm:$0xff]  }
 0x3c0   :  { %2957 = vmatpush2.bf16.msra.mxu1 %v5384_v2  ;;  %2917 = vmatprep.subr.bf16.mxu0 %v5249_v3 }
 0x3c1   :  { %2958 = vmatprep.subr.bf16.mxu1 %v5377_v4 }
 0x3c3   :  { %2918 = vmatpush2.bf16.msra.mxu0 %v5248_v10 }
 0x3c4   :  { %2959 = vmatpush2.bf16.msra.mxu1 %v5376_v11  ;;  %2919 = vmatprep.subr.bf16.mxu0 %v5241_v12  ;;  %v5816_v12 = vld [vmem:[#allocation13 + $0x60] sm:$0xff]  }
 0x3c5   :  { %2960 = vmatprep.subr.bf16.mxu1 %v5369_v15 }
 0x3c7   :  { %2920 = vmatpush2.bf16.msra.mxu0 %v5240_v23 }
 0x3c8   :  { %2961 = vmatpush2.bf16.msra.mxu1 %v5368_v24  ;;  %2921 = vmatprep.subr.bf16.mxu0 %v5233_v6 }
 0x3c9   :  { %2962 = vmatprep.subr.bf16.mxu1 %v5361_v25 }
 0x3cb   :  { %2922 = vmatpush2.bf16.msra.mxu0 %v5232_v30  ;;  %v5818_v30 = vld [vmem:[#allocation13 + $0x58] sm:$0xff]  }
 0x3cc   :  { %2963 = vmatpush2.bf16.msra.mxu1 %v5360_v32  ;;  %2923 = vmatprep.subr.bf16.mxu0 %v5225_v31  ;;  %v5833_v32 = vld [vmem:[#allocation13 + $0xa0] sm:$0xff]   ;;  %v5834_v31 = vld [vmem:[#allocation13 + $0xd8] sm:$0xff]  }
 0x3cd   :  { %2964 = vmatprep.subr.bf16.mxu1 %v5353_v34 }
 0x3cf   :  { %2924 = vmatpush2.bf16.msra.mxu0 %v5224_v41 }
 0x3d0   :  { %2965 = vmatpush2.bf16.msra.mxu1 %v5352_v39  ;;  %2925 = vmatprep.subr.bf16.mxu0 %v5217_v42  ;;  %v5820_v42 = vld [vmem:[#allocation13 + $0x50] sm:$0xff]  }
 0x3d1   :  { %2966 = vmatprep.subr.bf16.mxu1 %v5345_v40  ;;  %v5835_v40 = vld [vmem:[#allocation13 + $0x98] sm:$0xff]  }
 0x3d3   :  { %2926 = vmatpush2.bf16.msra.mxu0 %v5216_v44 }
 0x3d4   :  { %2967 = vmatpush2.bf16.msra.mxu1 %v5344_v45  ;;  %5652 = vmatprep.subr.bf16.mxu0 %v5810_v46  ;;  %v5836_v45 = vld [vmem:[#allocation13 + $0xd0] sm:$0xff]  }
 0x3d5   :  { %5674 = vmatprep.subr.bf16.mxu1 %v5826_v48 }
 0x3d6   :  { %2928 = vmatmul.mubr.bf16.vlgmr.msra.gmra.mxu0 %v6512_v59  ;;  %v2683_v60 = vpop.f32.mrf.mxu0  ;;  %v2724_v57 = vpop.f32.mrf.mxu1  ;;  %v5830_v59 = vld [vmem:[#allocation13 + $0xe8] sm:$0xff]  }
 0x3d7   :  { %2969 = vmatmul.mubr.bf16.vlgmr.msra.gmra.mxu1 %v6516_v63  ;;  %v2684_v47 = vadd.f32 %v2683_v60, %v6502_v49  ;;  %5653 = vmatpush3.bf16.msra.mxu0 %v5811_v51  ;;  %v5837_v60 = vld [vmem:[#allocation13 + $0x90] sm:$0xff]  }
 0x3d8   :  { %v2685_v61 = vpop.f32.mrf.mxu0  ;;  %5654 = vmatprep.subr.bf16.mxu0 %v5812_v52  ;;  %5675 = vmatpush3.bf16.msra.mxu1 %v5827_v53  ;;  %v2726_v4 = vpop.f32.mrf.mxu1  ;;  %v5821_v52 = vld [vmem:[#allocation13 + $0x10] sm:$0xff]   ;;  %v5822_v53 = vld [vmem:[#allocation13 + $0x48] sm:$0xff]  }
 0x3d9   :  { %v6543_v2 = vadd.f32 %v2724_v57, %v2684_v47  ;;  %v2686_v3 = vadd.f32 %v2685_v61, %v6506_v55  ;;  %5676 = vmatprep.subr.bf16.mxu1 %v5828_v54  ;;  %v5831_v55 = vld [vmem:[#allocation13 + $0xa8] sm:$0xff]  }
 0x3da   :  { %v2687_v5 = vpop.f32.mrf.mxu0  ;;  %v2728_v8 = vpop.f32.mrf.mxu1  ;;  %v5838_v57 = vld [vmem:[#allocation13 + $0xc8] sm:$0xff]  }
 0x3db   :  { %v2979_v63 = vsel %vm282_vm1, %v6543_v2, 0.0  ;;  %v3035_v49 = vmul.f32 %v6543_v2, %v6543_v2  ;;  %v6550_v7 = vadd.f32 %v2726_v4, %v2686_v3  ;;  %5655 = vmatpush3.bf16.msra.mxu0 %v5813_v58  ;;  %v5824_v4 = vld [vmem:[#allocation13 + $0x40] sm:$0xff]  }
 0x3dc   :  { %v2980_v10 = vrot.slane %v2979_v63, 4  ;;  %v2688_v11 = vpop.f32.mrf.mxu0  ;;  %5656 = vmatprep.subr.bf16.mxu0 %v5814_v62  ;;  %5677 = vmatpush3.bf16.msra.mxu1 %v5829_v1  ;;  %v2729_v21 = vpop.f32.mrf.mxu1  ;;  %v5823_v1 = vld [vmem:[#allocation13 + $0x8] sm:$0xff]  }
 0x3dd   :  { %v3043_v15 = vsel %vm282_vm1, %v3035_v49, 0.0  ;;  %v2986_v16 = vsel %vm282_vm1, %v6550_v7, 0.0  ;;  %v3036_v19 = vmul.f32 %v6550_v7, %v6550_v7  ;;  %5678 = vmatprep.subr.bf16.mxu1 %v5830_v59  ;;  %v5839_v59 = vld [vmem:[#allocation13 + $0x88] sm:$0xff]   ;;  %v5840_v49 = vld [vmem:[#allocation13 + $0xc0] sm:$0xff]   ;;  %v5842_v11 = vld [vmem:[#allocation13 + $0x178] sm:$0xff]  }
 0x3de   :  { %v3044_v23 = vrot.slane %v3043_v15, 4  ;;  %v2987_v24 = vrot.slane %v2986_v16, 4  ;;  %v2981_v6 = vadd.f32 %v2980_v10, %v2979_v63  ;;  %v5841_v10 = vld [vmem:[#allocation13 + $0x80] sm:$0xff]   ;;  %v5845_v21 = vld [vmem:[#allocation13 + $0x130] sm:$0xff]  }
 0x3df   :  { %v3050_v25 = vsel %vm282_vm1, %v3036_v19, 0.0  ;;  %5657 = vmatpush3.bf16.msra.mxu0 %v5815_v9  ;;  %v5825_v9 = vld [vmem:[#allocation13] sm:$0xff]   ;;  %v5844_v19 = vld [vmem:[#allocation13 + $0x170] sm:$0xff]  }
 0x3e0   :  { %v3045_v27 = vadd.f32 %v3044_v23, %v3043_v15  ;;  %v2988_v28 = vadd.f32 %v2987_v24, %v2986_v16  ;;  %v3051_v29 = vrot.slane %v3050_v25, 4  ;;  %5658 = vmatprep.subr.bf16.mxu0 %v5816_v12  ;;  %5679 = vmatpush3.bf16.msra.mxu1 %v5831_v55  ;;  %v2982_v37 = vrot.slane %v2981_v6, 2  ;;  %v5858_v55 = vld [vmem:[#allocation13 + $0x1f8] sm:$0xff]   ;;  %v5847_v23 = vld [vmem:[#allocation13 + $0x128] sm:$0xff]   ;;  %v5848_v24 = vld [vmem:[#allocation13 + $0x160] sm:$0xff]  }
 0x3e1   :  { %5680 = vmatprep.subr.bf16.mxu1 %v5832_v22  ;;  %v5843_v15 = vld [vmem:[#allocation13 + $0x138] sm:$0xff]   ;;  %v5846_v22 = vld [vmem:[#allocation13 + $0x168] sm:$0xff]  }
 0x3e2   :  { %v3046_v34 = vrot.slane %v3045_v27, 2  ;;  %v2989_v35 = vrot.slane %v2988_v28, 2  ;;  %v3052_v36 = vadd.f32 %v3051_v29, %v3050_v25  ;;  %v2983_v51 = vadd.f32 %v2982_v37, %v2981_v6  ;;  %v5849_v6 = vld [vmem:[#allocation13 + $0x120] sm:$0xff]   ;;  %v5850_v25 = vld [vmem:[#allocation13 + $0x158] sm:$0xff]   ;;  %v5854_v29 = vld [vmem:[#allocation13 + $0x148] sm:$0xff]  }
 0x3e3   :  { %5659 = vmatpush3.bf16.msra.mxu0 %v5817_v26  ;;  %v5851_v26 = vld [vmem:[#allocation13 + $0x118] sm:$0xff]  }
 0x3e4   :  { %v2990_v41 = vadd.f32 %v2989_v35, %v2988_v28  ;;  %v3053_v39 = vrot.slane %v3052_v36, 2  ;;  %5660 = vmatprep.subr.bf16.mxu0 %v5818_v30  ;;  %5681 = vmatpush3.bf16.msra.mxu1 %v5833_v32  ;;  %v3047_v44 = vadd.f32 %v3046_v34, %v3045_v27  ;;  %v2984_v62 = vrot.slane %v2983_v51, 1  ;;  %v5852_v27 = vld [vmem:[#allocation13 + $0x150] sm:$0xff]   ;;  %v5855_v30 = vld [vmem:[#allocation13 + $0x108] sm:$0xff]   ;;  %v5856_v32 = vld [vmem:[#allocation13 + $0x140] sm:$0xff]  }
 0x3e5   :  { %5682 = vmatprep.subr.bf16.mxu1 %v5834_v31  ;;  %v5853_v28 = vld [vmem:[#allocation13 + $0x110] sm:$0xff]   ;;  %v5857_v31 = vld [vmem:[#allocation13 + $0x100] sm:$0xff]  }
 0x3e6   :  { %v2991_v46 = vrot.slane %v2990_v41, 1  ;;  %v3054_v48 = vadd.f32 %v3053_v39, %v3052_v36  ;;  %v3048_v47 = vrot.slane %v3047_v44, 1  ;;  %v2985_v8 = vadd.f32 %v2984_v62, %v2983_v51 }
 0x3e7   :  { %5661 = vmatpush3.bf16.msra.mxu0 %v5819_v38 }
 0x3e8   :  { %5662 = vmatprep.subr.bf16.mxu0 %v5820_v42  ;;  %v3055_v54 = vrot.slane %v3054_v48, 1  ;;  %5683 = vmatpush3.bf16.msra.mxu1 %v5835_v40  ;;  %v2992_v58 = vadd.f32 %v2991_v46, %v2990_v41  ;;  %v3049_v5 = vadd.f32 %v3048_v47, %v3047_v44 }
 0x3e9   :  { %5684 = vmatprep.subr.bf16.mxu1 %v5836_v45 }
 0x3ea   :  { %v3056_v61 = vadd.f32 %v3055_v54, %v3054_v48  ;;  %v3099_v12 = vsel %vm343_vm2, %v2985_v8, %v3049_v5 }
 0x3eb   :  { %5663 = vmatpush3.bf16.msra.mxu0 %v5821_v52  ;;  %v3107_v16 = vpack.c.bf16 %v3099_v12, %v3099_v12 }
 0x3ec   :  { %5664 = vmatprep.subr.bf16.mxu0 %v5822_v53  ;;  %v3100_v3 = vsel %vm343_vm2, %v2992_v58, %v3056_v61  ;;  %5685 = vmatpush3.bf16.msra.mxu1 %v5837_v60 }
 0x3ed   :  { %v3108_v63 = vpack.c.bf16 %v3100_v3, %v3100_v3  ;;  %5686 = vmatprep.subr.bf16.mxu1 %v5838_v57 }
 0x3ef   :  { %5665 = vmatpush3.bf16.msra.mxu0 %v5823_v1  ;;  %3659 = vmatprep.mubr.bf16.mxu0 %v3108_v63 }
 0x3f0   :  { %5666 = vmatprep.subr.bf16.mxu0 %v5824_v4  ;;  %5687 = vmatpush3.bf16.msra.mxu1 %v5839_v59 }
 0x3f1   :  { %5688 = vmatprep.subr.bf16.mxu1 %v5840_v49 }
 0x3f3   :  { %5667 = vmatpush3.bf16.msra.mxu0 %v5825_v9 }
 0x3f4   :  { %5689 = vmatpush3.bf16.msra.mxu1 %v5841_v10  ;;  %5696 = vmatprep.subr.bf16.mxu0 %v5842_v11 }
 0x3f5   :  { %5718 = vmatprep.subr.bf16.mxu1 %v5858_v55 }
 0x3f6   :  { %3660 = vmatmul.mubr.bf16.vlgmr.msra.gmra.mxu0 %v3107_v16 }
 0x3f7   :  { %5697 = vmatpush3.bf16.msra.mxu0 %v5843_v15 }
 0x3f8   :  { %5698 = vmatprep.subr.bf16.mxu0 %v5844_v19 }
 0x3fb   :  { %5699 = vmatpush3.bf16.msra.mxu0 %v5845_v21 }
 0x3fc   :  { %5700 = vmatprep.subr.bf16.mxu0 %v5846_v22 }
 0x3ff   :  { %5701 = vmatpush3.bf16.msra.mxu0 %v5847_v23 }
 0x400   :  { %5702 = vmatprep.subr.bf16.mxu0 %v5848_v24 }
 0x403   :  { %5703 = vmatpush3.bf16.msra.mxu0 %v5849_v6  ;;  %v5859_v6 = vld [vmem:[#allocation13 + $0x1b8] sm:$0xff]  }
 0x404   :  { %5704 = vmatprep.subr.bf16.mxu0 %v5850_v25 }
 0x407   :  { %5705 = vmatpush3.bf16.msra.mxu0 %v5851_v26  ;;  %v5860_v26 = vld [vmem:[#allocation13 + $0x1f0] sm:$0xff]  }
 0x408   :  { %5706 = vmatprep.subr.bf16.mxu0 %v5852_v27  ;;  %v5861_v27 = vld [vmem:[#allocation13 + $0x1b0] sm:$0xff]  }
 0x40b   :  { %5707 = vmatpush3.bf16.msra.mxu0 %v5853_v28  ;;  %v5862_v28 = vld [vmem:[#allocation13 + $0x1e8] sm:$0xff]  }
 0x40c   :  { %5708 = vmatprep.subr.bf16.mxu0 %v5854_v29  ;;  %v5863_v29 = vld [vmem:[#allocation13 + $0x1a8] sm:$0xff]  }
 0x40f   :  { %5709 = vmatpush3.bf16.msra.mxu0 %v5855_v30  ;;  %v5864_v30 = vld [vmem:[#allocation13 + $0x1e0] sm:$0xff]  }
 0x410   :  { %5710 = vmatprep.subr.bf16.mxu0 %v5856_v32  ;;  %v5865_v32 = vld [vmem:[#allocation13 + $0x1a0] sm:$0xff]  }
 0x413   :  { %5711 = vmatpush3.bf16.msra.mxu0 %v5857_v31  ;;  %v5866_v31 = vld [vmem:[#allocation13 + $0x1d8] sm:$0xff]  }
 0x416   :  { %v2765_v34 = vpop.f32.mrf.mxu0  ;;  %v2806_v36 = vpop.f32.mrf.mxu1 }
 0x417   :  { %v2766_v35 = vadd.f32 %v2765_v34, %v6504_v50  ;;  %v5867_v34 = vld [vmem:[#allocation13 + $0x198] sm:$0xff]  }
 0x418   :  { %v2767_v37 = vpop.f32.mrf.mxu0  ;;  %v2808_v39 = vpop.f32.mrf.mxu1 }
 0x419   :  { %v6561_v38 = vadd.f32 %v2806_v36, %v2766_v35  ;;  %v2768_v41 = vadd.f32 %v2767_v37, %v6508_v56  ;;  %v5868_v35 = vld [vmem:[#allocation13 + $0x1d0] sm:$0xff]   ;;  %v5870_v37 = vld [vmem:[#allocation13 + $0x1c8] sm:$0xff]  }
 0x41a   :  { %v2769_v42 = vpop.f32.mrf.mxu0  ;;  %v2810_v46 = vpop.f32.mrf.mxu1  ;;  %v5869_v36 = vld [vmem:[#allocation13 + $0x190] sm:$0xff]  }
 0x41b   :  { %v2993_v40 = vsel %vm282_vm1, %v6561_v38, 0.0  ;;  %v3037_v44 = vmul.f32 %v6561_v38, %v6561_v38  ;;  %v6568_v45 = vadd.f32 %v2808_v39, %v2768_v41  ;;  %v5871_v41 = vld [vmem:[#allocation13 + $0x188] sm:$0xff]   ;;  %v5872_v39 = vld [vmem:[#allocation13 + $0x1c0] sm:$0xff]  }
 0x41c   :  { %v2994_v48 = vrot.slane %v2993_v40, 4  ;;  %v2770_v51 = vpop.f32.mrf.mxu0  ;;  %v2811_v53 = vpop.f32.mrf.mxu1  ;;  %v5873_v42 = vld [vmem:[#allocation13 + $0x180] sm:$0xff]  }
 0x41d   :  { %v3057_v50 = vsel %vm282_vm1, %v3037_v44, 0.0  ;;  %v3000_v52 = vsel %vm282_vm1, %v6568_v45, 0.0  ;;  %v3038_v56 = vmul.f32 %v6568_v45, %v6568_v45 }
 0x41e   :  { %v2995_v54 = vadd.f32 %v2994_v48, %v2993_v40  ;;  %v3058_v60 = vrot.slane %v3057_v50, 4  ;;  %v3001_v47 = vrot.slane %v3000_v52, 4 }
 0x41f   :  { %v3064_v57 = vsel %vm282_vm1, %v3038_v56, 0.0 }
 0x420   :  { %v2996_v58 = vrot.slane %v2995_v54, 2  ;;  %v3059_v61 = vadd.f32 %v3058_v60, %v3057_v50  ;;  %v3002_v62 = vadd.f32 %v3001_v47, %v3000_v52  ;;  %v3065_v1 = vrot.slane %v3064_v57, 4 }
 0x422   :  { %v2997_v3 = vadd.f32 %v2996_v58, %v2995_v54  ;;  %v3060_v4 = vrot.slane %v3059_v61, 2  ;;  %v3003_v59 = vrot.slane %v3002_v62, 2  ;;  %v3066_v5 = vadd.f32 %v3065_v1, %v3064_v57 }
 0x424   :  { %v3061_v63 = vadd.f32 %v3060_v4, %v3059_v61  ;;  %v3004_v49 = vadd.f32 %v3003_v59, %v3002_v62  ;;  %v3067_v8 = vrot.slane %v3066_v5, 2  ;;  %v2998_v9 = vrot.slane %v2997_v3, 1 }
 0x426   :  { %v3062_v10 = vrot.slane %v3061_v63, 1  ;;  %v3005_v11 = vrot.slane %v3004_v49, 1  ;;  %v3068_v12 = vadd.f32 %v3067_v8, %v3066_v5  ;;  %v2999_v16 = vadd.f32 %v2998_v9, %v2997_v3 }
 0x428   :  { %v3063_v55 = vadd.f32 %v3062_v10, %v3061_v63  ;;  %v3069_v15 = vrot.slane %v3068_v12, 1  ;;  %v3006_v19 = vadd.f32 %v3005_v11, %v3004_v49 }
 0x42a   :  { %v3070_v21 = vadd.f32 %v3069_v15, %v3068_v12  ;;  %v3101_v22 = vsel %vm343_vm2, %v2999_v16, %v3063_v55 }
 0x42b   :  { %v3109_v25 = vpack.c.bf16 %v3101_v22, %v3101_v22 }
 0x42c   :  { %v3102_v23 = vsel %vm343_vm2, %v3006_v19, %v3070_v21 }
 0x42d   :  { %v3110_v24 = vpack.c.bf16 %v3102_v23, %v3102_v23 }
 0x42f   :  { %3699 = vmatprep.mubr.bf16.mxu1 %v3110_v24 }
 0x430   :  { %3700 = vmatmul.mubr.bf16.vlgmr.msra.gmra.mxu1 %v3109_v25 }
 0x431   :  { %5719 = vmatpush3.bf16.msra.mxu1 %v5859_v6 }
 0x432   :  { %5720 = vmatprep.subr.bf16.mxu1 %v5860_v26 }
 0x435   :  { %5721 = vmatpush3.bf16.msra.mxu1 %v5861_v27 }
 0x436   :  { %5722 = vmatprep.subr.bf16.mxu1 %v5862_v28 }
 0x439   :  { %5723 = vmatpush3.bf16.msra.mxu1 %v5863_v29 }
 0x43a   :  { %5724 = vmatprep.subr.bf16.mxu1 %v5864_v30 }
 0x43d   :  { %5725 = vmatpush3.bf16.msra.mxu1 %v5865_v32 }
 0x43e   :  { %5726 = vmatprep.subr.bf16.mxu1 %v5866_v31 }
 0x441   :  { %5727 = vmatpush3.bf16.msra.mxu1 %v5867_v34 }
 0x442   :  { %5728 = vmatprep.subr.bf16.mxu1 %v5868_v35 }
 0x445   :  { %5729 = vmatpush3.bf16.msra.mxu1 %v5869_v36 }
 0x446   :  { %5730 = vmatprep.subr.bf16.mxu1 %v5870_v37 }
 0x449   :  { %5731 = vmatpush3.bf16.msra.mxu1 %v5871_v41 }
 0x44a   :  { %5732 = vmatprep.subr.bf16.mxu1 %v5872_v39 }
 0x44d   :  { %5733 = vmatpush3.bf16.msra.mxu1 %v5873_v42 }
 0x456   :  { %v2847_v40 = vpop.f32.mrf.mxu0 }
 0x457   :  { %v2848_v44 = vadd.f32 %v2847_v40, %v6523_v13  ;;  %v2888_v46 = vpop.f32.mrf.mxu1 }
 0x458   :  { %v2849_v48 = vpop.f32.mrf.mxu0 }
 0x459   :  { %v6579_v51 = vadd.f32 %v2888_v46, %v2848_v44  ;;  %v2850_v50 = vadd.f32 %v2849_v48, %v6528_v17  ;;  %v2890_v52 = vpop.f32.mrf.mxu1 }
 0x45a   :  { %v2851_v56 = vpop.f32.mrf.mxu0 }
 0x45b   :  { %v3007_v53 = vsel %vm282_vm1, %v6579_v51, 0.0  ;;  %v3039_v54 = vmul.f32 %v6579_v51, %v6579_v51  ;;  %v6586_v60 = vadd.f32 %v2890_v52, %v2850_v50  ;;  %v2892_v47 = vpop.f32.mrf.mxu1 }
 0x45c   :  { %v3008_v57 = vrot.slane %v3007_v53, 4  ;;  %v2852_v58 = vpop.f32.mrf.mxu0 }
 0x45d   :  { %v3071_v13 = vsel %vm282_vm1, %v3039_v54, 0.0  ;;  %v3014_v61 = vsel %vm282_vm1, %v6586_v60, 0.0  ;;  %v3040_v17 = vmul.f32 %v6586_v60, %v6586_v60  ;;  %v2893_v62 = vpop.f32.mrf.mxu1 }
 0x45e   :  { %v3009_v1 = vadd.f32 %v3008_v57, %v3007_v53  ;;  %v3072_v3 = vrot.slane %v3071_v13, 4  ;;  %v3015_v4 = vrot.slane %v3014_v61, 4 }
 0x45f   :  { %v3078_v59 = vsel %vm282_vm1, %v3040_v17, 0.0 }
 0x460   :  { %v3010_v5 = vrot.slane %v3009_v1, 2  ;;  %v3073_v63 = vadd.f32 %v3072_v3, %v3071_v13  ;;  %v3016_v49 = vadd.f32 %v3015_v4, %v3014_v61  ;;  %v3079_v8 = vrot.slane %v3078_v59, 4 }
 0x462   :  { %v3011_v9 = vadd.f32 %v3010_v5, %v3009_v1  ;;  %v3074_v10 = vrot.slane %v3073_v63, 2  ;;  %v3017_v11 = vrot.slane %v3016_v49, 2  ;;  %v3080_v12 = vadd.f32 %v3079_v8, %v3078_v59 }
 0x464   :  { %v3075_v55 = vadd.f32 %v3074_v10, %v3073_v63  ;;  %v3018_v15 = vadd.f32 %v3017_v11, %v3016_v49  ;;  %v3081_v16 = vrot.slane %v3080_v12, 2  ;;  %v3012_v19 = vrot.slane %v3011_v9, 1 }
 0x466   :  { %v3076_v21 = vrot.slane %v3075_v55, 1  ;;  %v3019_v22 = vrot.slane %v3018_v15, 1  ;;  %v3082_v23 = vadd.f32 %v3081_v16, %v3080_v12  ;;  %v3013_v25 = vadd.f32 %v3012_v19, %v3011_v9 }
 0x468   :  { %v3077_v24 = vadd.f32 %v3076_v21, %v3075_v55  ;;  %v3083_v6 = vrot.slane %v3082_v23, 1  ;;  %v3020_v26 = vadd.f32 %v3019_v22, %v3018_v15 }
 0x46a   :  { %v3084_v27 = vadd.f32 %v3083_v6, %v3082_v23  ;;  %v3103_v28 = vsel %vm343_vm2, %v3013_v25, %v3077_v24 }
 0x46b   :  { %v3111_v32 = vpack.c.bf16 %v3103_v28, %v3103_v28 }
 0x46c   :  { %v3104_v29 = vsel %vm343_vm2, %v3020_v26, %v3084_v27 }
 0x46d   :  { %v3112_v30 = vpack.c.bf16 %v3104_v29, %v3104_v29 }
 0x46f   :  { %3739 = vmatprep.mubr.bf16.mxu0 %v3112_v30 }
 0x470   :  { %3740 = vmatmul.mubr.bf16.vlgmr.msra.gmra.mxu0 %v3111_v32 }
 0x471   :  { %3901 = vmatprep.mubr.bf16.mxu0 %v6304_v0 }
 0x496   :  { %v2929_v31 = vpop.f32.mrf.mxu0 }
 0x497   :  { %v2930_v34 = vadd.f32 %v2929_v31, %v6525_v14  ;;  %v2970_v35 = vpop.f32.mrf.mxu1 }
 0x498   :  { %v2931_v36 = vpop.f32.mrf.mxu0 }
 0x499   :  { %v6598_v37 = vadd.f32 %v2970_v35, %v2930_v34  ;;  %v2932_v41 = vadd.f32 %v2931_v36, %v6530_v18  ;;  %v2972_v39 = vpop.f32.mrf.mxu1  ;;  %v3818_v36 = vld [vmem:[#allocation15] sm:$0xff] }
 0x49a   :  { %v2933_v42 = vpop.f32.mrf.mxu0 }
 0x49b   :  { %v3021_v40 = vsel %vm282_vm1, %v6598_v37, 0.0  ;;  %v3041_v44 = vmul.f32 %v6598_v37, %v6598_v37  ;;  %v6605_v46 = vadd.f32 %v2972_v39, %v2932_v41  ;;  %v2974_v48 = vpop.f32.mrf.mxu1  ;;  %v3822_v41 = vld [vmem:[#allocation15 + $0x20] sm:$0xff]  ;;  %v3819_v39 = vld [vmem:[#allocation15 + $0x8] sm:$0xff] }
 0x49c   :  { %v3022_v50 = vrot.slane %v3021_v40, 4  ;;  %v2934_v52 = vpop.f32.mrf.mxu0  ;;  %v5467_v42 = vcombine.low %v3818_v36, %v3822_v41 }
 0x49d   :  { %v3085_v14 = vsel %vm282_vm1, %v3041_v44, 0.0  ;;  %v3028_v56 = vsel %vm282_vm1, %v6605_v46, 0.0  ;;  %v3042_v18 = vmul.f32 %v6605_v46, %v6605_v46  ;;  %v2975_v53 = vpop.f32.mrf.mxu1  ;;  %v3823_v44 = vld [vmem:[#allocation15 + $0x28] sm:$0xff]  ;;  %v3820_v52 = vld [vmem:[#allocation15 + $0x10] sm:$0xff] }
 0x49e   :  { %v3023_v54 = vadd.f32 %v3022_v50, %v3021_v40  ;;  %v3086_v47 = vrot.slane %v3085_v14, 4  ;;  %v3029_v57 = vrot.slane %v3028_v56, 4  ;;  %v5468_v40 = vcombine.high %v3818_v36, %v3822_v41  ;;  %v5888_v36 = vld [vmem:[#allocation16 + $0x54] ss:$8 sps:$4 sm:$0xff]  }
 0x49f   :  { %v3092_v58 = vsel %vm282_vm1, %v3042_v18, 0.0  ;;  %v5469_v48 = vcombine.low %v3819_v39, %v3823_v44  ;;  %v5470_v50 = vcombine.high %v3819_v39, %v3823_v44  ;;  %v5891_v41 = vld [vmem:[#allocation16 + $0x154] ss:$8 sps:$4 sm:$0xff]   ;;  %v5889_v39 = vld [vmem:[#allocation16 + $0x150] ss:$8 sps:$4 sm:$0xff]  }
 0x4a0   :  { %v3024_v13 = vrot.slane %v3023_v54, 2  ;;  %v3087_v61 = vadd.f32 %v3086_v47, %v3085_v14  ;;  %v3030_v17 = vadd.f32 %v3029_v57, %v3028_v56  ;;  %v3093_v62 = vrot.slane %v3092_v58, 4  ;;  %3883 = vmatprep.subr.bf16.mxu0 %v5468_v40  ;;  %v3824_v14 = vld [vmem:[#allocation15 + $0x30] sm:$0xff]  ;;  %v3821_v56 = vld [vmem:[#allocation15 + $0x18] sm:$0xff]  ;;  %v5897_v40 = vld [vmem:[#allocation16 + $0x144] ss:$8 sps:$4 sm:$0xff]  }
 0x4a1   :  { %3884 = vmatpush1.bf16.msra.mxu0 %v5467_v42  ;;  %3924 = vmatprep.subr.bf16.mxu1 %v5470_v50  ;;  %v5471_v18 = vcombine.low %v3820_v52, %v3824_v14  ;;  %v5472_v53 = vcombine.high %v3820_v52, %v3824_v14  ;;  %v5894_v42 = vld [vmem:[#allocation16 + $0x44] ss:$8 sps:$4 sm:$0xff]   ;;  %v5892_v44 = vld [vmem:[#allocation16 + $0x40] ss:$8 sps:$4 sm:$0xff]   ;;  %v5900_v50 = vld [vmem:[#allocation16 + $0x34] ss:$8 sps:$4 sm:$0xff]  }
 0x4a2   :  { %v3025_v1 = vadd.f32 %v3024_v13, %v3023_v54  ;;  %v3088_v3 = vrot.slane %v3087_v61, 2  ;;  %v3031_v4 = vrot.slane %v3030_v17, 2  ;;  %v3094_v59 = vadd.f32 %v3093_v62, %v3092_v58  ;;  %v3825_v54 = vld [vmem:[#allocation15 + $0x38] sm:$0xff] }
 0x4a3   :  { %v5473_v47 = vcombine.low %v3821_v56, %v3825_v54  ;;  %v5474_v57 = vcombine.high %v3821_v56, %v3825_v54  ;;  %3965 = vmatprep.subr.bf16.mxu0 %v5472_v53  ;;  %v5903_v52 = vld [vmem:[#allocation16 + $0x134] ss:$8 sps:$4 sm:$0xff]   ;;  %v5898_v14 = vld [vmem:[#allocation16 + $0x30] ss:$8 sps:$4 sm:$0xff]   ;;  %v5909_v53 = vld [vmem:[#allocation16 + $0x124] ss:$8 sps:$4 sm:$0xff]  }
 0x4a4   :  { %v3089_v5 = vadd.f32 %v3088_v3, %v3087_v61  ;;  %v3032_v63 = vadd.f32 %v3031_v4, %v3030_v17  ;;  %v3095_v49 = vrot.slane %v3094_v59, 2  ;;  %v3026_v8 = vrot.slane %v3025_v1, 1  ;;  %v5901_v56 = vld [vmem:[#allocation16 + $0x130] ss:$8 sps:$4 sm:$0xff]   ;;  %v5904_v54 = vld [vmem:[#allocation16 + $0x20] ss:$8 sps:$4 sm:$0xff]  }
 0x4a6   :  { %v3090_v9 = vrot.slane %v3089_v5, 1  ;;  %v3033_v10 = vrot.slane %v3032_v63, 1  ;;  %v3096_v11 = vadd.f32 %v3095_v49, %v3094_v59  ;;  %v3027_v15 = vadd.f32 %v3026_v8, %v3025_v1 }
 0x4a8   :  { %v3091_v12 = vadd.f32 %v3090_v9, %v3089_v5  ;;  %v3097_v55 = vrot.slane %v3096_v11, 1  ;;  %v3034_v16 = vadd.f32 %v3033_v10, %v3032_v63 }
 0x4aa   :  { %v3098_v19 = vadd.f32 %v3097_v55, %v3096_v11  ;;  %v3105_v21 = vsel %vm343_vm2, %v3027_v15, %v3091_v12 }
 0x4ab   :  { %v3113_v24 = vpack.c.bf16 %v3105_v21, %v3105_v21 }
 0x4ac   :  { %v3106_v22 = vsel %vm343_vm2, %v3034_v16, %v3098_v19  ;;  %v2977_v19 = vld [vmem:[#allocation4 + $0x2] sm:$0x1] }
 0x4ad   :  { %v3114_v23 = vpack.c.bf16 %v3106_v22, %v3106_v22 }
 0x4af   :  { %3779 = vmatprep.mubr.bf16.mxu1 %v3114_v23  ;;  %v2978_v23 = vld [vmem:[#allocation4 + $0x3] sm:$0x1] }
 0x4b0   :  { %3780 = vmatmul.mubr.bf16.vlgmr.msra.gmra.mxu1 %v3113_v24 }
 0x4b1   :  { %3942 = vmatprep.mubr.bf16.mxu1 %v6304_v0  ;;  %3925 = vmatpush1.bf16.msra.mxu1 %v5469_v48  ;;  %v5895_v48 = vld [vmem:[#allocation16 + $0x140] ss:$8 sps:$4 sm:$0xff]  }
 0x4b2   :  { %4006 = vmatprep.subr.bf16.mxu1 %v5474_v57  ;;  %v5912_v57 = vld [vmem:[#allocation16 + $0x14] ss:$8 sps:$4 sm:$0xff]  }
 0x4b6   :  { %v5668_v6 = vpop.f32.mrf.mxu0 }
 0x4b8   :  { %v5669_v25 = vpop.f32.mrf.mxu0 }
 0x4b9   :  { %v5670_v26 = vadd.f32 %v5669_v25, %v5668_v6 }
 0x4ba   :  { %v5671_v27 = vpop.f32.mrf.mxu0 }
 0x4bc   :  { %v5672_v28 = vpop.f32.mrf.mxu0 }
 0x4bd   :  { %v5876_v28 = vld [vmem:[#allocation16 + $0x74] ss:$8 sps:$4 sm:$0xff]  }
 0x4f0   :  { %v5690_v29 = vpop.f32.mrf.mxu1 }
 0x4f2   :  { %v5691_v30 = vpop.f32.mrf.mxu1 }
 0x4f3   :  { %v5692_v32 = vadd.f32 %v5691_v30, %v5690_v29  ;;  %v5879_v29 = vld [vmem:[#allocation16 + $0x174] ss:$8 sps:$4 sm:$0xff]   ;;  %v5877_v30 = vld [vmem:[#allocation16 + $0x170] ss:$8 sps:$4 sm:$0xff]  }
 0x4f4   :  { %v5693_v31 = vpop.f32.mrf.mxu1 }
 0x4f5   :  { %v3702_v34 = vadd.f32 %v5692_v32, %v5670_v26  ;;  %v5882_v32 = vld [vmem:[#allocation16 + $0x64] ss:$8 sps:$4 sm:$0xff]  }
 0x4f6   :  { %v5694_v35 = vpop.f32.mrf.mxu1  ;;  %v5885_v31 = vld [vmem:[#allocation16 + $0x164] ss:$8 sps:$4 sm:$0xff]  }
 0x4f7   :  { %v5883_v35 = vld [vmem:[#allocation16 + $0x160] ss:$8 sps:$4 sm:$0xff]  }
 0x530   :  { %v5712_v58 = vpop.f32.mrf.mxu0 }
 0x532   :  { %v5713_v13 = vpop.f32.mrf.mxu0 }
 0x533   :  { %v5714_v61 = vadd.f32 %v5713_v13, %v5712_v58  ;;  %v5915_v58 = vld [vmem:[#allocation16 + $0x114] ss:$8 sps:$4 sm:$0xff]   ;;  %v5910_v13 = vld [vmem:[#allocation16 + $0x10] ss:$8 sps:$4 sm:$0xff]  }
 0x534   :  { %v5715_v17 = vpop.f32.mrf.mxu0 }
 0x535   :  { %v3742_v62 = vadd.f32 %v5714_v61, %v3702_v34  ;;  %v5880_v34 = vld [vmem:[#allocation16 + $0x60] ss:$8 sps:$4 sm:$0xff]   ;;  %v5913_v61 = vld [vmem:[#allocation16 + $0x110] ss:$8 sps:$4 sm:$0xff]   ;;  %v5918_v17 = vld [vmem:[#allocation16 + $0x4] ss:$8 sps:$4 sm:$0xff]  }
 0x536   :  { %v5716_v1 = vpop.f32.mrf.mxu0 }
 0x537   :  { %v5916_v1 = vld [vmem:[#allocation16] ss:$8 sps:$4 sm:$0xff]  }
 0x570   :  { %v5734_v3 = vpop.f32.mrf.mxu1 }
 0x572   :  { %v5735_v4 = vpop.f32.mrf.mxu1 }
 0x573   :  { %v5736_v59 = vadd.f32 %v5735_v4, %v5734_v3  ;;  %v5919_v3 = vld [vmem:[#allocation16 + $0x100] ss:$8 sps:$4 sm:$0xff]   ;;  %v5924_v4 = vld [vmem:[#allocation16 + $0xf4] ss:$8 sps:$4 sm:$0xff]  }
 0x574   :  { %v5737_v5 = vpop.f32.mrf.mxu1 }
 0x575   :  { %v3782_v63 = vadd.f32 %v5736_v59, %v3742_v62  ;;  %v5921_v62 = vld [vmem:[#allocation16 + $0x104] ss:$8 sps:$4 sm:$0xff]   ;;  %v5927_v59 = vld [vmem:[#allocation16 + $0x1f4] ss:$8 sps:$4 sm:$0xff]   ;;  %v5922_v5 = vld [vmem:[#allocation16 + $0xf0] ss:$8 sps:$4 sm:$0xff]  }
 0x576   :  { %v5738_v49 = vpop.f32.mrf.mxu1 }
 0x577   :  { %v3787_v8 = vmul.f32 0.0078125, %v3782_v63  ;;  %v5925_v63 = vld [vmem:[#allocation16 + $0x1f0] ss:$8 sps:$4 sm:$0xff]   ;;  %v5930_v49 = vld [vmem:[#allocation16 + $0xe4] ss:$8 sps:$4 sm:$0xff]  }
 0x579   :  { %v3788_v9 = vmul.f32 %v3787_v8, %v3787_v8 }
 0x57b   :  { %v3790_v10 = vrot.slane %v3788_v9, 7  ;;  %v5928_v9 = vld [vmem:[#allocation16 + $0xe0] ss:$8 sps:$4 sm:$0xff]  }
 0x57d   :  { %v3792_v11 = vsub.f32 %v3787_v8, %v3790_v10  ;;  %v5931_v10 = vld [vmem:[#allocation16 + $0x1e0] ss:$8 sps:$4 sm:$0xff]  }
 0x57f   :  { %v3793_v12 = vmax.f32 %v3792_v11, 0.0  ;;  %v5936_v11 = vld [vmem:[#allocation16 + $0xd4] ss:$8 sps:$4 sm:$0xff]  }
 0x581   :  { %v3794_v55 = vadd.f32 1e-05, %v3793_v12  ;;  %v5939_v12 = vld [vmem:[#allocation16 + $0x1d4] ss:$8 sps:$4 sm:$0xff]  }
 0x583   :  { %6068 = vrsqrt.f32 %v3794_v55  ;;  %v5934_v55 = vld [vmem:[#allocation16 + $0xd0] ss:$8 sps:$4 sm:$0xff]  }
 0x590   :  { %v6069_v15 = vpop.eup %6068 }
 0x591   :  { %v3803_v16 = vrot.slane %v6069_v15, %v6451_v33  ;;  %v5874_v33 = vld [vmem:[#allocation16 + $0x70] ss:$8 sps:$4 sm:$0xff]  }
 0x592   :  { %v5937_v15 = vld [vmem:[#allocation16 + $0x1d0] ss:$8 sps:$4 sm:$0xff]  }
 0x593   :  { %v5466_v21 = vrot.slane %v3803_v16, 9  ;;  %v5942_v16 = vld [vmem:[#allocation16 + $0xc4] ss:$8 sps:$4 sm:$0xff]  }
 0x595   :  { %v3807_v22 = vmul.f32 %v5466_v21, %v2977_v19  ;;  %v5945_v19 = vld [vmem:[#allocation16 + $0x1c4] ss:$8 sps:$4 sm:$0xff]   ;;  %v5940_v21 = vld [vmem:[#allocation16 + $0xc0] ss:$8 sps:$4 sm:$0xff]  }
 0x597   :  { %v3808_v24 = vmul.f32 %v3807_v22, %v3787_v8  ;;  %v5933_v8 = vld [vmem:[#allocation16 + $0x1e4] ss:$8 sps:$4 sm:$0xff]  }
 0x599   :  { %v3809_v6 = vsub.f32 %v2978_v23, %v3808_v24  ;;  %v5948_v23 = vld [vmem:[#allocation16 + $0xb4] ss:$8 sps:$4 sm:$0xff]  }
 0x59a   :  { %v5951_v24 = vld [vmem:[#allocation16 + $0x1b4] ss:$8 sps:$4 sm:$0xff]  }
 0x59b   :  { %v3814_v25 = vrot.slane %v3809_v6, %v6455_v43  ;;  %v5946_v6 = vld [vmem:[#allocation16 + $0xb0] ss:$8 sps:$4 sm:$0xff]  }
 0x59d   :  { %v3816_v26 = vsel %vm343_vm2, %v3807_v22, %v3814_v25  ;;  %v5943_v22 = vld [vmem:[#allocation16 + $0x1c0] ss:$8 sps:$4 sm:$0xff]   ;;  %v5949_v25 = vld [vmem:[#allocation16 + $0x1b0] ss:$8 sps:$4 sm:$0xff]  }
 0x59e   :  { %v3817_v27 = vpack.c.bf16 %v3816_v26, %v3816_v26  ;;  %v5954_v26 = vld [vmem:[#allocation16 + $0xa4] ss:$8 sps:$4 sm:$0xff]  }
 0x5a0   :  { %5475 = vmatmul.mubr.msk.bf16.vlgmr.msra.gmra.mxu0 %vm194_vm0, %v3817_v27  ;;  %5476 = vmatmul.mubr.msk.bf16.vlgmr.msra.gmra.mxu1 %vm194_vm0, %v3817_v27 }
 0x5a1   :  { %3966 = vmatpush1.bf16.msra.mxu0 %v5471_v18  ;;  %4007 = vmatpush1.bf16.msra.mxu1 %v5473_v47  ;;  %v5906_v18 = vld [vmem:[#allocation16 + $0x24] ss:$8 sps:$4 sm:$0xff]   ;;  %v5907_v47 = vld [vmem:[#allocation16 + $0x120] ss:$8 sps:$4 sm:$0xff]  }
 0x5a2   :  { %3983 = vmatprep.mubr.bf16.mxu0 %v6304_v0  ;;  %4024 = vmatprep.mubr.bf16.mxu1 %v6304_v0  ;;  %v5886_v0 = vld [vmem:[#allocation16 + $0x50] ss:$8 sps:$4 sm:$0xff]  }
 0x5a3   :  { %4897 = vmatprep.subr.bf16.mxu0 %v5876_v28  ;;  %4938 = vmatprep.subr.bf16.mxu1 %v5879_v29  ;;  %v5952_v28 = vld [vmem:[#allocation16 + $0xa0] ss:$8 sps:$4 sm:$0xff]  }
 0x5a4   :  { %v5955_v29 = vld [vmem:[#allocation16 + $0x1a0] ss:$8 sps:$4 sm:$0xff]  }
 0x5a8   :  { %5477 = vmatmul.mubr.msk.bf16.vlgmr.msra.gmra.mxu0 %vm194_vm0, %v3817_v27  ;;  %5478 = vmatmul.mubr.msk.bf16.vlgmr.msra.gmra.mxu1 %vm194_vm0, %v3817_v27  ;;  %v5957_v27 = vld [vmem:[#allocation16 + $0x1a4] ss:$8 sps:$4 sm:$0xff]  }
 0x5a9   :  { %4898 = vmatpush1.bf16.msra.mxu0 %v5874_v33  ;;  %4939 = vmatpush1.bf16.msra.mxu1 %v5877_v30  ;;  %v5960_v33 = vld [vmem:[#allocation16 + $0x94] ss:$8 sps:$4 sm:$0xff]  }
 0x5aa   :  { %4899 = vmatprep.subr.bf16.mxu0 %v5882_v32  ;;  %4940 = vmatprep.subr.bf16.mxu1 %v5885_v31  ;;  %v5963_v30 = vld [vmem:[#allocation16 + $0x194] ss:$8 sps:$4 sm:$0xff]   ;;  %v5958_v32 = vld [vmem:[#allocation16 + $0x90] ss:$8 sps:$4 sm:$0xff]  }
 0x5ab   :  { %v5961_v31 = vld [vmem:[#allocation16 + $0x190] ss:$8 sps:$4 sm:$0xff]  }
 0x5ad   :  { %4900 = vmatpush1.bf16.msra.mxu0 %v5880_v34  ;;  %4941 = vmatpush1.bf16.msra.mxu1 %v5883_v35  ;;  %v5966_v34 = vld [vmem:[#allocation16 + $0x84] ss:$8 sps:$4 sm:$0xff]  }
 0x5ae   :  { %4901 = vmatprep.subr.bf16.mxu0 %v5888_v36  ;;  %4942 = vmatprep.subr.bf16.mxu1 %v5891_v41  ;;  %v5969_v35 = vld [vmem:[#allocation16 + $0x184] ss:$8 sps:$4 sm:$0xff]   ;;  %v5964_v36 = vld [vmem:[#allocation16 + $0x80] ss:$8 sps:$4 sm:$0xff]  }
 0x5af   :  { %v5967_v41 = vld [vmem:[#allocation16 + $0x180] ss:$8 sps:$4 sm:$0xff]  }
 0x5b1   :  { %4902 = vmatpush1.bf16.msra.mxu0 %v5886_v0  ;;  %4943 = vmatpush1.bf16.msra.mxu1 %v5889_v39  ;;  %v5972_v0 = vld [vmem:[#allocation16 + $0x274] ss:$8 sps:$4 sm:$0xff]  }
 0x5b2   :  { %4903 = vmatprep.subr.bf16.mxu0 %v5894_v42  ;;  %4944 = vmatprep.subr.bf16.mxu1 %v5897_v40  ;;  %v5975_v39 = vld [vmem:[#allocation16 + $0x374] ss:$8 sps:$4 sm:$0xff]  }
 0x5b5   :  { %4904 = vmatpush1.bf16.msra.mxu0 %v5892_v44  ;;  %4945 = vmatpush1.bf16.msra.mxu1 %v5895_v48 }
 0x5b6   :  { %4905 = vmatprep.subr.bf16.mxu0 %v5900_v50  ;;  %4946 = vmatprep.subr.bf16.mxu1 %v5903_v52 }
 0x5b9   :  { %4906 = vmatpush1.bf16.msra.mxu0 %v5898_v14  ;;  %4947 = vmatpush1.bf16.msra.mxu1 %v5901_v56 }
 0x5ba   :  { %4907 = vmatprep.subr.bf16.mxu0 %v5906_v18  ;;  %4948 = vmatprep.subr.bf16.mxu1 %v5909_v53 }
 0x5bd   :  { %4908 = vmatpush1.bf16.msra.mxu0 %v5904_v54  ;;  %4949 = vmatpush1.bf16.msra.mxu1 %v5907_v47 }
 0x5be   :  { %4909 = vmatprep.subr.bf16.mxu0 %v5912_v57  ;;  %4950 = vmatprep.subr.bf16.mxu1 %v5915_v58 }
 0x5c1   :  { %4910 = vmatpush1.bf16.msra.mxu0 %v5910_v13  ;;  %4951 = vmatpush1.bf16.msra.mxu1 %v5913_v61 }
 0x5c2   :  { %4911 = vmatprep.subr.bf16.mxu0 %v5918_v17  ;;  %4952 = vmatprep.subr.bf16.mxu1 %v5921_v62 }
 0x5c5   :  { %4912 = vmatpush1.bf16.msra.mxu0 %v5916_v1  ;;  %4953 = vmatpush1.bf16.msra.mxu1 %v5919_v3 }
 0x5c6   :  { %4913 = vmatprep.subr.bf16.mxu0 %v5924_v4  ;;  %4954 = vmatprep.subr.bf16.mxu1 %v5927_v59 }
 0x5c9   :  { %4914 = vmatpush2.bf16.msra.mxu0 %v5922_v5  ;;  %4955 = vmatpush2.bf16.msra.mxu1 %v5925_v63 }
 0x5ca   :  { %4915 = vmatprep.subr.bf16.mxu0 %v5930_v49  ;;  %4956 = vmatprep.subr.bf16.mxu1 %v5933_v8 }
 0x5cd   :  { %4916 = vmatpush2.bf16.msra.mxu0 %v5928_v9  ;;  %4957 = vmatpush2.bf16.msra.mxu1 %v5931_v10 }
 0x5ce   :  { %4917 = vmatprep.subr.bf16.mxu0 %v5936_v11  ;;  %4958 = vmatprep.subr.bf16.mxu1 %v5939_v12 }
 0x5d1   :  { %4918 = vmatpush2.bf16.msra.mxu0 %v5934_v55  ;;  %4959 = vmatpush2.bf16.msra.mxu1 %v5937_v15 }
 0x5d2   :  { %4919 = vmatprep.subr.bf16.mxu0 %v5942_v16  ;;  %4960 = vmatprep.subr.bf16.mxu1 %v5945_v19 }
 0x5d5   :  { %4920 = vmatpush2.bf16.msra.mxu0 %v5940_v21  ;;  %4961 = vmatpush2.bf16.msra.mxu1 %v5943_v22 }
 0x5d6   :  { %4921 = vmatprep.subr.bf16.mxu0 %v5948_v23  ;;  %4962 = vmatprep.subr.bf16.mxu1 %v5951_v24  ;;  %v5970_v23 = vld [vmem:[#allocation16 + $0x270] ss:$8 sps:$4 sm:$0xff]  }
 0x5d7   :  { %v5973_v24 = vld [vmem:[#allocation16 + $0x370] ss:$8 sps:$4 sm:$0xff]  }
 0x5d9   :  { %4922 = vmatpush2.bf16.msra.mxu0 %v5946_v6  ;;  %4963 = vmatpush2.bf16.msra.mxu1 %v5949_v25 }
 0x5da   :  { %4923 = vmatprep.subr.bf16.mxu0 %v5954_v26  ;;  %4964 = vmatprep.subr.bf16.mxu1 %v5957_v27 }
 0x5dd   :  { %4924 = vmatpush2.bf16.msra.mxu0 %v5952_v28  ;;  %4965 = vmatpush2.bf16.msra.mxu1 %v5955_v29  ;;  %v5978_v28 = vld [vmem:[#allocation16 + $0x264] ss:$8 sps:$4 sm:$0xff]  }
 0x5de   :  { %4925 = vmatprep.subr.bf16.mxu0 %v5960_v33  ;;  %4966 = vmatprep.subr.bf16.mxu1 %v5963_v30  ;;  %v5981_v29 = vld [vmem:[#allocation16 + $0x364] ss:$8 sps:$4 sm:$0xff]  }
 0x5e1   :  { %4926 = vmatpush2.bf16.msra.mxu0 %v5958_v32  ;;  %4967 = vmatpush2.bf16.msra.mxu1 %v5961_v31 }
 0x5e2   :  { %4927 = vmatprep.subr.bf16.mxu0 %v5966_v34  ;;  %4968 = vmatprep.subr.bf16.mxu1 %v5969_v35  ;;  %v5976_v34 = vld [vmem:[#allocation16 + $0x260] ss:$8 sps:$4 sm:$0xff]  }
 0x5e5   :  { %4928 = vmatpush2.bf16.msra.mxu0 %v5964_v36  ;;  %4969 = vmatpush2.bf16.msra.mxu1 %v5967_v41  ;;  %v5987_v41 = vld [vmem:[#allocation16 + $0x354] ss:$8 sps:$4 sm:$0xff]  }
 0x5e6   :  { %4979 = vmatprep.subr.bf16.mxu0 %v5972_v0  ;;  %5020 = vmatprep.subr.bf16.mxu1 %v5975_v39 }
 0x660   :  { %v3903_v42 = vpop.f32.mrf.mxu0  ;;  %v3944_v40 = vpop.f32.mrf.mxu1 }
 0x661   :  { %v4036_v44 = vrot.slane %v3903_v42, %v6455_v43  ;;  %v4044_v48 = vrot.slane %v3944_v40, %v6455_v43  ;;  %v4076_v50 = vrot.slane %v3903_v42, %v6488_v20  ;;  %v4084_v53 = vrot.slane %v3944_v40, %v6488_v20  ;;  %v5982_v42 = vld [vmem:[#allocation16 + $0x250] ss:$8 sps:$4 sm:$0xff]  }
 0x662   :  { %v3905_v52 = vpop.f32.mrf.mxu0  ;;  %v3946_v14 = vpop.f32.mrf.mxu1  ;;  %v5985_v40 = vld [vmem:[#allocation16 + $0x350] ss:$8 sps:$4 sm:$0xff]  }
 0x663   :  { %v4065_v56 = vmul.f32 %v4036_v44, %v6543_v2  ;;  %v4067_v18 = vmul.f32 %v4044_v48, %v6561_v38  ;;  %v4040_v54 = vrot.slane %v3905_v52, %v6455_v43  ;;  %v4048_v47 = vrot.slane %v3946_v14, %v6455_v43  ;;  %v5990_v44 = vld [vmem:[#allocation16 + $0x244] ss:$8 sps:$4 sm:$0xff]  }
 0x664   :  { %v3907_v57 = vpop.f32.mrf.mxu0  ;;  %v3948_v58 = vpop.f32.mrf.mxu1  ;;  %v4080_v62 = vrot.slane %v3905_v52, %v6488_v20  ;;  %v4088_v2 = vrot.slane %v3946_v14, %v6488_v20  ;;  %v5993_v48 = vld [vmem:[#allocation16 + $0x344] ss:$8 sps:$4 sm:$0xff]   ;;  %v5991_v52 = vld [vmem:[#allocation16 + $0x340] ss:$8 sps:$4 sm:$0xff]   ;;  %v5996_v14 = vld [vmem:[#allocation16 + $0x234] ss:$8 sps:$4 sm:$0xff]  }
 0x665   :  { %v4105_v13 = vadd.f32 %v4076_v50, %v4065_v56  ;;  %v4107_v61 = vadd.f32 %v4084_v53, %v4067_v18  ;;  %v4066_v17 = vmul.f32 %v4040_v54, %v6550_v7  ;;  %v4068_v1 = vmul.f32 %v4048_v47, %v6568_v45  ;;  %v5988_v50 = vld [vmem:[#allocation16 + $0x240] ss:$8 sps:$4 sm:$0xff]   ;;  %v5999_v56 = vld [vmem:[#allocation16 + $0x334] ss:$8 sps:$4 sm:$0xff]   ;;  %v5994_v18 = vld [vmem:[#allocation16 + $0x230] ss:$8 sps:$4 sm:$0xff]  }
 0x666   :  { %v3908_v3 = vpop.f32.mrf.mxu0  ;;  %v3949_v38 = vpop.f32.mrf.mxu1  ;;  %v5997_v53 = vld [vmem:[#allocation16 + $0x330] ss:$8 sps:$4 sm:$0xff]   ;;  %v6002_v54 = vld [vmem:[#allocation16 + $0x224] ss:$8 sps:$4 sm:$0xff]   ;;  %v6000_v57 = vld [vmem:[#allocation16 + $0x220] ss:$8 sps:$4 sm:$0xff]  }
 0x667   :  { %v4106_v4 = vadd.f32 %v4080_v62, %v4066_v17  ;;  %v4113_v59 = vmax.f32 %v4105_v13, 0.0  ;;  %v4115_v5 = vmax.f32 %v4107_v61, 0.0  ;;  %v4108_v63 = vadd.f32 %v4088_v2, %v4068_v1  ;;  %v6005_v47 = vld [vmem:[#allocation16 + $0x324] ss:$8 sps:$4 sm:$0xff]   ;;  %v6003_v58 = vld [vmem:[#allocation16 + $0x320] ss:$8 sps:$4 sm:$0xff]  }
 0x668   :  { %v6637_v49 = vpop.f32.mrf.mxu0  ;;  %v6639_v8 = vpop.f32.mrf.mxu1  ;;  %v6008_v13 = vld [vmem:[#allocation16 + $0x214] ss:$8 sps:$4 sm:$0xff]   ;;  %v6006_v17 = vld [vmem:[#allocation16 + $0x210] ss:$8 sps:$4 sm:$0xff]   ;;  %v6014_v1 = vld [vmem:[#allocation16 + $0x204] ss:$8 sps:$4 sm:$0xff]  }
 0x669   :  { %v4114_v9 = vmax.f32 %v4106_v4, 0.0  ;;  %v4116_v10 = vmax.f32 %v4108_v63, 0.0  ;;  %v4121_v55 = vpack.c.bf16 %v4113_v59, %v4113_v59  ;;  %v4123_v15 = vpack.c.bf16 %v4115_v5, %v4115_v5  ;;  %v6011_v61 = vld [vmem:[#allocation16 + $0x314] ss:$8 sps:$4 sm:$0xff]   ;;  %v6009_v62 = vld [vmem:[#allocation16 + $0x310] ss:$8 sps:$4 sm:$0xff]  }
 0x66a   :  { %v3987_v11 = vpop.f32.mrf.mxu0  ;;  %v4028_v7 = vpop.f32.mrf.mxu1  ;;  %v6017_v2 = vld [vmem:[#allocation16 + $0x304] ss:$8 sps:$4 sm:$0xff]   ;;  %v6012_v3 = vld [vmem:[#allocation16 + $0x200] ss:$8 sps:$4 sm:$0xff]   ;;  %v6020_v4 = vld [vmem:[#allocation16 + $0x2f4] ss:$8 sps:$4 sm:$0xff]  }
 0x66b   :  { %v4056_v12 = vrot.slane %v3987_v11, %v6455_v43  ;;  %v4064_v45 = vrot.slane %v4028_v7, %v6455_v43  ;;  %v4122_v21 = vpack.c.bf16 %v4114_v9, %v4114_v9  ;;  %v4124_v22 = vpack.c.bf16 %v4116_v10, %v4116_v10  ;;  %v6015_v38 = vld [vmem:[#allocation16 + $0x300] ss:$8 sps:$4 sm:$0xff]   ;;  %v6023_v59 = vld [vmem:[#allocation16 + $0x3f4] ss:$8 sps:$4 sm:$0xff]   ;;  %v6018_v5 = vld [vmem:[#allocation16 + $0x2f0] ss:$8 sps:$4 sm:$0xff]  }
 0x66c   :  { %v3989_v16 = vpop.f32.mrf.mxu0  ;;  %v4030_v19 = vpop.f32.mrf.mxu1  ;;  %v4096_v25 = vrot.slane %v3987_v11, %v6488_v20  ;;  %v4104_v27 = vrot.slane %v4028_v7, %v6488_v20  ;;  %v6021_v63 = vld [vmem:[#allocation16 + $0x3f0] ss:$8 sps:$4 sm:$0xff]   ;;  %v6026_v9 = vld [vmem:[#allocation16 + $0x2e4] ss:$8 sps:$4 sm:$0xff]   ;;  %v6024_v11 = vld [vmem:[#allocation16 + $0x2e0] ss:$8 sps:$4 sm:$0xff]  }
 0x66d   :  { %v4070_v6 = vmul.f32 %v4056_v12, %v6586_v60  ;;  %v4072_v26 = vmul.f32 %v4064_v45, %v6605_v46  ;;  %4929 = vmatprep.mubr.bf16.mxu0 %v4122_v21  ;;  %4970 = vmatprep.mubr.bf16.mxu1 %v4124_v22  ;;  %v5979_v60 = vld [vmem:[#allocation16 + $0x360] ss:$8 sps:$4 sm:$0xff]   ;;  %v5984_v46 = vld [vmem:[#allocation16 + $0x254] ss:$8 sps:$4 sm:$0xff]   ;;  %v6029_v10 = vld [vmem:[#allocation16 + $0x3e4] ss:$8 sps:$4 sm:$0xff]  }
 0x66e   :  { %v3990_v33 = vpop.f32.mrf.mxu0  ;;  %v4031_v30 = vpop.f32.mrf.mxu1  ;;  %4930 = vmatmul.mubr.bf16.vlgmr.msra.gmra.mxu0 %v4121_v55  ;;  %4971 = vmatmul.mubr.bf16.vlgmr.msra.gmra.mxu1 %v4123_v15  ;;  %v6027_v7 = vld [vmem:[#allocation16 + $0x3e0] ss:$8 sps:$4 sm:$0xff]   ;;  %v6032_v12 = vld [vmem:[#allocation16 + $0x2d4] ss:$8 sps:$4 sm:$0xff]   ;;  %v6030_v55 = vld [vmem:[#allocation16 + $0x2d0] ss:$8 sps:$4 sm:$0xff]  }
 0x66f   :  { %v4110_v32 = vadd.f32 %v4096_v25, %v4070_v6  ;;  %v4112_v31 = vadd.f32 %v4104_v27, %v4072_v26  ;;  %4980 = vmatpush1.bf16.msra.mxu0 %v5970_v23  ;;  %5021 = vmatpush1.bf16.msra.mxu1 %v5973_v24  ;;  %v6035_v45 = vld [vmem:[#allocation16 + $0x3d4] ss:$8 sps:$4 sm:$0xff]   ;;  %v6033_v15 = vld [vmem:[#allocation16 + $0x3d0] ss:$8 sps:$4 sm:$0xff]   ;;  %v6038_v16 = vld [vmem:[#allocation16 + $0x2c4] ss:$8 sps:$4 sm:$0xff]   ;;  %v4052_v26 = vrot.slane %v6637_v49, %v6455_v43 }
 0x670   :  { %4981 = vmatprep.subr.bf16.mxu0 %v5978_v28  ;;  %5022 = vmatprep.subr.bf16.mxu1 %v5981_v29  ;;  %v6041_v19 = vld [vmem:[#allocation16 + $0x3c4] ss:$8 sps:$4 sm:$0xff]   ;;  %v6036_v21 = vld [vmem:[#allocation16 + $0x2c0] ss:$8 sps:$4 sm:$0xff]   ;;  %v6044_v23 = vld [vmem:[#allocation16 + $0x2b4] ss:$8 sps:$4 sm:$0xff]   ;;  %v4060_v27 = vrot.slane %v6639_v8, %v6455_v43  ;;  %v4100_v43 = vrot.slane %v6639_v8, %v6488_v20 }
 0x671   :  { %v4118_v35 = vmax.f32 %v4110_v32, 0.0  ;;  %v4120_v36 = vmax.f32 %v4112_v31, 0.0  ;;  %v6039_v22 = vld [vmem:[#allocation16 + $0x3c0] ss:$8 sps:$4 sm:$0xff]   ;;  %v6047_v24 = vld [vmem:[#allocation16 + $0x3b4] ss:$8 sps:$4 sm:$0xff]   ;;  %v4069_v32 = vmul.f32 %v4052_v26, %v6579_v51 }
 0x672   :  { %v6042_v6 = vld [vmem:[#allocation16 + $0x2b0] ss:$8 sps:$4 sm:$0xff]   ;;  %v6050_v28 = vld [vmem:[#allocation16 + $0x2a4] ss:$8 sps:$4 sm:$0xff]   ;;  %v6048_v33 = vld [vmem:[#allocation16 + $0x2a0] ss:$8 sps:$4 sm:$0xff]   ;;  %v4071_v31 = vmul.f32 %v4060_v27, %v6598_v37 }
 0x673   :  { %v4126_v0 = vpack.c.bf16 %v4118_v35, %v4118_v35  ;;  %v4128_v39 = vpack.c.bf16 %v4120_v36, %v4120_v36  ;;  %4982 = vmatpush1.bf16.msra.mxu0 %v5976_v34  ;;  %5023 = vmatpush1.bf16.msra.mxu1 %v5979_v60  ;;  %v6045_v25 = vld [vmem:[#allocation16 + $0x3b0] ss:$8 sps:$4 sm:$0xff]   ;;  %v6053_v29 = vld [vmem:[#allocation16 + $0x3a4] ss:$8 sps:$4 sm:$0xff]   ;;  %v6051_v30 = vld [vmem:[#allocation16 + $0x3a0] ss:$8 sps:$4 sm:$0xff]   ;;  %v4092_v35 = vrot.slane %v6637_v49, %v6488_v20 }
 0x674   :  { %4983 = vmatprep.subr.bf16.mxu0 %v5984_v46  ;;  %5024 = vmatprep.subr.bf16.mxu1 %v5987_v41  ;;  %v6056_v34 = vld [vmem:[#allocation16 + $0x294] ss:$8 sps:$4 sm:$0xff]   ;;  %v6054_v36 = vld [vmem:[#allocation16 + $0x290] ss:$8 sps:$4 sm:$0xff]   ;;  %v6062_v51 = vld [vmem:[#allocation16 + $0x284] ss:$8 sps:$4 sm:$0xff]  }
 0x675   :  { %5011 = vmatprep.mubr.bf16.mxu0 %v4126_v0  ;;  %5052 = vmatprep.mubr.bf16.mxu1 %v4128_v39  ;;  %v6059_v60 = vld [vmem:[#allocation16 + $0x394] ss:$8 sps:$4 sm:$0xff]   ;;  %v6057_v46 = vld [vmem:[#allocation16 + $0x390] ss:$8 sps:$4 sm:$0xff]   ;;  %v4109_v41 = vadd.f32 %v4092_v35, %v4069_v32  ;;  %v4111_v0 = vadd.f32 %v4100_v43, %v4071_v31  ;;  %v6065_v37 = vld [vmem:[#allocation16 + $0x384] ss:$8 sps:$4 sm:$0xff]  }
 0x676   :  { %v6060_v39 = vld [vmem:[#allocation16 + $0x280] ss:$8 sps:$4 sm:$0xff]  }
 0x677   :  { %4984 = vmatpush1.bf16.msra.mxu0 %v5982_v42  ;;  %5025 = vmatpush1.bf16.msra.mxu1 %v5985_v40  ;;  %v6063_v42 = vld [vmem:[#allocation16 + $0x380] ss:$8 sps:$4 sm:$0xff]   ;;  %v4117_v40 = vmax.f32 %v4109_v41, 0.0 }
 0x678   :  { %4985 = vmatprep.subr.bf16.mxu0 %v5990_v44  ;;  %5026 = vmatprep.subr.bf16.mxu1 %v5993_v48  ;;  %v4119_v44 = vmax.f32 %v4111_v0, 0.0 }
 0x679   :  { %v4125_v20 = vpack.c.bf16 %v4117_v40, %v4117_v40 }
 0x67a   :  { %v4127_v49 = vpack.c.bf16 %v4119_v44, %v4119_v44 }
 0x67b   :  { %4986 = vmatpush1.bf16.msra.mxu0 %v5988_v50  ;;  %5027 = vmatpush1.bf16.msra.mxu1 %v5991_v52 }
 0x67c   :  { %4987 = vmatprep.subr.bf16.mxu0 %v5996_v14  ;;  %5028 = vmatprep.subr.bf16.mxu1 %v5999_v56 }
 0x67f   :  { %4988 = vmatpush1.bf16.msra.mxu0 %v5994_v18  ;;  %5029 = vmatpush1.bf16.msra.mxu1 %v5997_v53 }
 0x680   :  { %4989 = vmatprep.subr.bf16.mxu0 %v6002_v54  ;;  %5030 = vmatprep.subr.bf16.mxu1 %v6005_v47 }
 0x683   :  { %4990 = vmatpush1.bf16.msra.mxu0 %v6000_v57  ;;  %5031 = vmatpush1.bf16.msra.mxu1 %v6003_v58 }
 0x684   :  { %4991 = vmatprep.subr.bf16.mxu0 %v6008_v13  ;;  %5032 = vmatprep.subr.bf16.mxu1 %v6011_v61 }
 0x687   :  { %4992 = vmatpush1.bf16.msra.mxu0 %v6006_v17  ;;  %5033 = vmatpush1.bf16.msra.mxu1 %v6009_v62 }
 0x688   :  { %4993 = vmatprep.subr.bf16.mxu0 %v6014_v1  ;;  %5034 = vmatprep.subr.bf16.mxu1 %v6017_v2 }
 0x68b   :  { %4994 = vmatpush1.bf16.msra.mxu0 %v6012_v3  ;;  %5035 = vmatpush1.bf16.msra.mxu1 %v6015_v38 }
 0x68c   :  { %4995 = vmatprep.subr.bf16.mxu0 %v6020_v4  ;;  %5036 = vmatprep.subr.bf16.mxu1 %v6023_v59 }
 0x68f   :  { %4996 = vmatpush2.bf16.msra.mxu0 %v6018_v5  ;;  %5037 = vmatpush2.bf16.msra.mxu1 %v6021_v63 }
 0x690   :  { %4997 = vmatprep.subr.bf16.mxu0 %v6026_v9  ;;  %5038 = vmatprep.subr.bf16.mxu1 %v6029_v10 }
 0x693   :  { %4998 = vmatpush2.bf16.msra.mxu0 %v6024_v11  ;;  %5039 = vmatpush2.bf16.msra.mxu1 %v6027_v7 }
 0x694   :  { %4999 = vmatprep.subr.bf16.mxu0 %v6032_v12  ;;  %5040 = vmatprep.subr.bf16.mxu1 %v6035_v45 }
 0x697   :  { %5000 = vmatpush2.bf16.msra.mxu0 %v6030_v55  ;;  %5041 = vmatpush2.bf16.msra.mxu1 %v6033_v15 }
 0x698   :  { %5001 = vmatprep.subr.bf16.mxu0 %v6038_v16  ;;  %5042 = vmatprep.subr.bf16.mxu1 %v6041_v19 }
 0x69b   :  { %5002 = vmatpush2.bf16.msra.mxu0 %v6036_v21  ;;  %5043 = vmatpush2.bf16.msra.mxu1 %v6039_v22 }
 0x69c   :  { %5003 = vmatprep.subr.bf16.mxu0 %v6044_v23  ;;  %5044 = vmatprep.subr.bf16.mxu1 %v6047_v24 }
 0x69f   :  { %5004 = vmatpush2.bf16.msra.mxu0 %v6042_v6  ;;  %5045 = vmatpush2.bf16.msra.mxu1 %v6045_v25 }
 0x6a0   :  { %5005 = vmatprep.subr.bf16.mxu0 %v6050_v28  ;;  %5046 = vmatprep.subr.bf16.mxu1 %v6053_v29 }
 0x6a3   :  { %5006 = vmatpush2.bf16.msra.mxu0 %v6048_v33  ;;  %5047 = vmatpush2.bf16.msra.mxu1 %v6051_v30 }
 0x6a4   :  { %5007 = vmatprep.subr.bf16.mxu0 %v6056_v34  ;;  %5048 = vmatprep.subr.bf16.mxu1 %v6059_v60 }
 0x6a7   :  { %5008 = vmatpush2.bf16.msra.mxu0 %v6054_v36  ;;  %5049 = vmatpush2.bf16.msra.mxu1 %v6057_v46 }
 0x6a8   :  { %5009 = vmatprep.subr.bf16.mxu0 %v6062_v51  ;;  %5050 = vmatprep.subr.bf16.mxu1 %v6065_v37 }
 0x6ab   :  { %5010 = vmatpush2.bf16.msra.mxu0 %v6060_v39  ;;  %5051 = vmatpush2.bf16.msra.mxu1 %v6063_v42 }
 0x6ae   :  { %5012 = vmatmul.mubr.bf16.vlgmr.msra.gmra.mxu0 %v4125_v20  ;;  %5053 = vmatmul.mubr.bf16.vlgmr.msra.gmra.mxu1 %v4127_v49 }
 0x72e   :  { %v4931_v8 = vpop.f32.mrf.mxu0  ;;  %v4972_v48 = vpop.f32.mrf.mxu1 }
 0x72f   :  { %v4973_v50 = vadd.f32 %v4972_v48, %v4931_v8 }
 0x730   :  { %v4933_v52 = vpop.f32.mrf.mxu0  ;;  %v4974_v14 = vpop.f32.mrf.mxu1 }
 0x731   :  { %v4975_v58 = vadd.f32 %v4974_v14, %v4933_v52 }
 0x732   :  { %v4935_v56 = vpop.f32.mrf.mxu0  ;;  %v4976_v18 = vpop.f32.mrf.mxu1 }
 0x734   :  { %v4936_v53 = vpop.f32.mrf.mxu0  ;;  %v4977_v54 = vpop.f32.mrf.mxu1 }
 0x76e   :  { %v5013_v47 = vpop.f32.mrf.mxu0  ;;  %v5054_v57 = vpop.f32.mrf.mxu1 }
 0x76f   :  { %v5014_v13 = vadd.f32 %v5013_v47, %v4973_v50 }
 0x770   :  { %v5015_v61 = vpop.f32.mrf.mxu0  ;;  %v5056_v17 = vpop.f32.mrf.mxu1 }
 0x771   :  { %v5055_v62 = vadd.f32 %v5054_v57, %v5014_v13  ;;  %v5016_v1 = vadd.f32 %v5015_v61, %v4975_v58 }
 0x772   :  { %v5017_v2 = vpop.f32.mrf.mxu0  ;;  %v5058_v3 = vpop.f32.mrf.mxu1 }
 0x773   :  { %v5057_v38 = vadd.f32 %v5056_v17, %v5016_v1  ;;  %6070 = vtanh.f32 %v5055_v62 }
 0x774   :  { %v5018_v4 = vpop.f32.mrf.mxu0  ;;  %v5059_v59 = vpop.f32.mrf.mxu1 }
 0x775   :  { %6072 = vtanh.f32 %v5057_v38 }
 0x780   :  { %v6071_v5 = vpop.eup %6070 }
 0x782   :  { %v6073_v63 = vpop.eup %6072 }
 0x783   :  { %v5065_v9 = vcombine.low %v6071_v5, %v6073_v63 }
 0x785   :  { %5607 = vst.sshfl [vmem:[%s6670_s10] sm:$0x33 pattern:$0x76325410] %v5065_v9 }
 0x786   :  { %5079 = vsyncpa [#allocation3], 1 }
 0x787   :  { %5080 = vsyncpa [#allocation5], 1 }
 0x788   :  { %5081 = vsyncpa [#allocation8], 1 }
 0x789   :  { %5082 = vsyncpa [#allocation11], 1 }
 0x78a   :  { %5083 = vsyncpa [#allocation14], 1 }
 0x78b   :  { %5084 = vsyncpa [#allocation17], 1 }

</bundles_post_ra>
